<compile_context>
chip_gen: v7x
topology: tpu7x:2x2x1
jax: 0.10.0
libtpu: 0.0.40
codegen_flags: <defaults>
</compile_context>

<pallas_src>
import functools

import jax
import jax.numpy as jnp
from jax.experimental import pallas as pl
from jax.experimental.pallas import tpu as pltpu

EPS = 1e-5          # PyTorch LayerNorm default
NEG_INF = -1e30     # additive mask for non-edges


# --------------------------------------------------------------------------- small helpers
def _ln(x, g, b):
    """LayerNorm over the last dim; g, b broadcast as [1, D]."""
    mu = jnp.mean(x, axis=-1, keepdims=True)
    var = jnp.mean((x - mu) ** 2, axis=-1, keepdims=True)
    return (x - mu) * jax.lax.rsqrt(var + EPS) * g + b


def _softmax_lastdim(e):
    e = e - jnp.max(e, axis=-1, keepdims=True)
    p = jnp.exp(e)
    return p * pl.reciprocal(jnp.sum(p, axis=-1, keepdims=True), approx=True)


# --------------------------------------------------------------------------- MSA stack
# vecD row packing (width D):
#   0 r_ln1g  1 r_ln1b  2 r_bo  3 r_ln2g  4 r_ln2b
#   5 c_ln1g  6 c_ln1b  7 c_bo  8 c_ln2g  9 c_ln2b  10 nb_g  11 nb_b
# vecI row packing (width inner): 0 r_bg  1 c_bg
def _msa_stack_kernel(x_ref, wrow_ref, wcol_ref, rwo_ref, cwo_ref, vecd_ref, veci_ref,
                      o_ref, *, heads, dim_head):
    l = pl.program_id(1)

    @pl.when(l == 0)
    def _():
        o_ref[...] = x_ref[...]          # layer-0 input; activation stays resident over l

    _, S, R, D = o_ref.shape
    inner = heads * dim_head
    x3 = o_ref[0].astype(jnp.float32)                                   # [S, R, D]
    x0 = x3.reshape(S * R, D)
    vd = vecd_ref[0]                                                    # [12, D]
    vi = veci_ref[0]                                                    # [2, inner]

    # ---- tied row attention over the sequence axis S (exact: mean of v over S) --------
    xn = _ln(x0, vd[0:1], vd[1:2])                                      # AxialAttention.norm
    pr = jnp.dot(xn.astype(jnp.bfloat16), wrow_ref[0],
                 preferred_element_type=jnp.float32)                    # [S*R, 2*inner]
    v_r = pr[:, :inner]
    g_r = jax.nn.sigmoid(pr[:, inner:] + vi[0:1])
    mv = jnp.mean(v_r.reshape(S, R, inner), axis=0)                     # [R, inner]
    gated = (mv[None, :, :] * g_r.reshape(S, R, inner)).reshape(S * R, inner)
    row = jnp.dot(gated.astype(jnp.bfloat16), rwo_ref[0],
                  preferred_element_type=jnp.float32) + vd[2:3]
    x1 = _ln(xn + row, vd[3:4], vd[4:5])                                # Attention.norm

    # ---- column attention over MSA rows R, batched over leading S ---------------------
    yn = _ln(x1, vd[5:6], vd[6:7])
    pc = jnp.dot(yn.astype(jnp.bfloat16), wcol_ref[0],
                 preferred_element_type=jnp.float32)                    # [S*R, 4*inner]
    q = pc[:, :inner].reshape(S, R, inner)                              # scale pre-folded
    k = pc[:, inner:2 * inner].reshape(S, R, inner)
    v = pc[:, 2 * inner:3 * inner].reshape(S, R, inner)
    g = jax.nn.sigmoid(pc[:, 3 * inner:] + vi[1:2]).reshape(S, R, inner)

    outs = []
    for h in range(heads):                                              # static, tiny
        lo, hi = h * dim_head, (h + 1) * dim_head
        dots = jnp.einsum('sid,sjd->sij',
                          q[:, :, lo:hi].astype(jnp.bfloat16),
                          k[:, :, lo:hi].astype(jnp.bfloat16),
                          preferred_element_type=jnp.float32)           # [S, R, R]
        attn = _softmax_lastdim(dots)
        outs.append(jnp.einsum('sij,sjd->sid', attn.astype(jnp.bfloat16),
                               v[:, :, lo:hi].astype(jnp.bfloat16),
                               preferred_element_type=jnp.float32))     # [S, R, Dh]
    o_all = (jnp.concatenate(outs, axis=-1) * g).reshape(S * R, inner)  # gate, then 1 proj
    col = jnp.dot(o_all.astype(jnp.bfloat16), cwo_ref[0],
                  preferred_element_type=jnp.float32) + vd[7:8]
    x2 = _ln(yn + col, vd[8:9], vd[9:10])

    # ---- CoreModel residual + LayerNorm ------------------------------------------------
    out = _ln(x2 + x0, vd[10:11], vd[11:12])
    o_ref[0] = out.reshape(S, R, D).astype(o_ref.dtype)


def msa_stack(x, layers, *, heads, dim_head):
    """x: [B, S, R, D] (transposed layout).  Applies all MSA blocks, returns same shape."""
    if not layers:
        return x
    B, S, R, D = x.shape
    L = len(layers)
    inner = heads * dim_head
    scale = dim_head ** (-0.5)

    w_row, w_col, r_wo, c_wo, vecd, veci = [], [], [], [], [], []
    for layer in layers:
        r, c = layer["row_attn"], layer["col_attn"]
        # tied path: q & k projections are dead (exact) -> only v | gate
        w_row.append(jnp.concatenate([r["wkv"][:, inner:], r["wg"]], axis=1))
        # fused q|k|v|gate projection; scale folded into wq
        w_col.append(jnp.concatenate([c["wq"] * scale, c["wkv"][:, :inner],
                                      c["wkv"][:, inner:], c["wg"]], axis=1))
        r_wo.append(r["wo"])
        c_wo.append(c["wo"])
        vecd.append(jnp.stack([r["ln1_g"][0], r["ln1_b"][0], r["bo"][0],
                               r["ln2_g"][0], r["ln2_b"][0],
                               c["ln1_g"][0], c["ln1_b"][0], c["bo"][0],
                               c["ln2_g"][0], c["ln2_b"][0],
                               layer["norm_g"][0], layer["norm_b"][0]]))
        veci.append(jnp.stack([r["bg"][0], c["bg"][0]]))
    w_row = jnp.stack(w_row).astype(jnp.bfloat16)          # [L, D, 2*inner]
    w_col = jnp.stack(w_col).astype(jnp.bfloat16)          # [L, D, 4*inner]
    r_wo = jnp.stack(r_wo).astype(jnp.bfloat16)            # [L, inner, D]
    c_wo = jnp.stack(c_wo).astype(jnp.bfloat16)            # [L, inner, D]
    vecd = jnp.stack(vecd)                                  # [L, 12, D]
    veci = jnp.stack(veci)                                  # [L, 2, inner]

    kernel = functools.partial(_msa_stack_kernel, heads=heads, dim_head=dim_head)
    return pl.pallas_call(
        kernel,
        out_shape=jax.ShapeDtypeStruct((B, S, R, D), jnp.float32),
        grid=(B, L),
        in_specs=[
            pl.BlockSpec((1, S, R, D), lambda b, l: (b, 0, 0, 0)),
            pl.BlockSpec((1, D, 2 * inner), lambda b, l: (l, 0, 0)),
            pl.BlockSpec((1, D, 4 * inner), lambda b, l: (l, 0, 0)),
            pl.BlockSpec((1, inner, D), lambda b, l: (l, 0, 0)),
            pl.BlockSpec((1, inner, D), lambda b, l: (l, 0, 0)),
            pl.BlockSpec((1, 12, D), lambda b, l: (l, 0, 0)),
            pl.BlockSpec((1, 2, inner), lambda b, l: (l, 0, 0)),
        ],
        out_specs=pl.BlockSpec((1, S, R, D), lambda b, l: (b, 0, 0, 0)),
        compiler_params=pltpu.CompilerParams(
            dimension_semantics=("parallel", "arbitrary")),
    )(x, w_row, w_col, r_wo, c_wo, vecd, veci)


# --------------------------------------------------------------------------- GNN stack
# vec row packing (width D): 0 att_src  1 att_dst  2 bias  3 norm_g  4 norm_b
def _gnn_stack_kernel(x_ref, pos_ref, fcw_ref, fcb_ref, mask_ref, w_ref, vec_ref, o_ref):
    l = pl.program_id(1)

    @pl.when(l == 0)
    def _():
        # fused positional add + fc + residual produces the layer-0 base activation
        y = x_ref[0].astype(jnp.float32) + pos_ref[...]
        emb = jnp.dot(y.astype(jnp.bfloat16), fcw_ref[...],
                      preferred_element_type=jnp.float32) + fcb_ref[...] + y
        o_ref[0] = emb.astype(o_ref.dtype)

    base = o_ref[0].astype(jnp.float32)                                 # [S, D]
    vd = vec_ref[0]                                                     # [5, D]
    h = jnp.dot(base.astype(jnp.bfloat16), w_ref[0],
                preferred_element_type=jnp.float32)                     # [S, D]
    a_src = jnp.sum(h * vd[0:1], axis=-1, keepdims=True)                # [S, 1]
    a_dst = jnp.sum(h * vd[1:2], axis=-1, keepdims=True)                # [S, 1]
    e = a_dst + jnp.transpose(a_src)                                    # e[i,j]=dst_i+src_j
    e = jnp.maximum(e, 0.2 * e) + mask_ref[0]                           # leaky_relu + mask
    attn = _softmax_lastdim(e)
    gat = jnp.dot(attn.astype(jnp.bfloat16), h.astype(jnp.bfloat16),
                  preferred_element_type=jnp.float32) + vd[2:3]
    o_ref[0] = _ln(gat + base, vd[3:4], vd[4:5]).astype(o_ref.dtype)    # residual + LN


def gnn_stack(x, pos, fc_w, fc_b, mask_bias, gnn_layers):
    """x: [B, S, D] core output (first MSA row).  pos+fc fused into GAT layer 0."""
    B, S, D = x.shape
    if not gnn_layers:                    # fallback: just pos + fc + residual
        y = x + pos[None]
        return jnp.dot(y, fc_w) + fc_b + y
    Lg = len(gnn_layers)
    w = jnp.stack([g["w"] for g in gnn_layers]).astype(jnp.bfloat16)    # [Lg, D, D]
    vec = jnp.stack([jnp.stack([g["att_src"][0], g["att_dst"][0], g["bias"][0],
                                g["norm_g"][0], g["norm_b"][0]])
                     for g in gnn_layers])                              # [Lg, 5, D]
    return pl.pallas_call(
        _gnn_stack_kernel,
        out_shape=jax.ShapeDtypeStruct((B, S, D), jnp.float32),
        grid=(B, Lg),
        in_specs=[
            pl.BlockSpec((1, S, D), lambda b, l: (b, 0, 0)),
            pl.BlockSpec((S, D), lambda b, l: (0, 0)),
            pl.BlockSpec((D, D), lambda b, l: (0, 0)),
            pl.BlockSpec((1, D), lambda b, l: (0, 0)),
            pl.BlockSpec((1, S, S), lambda b, l: (b, 0, 0)),
            pl.BlockSpec((1, D, D), lambda b, l: (l, 0, 0)),
            pl.BlockSpec((1, 5, D), lambda b, l: (l, 0, 0)),
        ],
        out_specs=pl.BlockSpec((1, S, D), lambda b, l: (b, 0, 0)),
        compiler_params=pltpu.CompilerParams(
            dimension_semantics=("parallel", "arbitrary")),
    )(x, pos, fc_w.astype(jnp.bfloat16), fc_b, mask_bias, w, vec)


# --------------------------------------------------------------------------- interface stack
# vecD row packing (width D): 0 ln1_g 1 ln1_b 2 bo 3 ln2_g 4 ln2_b 5 norm_g 6 norm_b
def _interface_stack_kernel(x_ref, win_ref, wo_ref, vecd_ref, veci_ref, o_ref, *, inner):
    l = pl.program_id(1)

    @pl.when(l == 0)
    def _():
        o_ref[...] = x_ref[...]

    x = o_ref[0].astype(jnp.float32)                                    # [N, D]
    vd = vecd_ref[0]                                                    # [7, D]
    bg = veci_ref[0]                                                    # [1, inner]
    xn = _ln(x, vd[0:1], vd[1:2])
    pr = jnp.dot(xn.astype(jnp.bfloat16), win_ref[0],
                 preferred_element_type=jnp.float32)                    # [N, 2*inner]
    v = pr[:, :inner]
    g = jax.nn.sigmoid(pr[:, inner:] + bg)
    mv = jnp.mean(v, axis=0, keepdims=True)                             # tied -> mean of v
    out = jnp.dot((mv * g).astype(jnp.bfloat16), wo_ref[0],
                  preferred_element_type=jnp.float32) + vd[2:3]
    row = _ln(xn + out, vd[3:4], vd[4:5])
    o_ref[0] = _ln(row + x, vd[5:6], vd[6:7]).astype(o_ref.dtype)


def interface_stack(x, layers, *, heads, dim_head):
    """x: [B, N, D] -> tied row attention + residual + LayerNorm, all layers in one call."""
    if not layers:
        return x
    B, N, D = x.shape
    Li = len(layers)
    inner = heads * dim_head
    w_in, wo, vecd, veci = [], [], [], []
    for layer in layers:
        a = layer["attn"]
        w_in.append(jnp.concatenate([a["wkv"][:, inner:], a["wg"]], axis=1))
        wo.append(a["wo"])
        vecd.append(jnp.stack([a["ln1_g"][0], a["ln1_b"][0], a["bo"][0],
                               a["ln2_g"][0], a["ln2_b"][0],
                               layer["norm_g"][0], layer["norm_b"][0]]))
        veci.append(a["bg"])
    w_in = jnp.stack(w_in).astype(jnp.bfloat16)             # [Li, D, 2*inner]
    wo = jnp.stack(wo).astype(jnp.bfloat16)                 # [Li, inner, D]
    vecd = jnp.stack(vecd)                                  # [Li, 7, D]
    veci = jnp.stack(veci)                                  # [Li, 1, inner]

    kernel = functools.partial(_interface_stack_kernel, inner=inner)
    return pl.pallas_call(
        kernel,
        out_shape=jax.ShapeDtypeStruct((B, N, D), jnp.float32),
        grid=(B, Li),
        in_specs=[
            pl.BlockSpec((1, N, D), lambda b, l: (b, 0, 0)),
            pl.BlockSpec((1, D, 2 * inner), lambda b, l: (l, 0, 0)),
            pl.BlockSpec((1, inner, D), lambda b, l: (l, 0, 0)),
            pl.BlockSpec((1, 7, D), lambda b, l: (l, 0, 0)),
            pl.BlockSpec((1, 1, inner), lambda b, l: (l, 0, 0)),
        ],
        out_specs=pl.BlockSpec((1, N, D), lambda b, l: (b, 0, 0)),
        compiler_params=pltpu.CompilerParams(
            dimension_semantics=("parallel", "arbitrary")),
    )(x, w_in, wo, vecd, veci)


# --------------------------------------------------------------------------- plain-JAX glue
def edges_to_maskbias(edges, seq_len):
    """edges: [B, 2, E] int32, -1 padded (source row checked, like the reference).
    Returns additive mask bias [B, S, S]: 0 where edge (target i <- source j), else -1e30."""
    B, _, E = edges.shape
    src = edges[:, 0, :]
    dst = edges[:, 1, :]
    valid = (src >= 0)
    src_c = jnp.where(valid, src, 0)
    dst_c = jnp.where(valid, dst, 0)
    b_idx = jnp.broadcast_to(jnp.arange(B)[:, None], (B, E))
    adj = jnp.zeros((B, seq_len, seq_len), jnp.float32)
    adj = adj.at[b_idx, dst_c, src_c].max(valid.astype(jnp.float32))    # adj[target, source]
    adj = jnp.maximum(adj, jnp.eye(seq_len, dtype=jnp.float32)[None])   # add_self_loops
    return jnp.where(adj > 0, 0.0, NEG_INF).astype(jnp.float32)


def cg_model(seqs, edges, params, *, heads, dim_head):
    # seqs: [B, R, S] int32.  Work in transposed [B, S, R, D] layout (transpose the tiny int
    # index tensor, not the features) so both axial attentions are transpose-free in-kernel.
    B, R, S = seqs.shape
    seqs_t = jnp.transpose(seqs, (0, 2, 1))                             # [B, S, R]
    x = params["core"]["embedding"][seqs_t]                             # [B, S, R, D]
    x = msa_stack(x, params["core"]["layers"], heads=heads, dim_head=dim_head)
    x = x[:, :, 0, :]                                                   # first MSA row [B,S,D]
    mask_bias = edges_to_maskbias(edges, S)
    return gnn_stack(x, params["pos_emb"][:S], params["fc_w"], params["fc_b"],
                     mask_bias, params["gnn"])                          # [B, S, D]


def mcs_forward(params, abseqs, agseqs, ab_edges, ag_edges, *, heads, dim_head):
    ab_out = cg_model(abseqs, ab_edges, params["ab"], heads=heads, dim_head=dim_head)
    ag_out = cg_model(agseqs, ag_edges, params["ag"], heads=heads, dim_head=dim_head)
    comb = jnp.concatenate([ab_out, ag_out], axis=1)                    # [B, Sab+Sag, D]
    comb = interface_stack(comb, params["int"], heads=heads, dim_head=dim_head)
    return comb[:, None, :, :]                                          # [B, 1, Stot, D]


# --------------------------------------------------------------------------- parameter init
def init_attention(key, dim, heads, dim_head=64):
    inner = heads * dim_head
    k1, k2, k3 = jax.random.split(key, 3)
    s = 0.05
    return dict(
        ln1_g=jnp.ones((1, dim), jnp.float32), ln1_b=jnp.zeros((1, dim), jnp.float32),
        wq=(jax.random.normal(k1, (dim, inner)) * s).astype(jnp.float32),
        wkv=(jax.random.normal(k2, (dim, 2 * inner)) * s).astype(jnp.float32),
        wg=jnp.zeros((dim, inner), jnp.float32),             # nn.init.constant_(gating.weight, 0)
        bg=jnp.ones((1, inner), jnp.float32),                 # nn.init.constant_(gating.bias, 1)
        wo=(jax.random.normal(k3, (inner, dim)) * s).astype(jnp.float32),
        bo=jnp.zeros((1, dim), jnp.float32),
        ln2_g=jnp.ones((1, dim), jnp.float32), ln2_b=jnp.zeros((1, dim), jnp.float32),
    )


def init_gat(key, dim):
    k1, k2, k3 = jax.random.split(key, 3)
    s = 0.05
    return dict(
        w=(jax.random.normal(k1, (dim, dim)) * s).astype(jnp.float32),
        att_src=(jax.random.normal(k2, (1, dim)) * s).astype(jnp.float32),
        att_dst=(jax.random.normal(k3, (1, dim)) * s).astype(jnp.float32),
        bias=jnp.zeros((1, dim), jnp.float32),
        norm_g=jnp.ones((1, dim), jnp.float32), norm_b=jnp.zeros((1, dim), jnp.float32),
    )


def init_cg(key, vocab, seq_len, dim, heads, dim_head, num_layers, num_gnn):
    keys = jax.random.split(key, 3 + num_layers + num_gnn)
    emb = (jax.random.normal(keys[0], (vocab, dim)) * 0.1).astype(jnp.float32)
    emb = emb.at[0].set(0.0)                                  # padding_idx=0
    layers = []
    for i in range(num_layers):
        kr, kc = jax.random.split(keys[1 + i])
        layers.append(dict(
            row_attn=init_attention(kr, dim, heads, dim_head),
            col_attn=init_attention(kc, dim, heads, dim_head),
            norm_g=jnp.ones((1, dim), jnp.float32), norm_b=jnp.zeros((1, dim), jnp.float32),
        ))
    kpos, kfc = jax.random.split(keys[1 + num_layers])
    gnn = [init_gat(keys[2 + num_layers + i], dim) for i in range(num_gnn)]
    return dict(
        core=dict(embedding=emb, layers=layers),
        pos_emb=(jax.random.uniform(kpos, (seq_len, dim), minval=-0.1, maxval=0.1)
                 ).astype(jnp.float32),
        fc_w=(jax.random.normal(kfc, (dim, dim)) * 0.05).astype(jnp.float32),
        fc_b=jnp.zeros((1, dim), jnp.float32),
        gnn=gnn,
    )


def init_mcs(key, vocab, ab_len, ag_len, dim, heads, dim_head, num_layers, num_gnn, num_int):
    kab, kag, kint = jax.random.split(key, 3)
    int_layers = []
    for i in range(num_int):
        ki = jax.random.fold_in(kint, i)
        int_layers.append(dict(
            attn=init_attention(ki, dim, heads, dim_head),
            norm_g=jnp.ones((1, dim), jnp.float32), norm_b=jnp.zeros((1, dim), jnp.float32),
        ))
    return dict(
        ab=init_cg(kab, vocab, ab_len, dim, heads, dim_head, num_layers, num_gnn),
        ag=init_cg(kag, vocab, ag_len, dim, heads, dim_head, num_layers, num_gnn),
        int=int_layers,
    )


def make_chain_edges(B, S, max_edges):
    src = list(range(S - 1)) + [-1] * (max_edges - (S - 1))
    dst = list(range(1, S)) + [-1] * (max_edges - (S - 1))
    e = jnp.array([src, dst], dtype=jnp.int32)                # [2, max_edges]
    return jnp.tile(e[None], (B, 1, 1))


# --------------------------------------------------------------------------- main
if __name__ == "__main__":
    vocab_size = 12
    ab_seq_len = 8
    ag_seq_len = 8
    embed_dim = 32
    num_heads = 2
    dim_head = 64
    num_layers = 1
    num_gnn_layers = 1
    num_int_layers = 1
    B, R = 2, 8                                               # batch, MSA rows

    key = jax.random.PRNGKey(0)
    kp, ks1, ks2 = jax.random.split(key, 3)
    params = init_mcs(kp, vocab_size, ab_seq_len, ag_seq_len, embed_dim, num_heads,
                      dim_head, num_layers, num_gnn_layers, num_int_layers)

    absequences = jax.random.randint(ks1, (B, R, ab_seq_len), 0, vocab_size, dtype=jnp.int32)
    agsequences = jax.random.randint(ks2, (B, R, ag_seq_len), 0, vocab_size, dtype=jnp.int32)
    ab_edges = make_chain_edges(B, ab_seq_len, max_edges=10)
    ag_edges = make_chain_edges(B, ag_seq_len, max_edges=10)

    # heads / dim_head are static Python ints (kept out of the traced pytree).
    fwd = jax.jit(functools.partial(mcs_forward, heads=num_heads, dim_head=dim_head))
    out = fwd(params, absequences, agsequences, ab_edges, ag_edges)
    out = jax.block_until_ready(out)
    assert out.shape == (B, 1, ab_seq_len + ag_seq_len, embed_dim)
    assert bool(jnp.all(jnp.isfinite(out)))
    print("KERNEL_OK")
</pallas_src>

<mosaic_0001>
module attributes {stable_mosaic.version = 11 : i64} {
  func.func @_msa_stack_kernel(%arg0: i32, %arg1: i32, %arg2: memref<1x8x8x32xf32, #tpu.memory_space<vmem>>, %arg3: memref<1x32x256xbf16, #tpu.memory_space<vmem>>, %arg4: memref<1x32x512xbf16, #tpu.memory_space<vmem>>, %arg5: memref<1x128x32xbf16, #tpu.memory_space<vmem>>, %arg6: memref<1x128x32xbf16, #tpu.memory_space<vmem>>, %arg7: memref<1x12x32xf32, #tpu.memory_space<vmem>>, %arg8: memref<1x2x128xf32, #tpu.memory_space<vmem>>, %arg9: memref<1x8x8x32xf32, #tpu.memory_space<vmem>>) attributes {dimension_semantics = [#tpu.dimension_semantics<parallel>, #tpu.dimension_semantics<arbitrary>], iteration_bounds = array<i64: 2, 1>, scalar_prefetch = 0 : i64, scratch_operands = 0 : i64, tpu.core_type = #tpu.core_type<tc>, window_params = [{transform_indices = @transform_0, window_bounds = array<i64: 1, 8, 8, 32>}, {transform_indices = @transform_1, window_bounds = array<i64: 1, 32, 256>}, {transform_indices = @transform_2, window_bounds = array<i64: 1, 32, 512>}, {transform_indices = @transform_3, window_bounds = array<i64: 1, 128, 32>}, {transform_indices = @transform_4, window_bounds = array<i64: 1, 128, 32>}, {transform_indices = @transform_5, window_bounds = array<i64: 1, 12, 32>}, {transform_indices = @transform_6, window_bounds = array<i64: 1, 2, 128>}, {transform_indices = @transform_7, window_bounds = array<i64: 1, 8, 8, 32>}]} {
    %c0_i32 = arith.constant 0 : i32
    %0 = arith.cmpi eq, %arg1, %c0_i32 : i32
    %1 = arith.extui %0 : i1 to i32
    %c0_i32_0 = arith.constant 0 : i32
    %2 = arith.cmpi ne, %1, %c0_i32_0 : i32
    scf.if %2 {
      %c0_66 = arith.constant 0 : index
      %c0_67 = arith.constant 0 : index
      %c0_68 = arith.constant 0 : index
      %c0_69 = arith.constant 0 : index
      %235 = vector.load %arg2[%c0_66, %c0_67, %c0_68, %c0_69] : memref<1x8x8x32xf32, #tpu.memory_space<vmem>>, vector<1x8x8x32xf32>
      %c0_70 = arith.constant 0 : index
      %c0_71 = arith.constant 0 : index
      %c0_72 = arith.constant 0 : index
      %c0_73 = arith.constant 0 : index
      %236 = vector.load %arg9[%c0_70, %c0_71, %c0_72, %c0_73] : memref<1x8x8x32xf32, #tpu.memory_space<vmem>>, vector<1x8x8x32xf32>
      tpu.vector_store %arg9[%c0_70, %c0_71, %c0_72, %c0_73], %235 {strides = array<i32>} : memref<1x8x8x32xf32, #tpu.memory_space<vmem>>, vector<1x8x8x32xf32>,
    } else {
    }
    %c0 = arith.constant 0 : index
    %c0_1 = arith.constant 0 : index
    %c0_2 = arith.constant 0 : index
    %c0_3 = arith.constant 0 : index
    %3 = vector.load %arg9[%c0, %c0_1, %c0_2, %c0_3] : memref<1x8x8x32xf32, #tpu.memory_space<vmem>>, vector<1x8x8x32xf32>
    %4 = vector.shape_cast %3 : vector<1x8x8x32xf32> to vector<8x8x32xf32>
    %5 = vector.shape_cast %4 : vector<8x8x32xf32> to vector<64x32xf32>
    %c0_4 = arith.constant 0 : index
    %c0_5 = arith.constant 0 : index
    %c0_6 = arith.constant 0 : index
    %6 = vector.load %arg7[%c0_4, %c0_5, %c0_6] : memref<1x12x32xf32, #tpu.memory_space<vmem>>, vector<1x12x32xf32>
    %7 = vector.shape_cast %6 : vector<1x12x32xf32> to vector<12x32xf32>
    %c0_7 = arith.constant 0 : index
    %c0_8 = arith.constant 0 : index
    %c0_9 = arith.constant 0 : index
    %8 = vector.load %arg8[%c0_7, %c0_8, %c0_9] : memref<1x2x128xf32, #tpu.memory_space<vmem>>, vector<1x2x128xf32>
    %9 = vector.shape_cast %8 : vector<1x2x128xf32> to vector<2x128xf32>
    %10 = vector.extract_strided_slice %7 {offsets = [0, 0], sizes = [1, 32], strides = [1, 1]} : vector<12x32xf32> to vector<1x32xf32>
    %11 = vector.extract_strided_slice %7 {offsets = [1, 0], sizes = [1, 32], strides = [1, 1]} : vector<12x32xf32> to vector<1x32xf32>
    %cst = arith.constant dense<0.000000e+00> : vector<64xf32>
    %12 = vector.multi_reduction <add>, %5, %cst [1] : vector<64x32xf32> to vector<64xf32>
    %13 = vector.shape_cast %12 : vector<64xf32> to vector<64x1xf32>
    %cst_10 = arith.constant 3.200000e+01 : f32
    %14 = vector.broadcast %cst_10 : f32 to vector<64x1xf32>
    %15 = arith.divf %13, %14 : vector<64x1xf32>
    %16 = vector.broadcast %15 : vector<64x1xf32> to vector<64x32xf32>
    %17 = arith.subf %5, %16 : vector<64x32xf32>
    %18 = arith.mulf %17, %17 : vector<64x32xf32>
    %cst_11 = arith.constant dense<0.000000e+00> : vector<64xf32>
    %19 = vector.multi_reduction <add>, %18, %cst_11 [1] : vector<64x32xf32> to vector<64xf32>
    %20 = vector.shape_cast %19 : vector<64xf32> to vector<64x1xf32>
    %cst_12 = arith.constant 3.200000e+01 : f32
    %21 = vector.broadcast %cst_12 : f32 to vector<64x1xf32>
    %22 = arith.divf %20, %21 : vector<64x1xf32>
    %23 = vector.broadcast %15 : vector<64x1xf32> to vector<64x32xf32>
    %24 = arith.subf %5, %23 : vector<64x32xf32>
    %cst_13 = arith.constant 9.99999974E-6 : f32
    %25 = vector.broadcast %cst_13 : f32 to vector<64x1xf32>
    %26 = arith.addf %22, %25 : vector<64x1xf32>
    %27 = math.rsqrt %26 : vector<64x1xf32>
    %28 = vector.broadcast %27 : vector<64x1xf32> to vector<64x32xf32>
    %29 = arith.mulf %24, %28 : vector<64x32xf32>
    %30 = vector.broadcast %10 : vector<1x32xf32> to vector<64x32xf32>
    %31 = arith.mulf %29, %30 : vector<64x32xf32>
    %32 = vector.broadcast %11 : vector<1x32xf32> to vector<64x32xf32>
    %33 = arith.addf %31, %32 : vector<64x32xf32>
    %34 = arith.truncf %33 : vector<64x32xf32> to vector<64x32xbf16>
    %c0_14 = arith.constant 0 : index
    %c0_15 = arith.constant 0 : index
    %c0_16 = arith.constant 0 : index
    %35 = vector.load %arg3[%c0_14, %c0_15, %c0_16] : memref<1x32x256xbf16, #tpu.memory_space<vmem>>, vector<1x32x256xbf16>
    %36 = vector.shape_cast %35 : vector<1x32x256xbf16> to vector<32x256xbf16>
    %cst_17 = arith.constant dense<0.000000e+00> : vector<64x256xf32>
    %37 = tpu.matmul %34, %36, %cst_17 {dimension_numbers = #tpu.dot_dimension_numbers<[1], [0], [0], [1], [0, 0, 1, 1], [], []>} : vector<64x32xbf16>, vector<32x256xbf16>, vector<64x256xf32> -> vector<64x256xf32>
    %38 = vector.extract_strided_slice %37 {offsets = [0, 0], sizes = [64, 128], strides = [1, 1]} : vector<64x256xf32> to vector<64x128xf32>
    %39 = vector.extract_strided_slice %37 {offsets = [0, 128], sizes = [64, 128], strides = [1, 1]} : vector<64x256xf32> to vector<64x128xf32>
    %40 = vector.extract_strided_slice %9 {offsets = [0, 0], sizes = [1, 128], strides = [1, 1]} : vector<2x128xf32> to vector<1x128xf32>
    %41 = vector.broadcast %40 : vector<1x128xf32> to vector<64x128xf32>
    %42 = arith.addf %39, %41 : vector<64x128xf32>
    %43 = arith.negf %42 : vector<64x128xf32>
    %44 = math.exp %43 : vector<64x128xf32>
    %cst_18 = arith.constant 1.000000e+00 : f32
    %45 = vector.broadcast %cst_18 : f32 to vector<64x128xf32>
    %46 = arith.addf %45, %44 : vector<64x128xf32>
    %47 = arith.divf %45, %46 : vector<64x128xf32>
    %48 = vector.shape_cast %38 : vector<64x128xf32> to vector<8x8x128xf32>
    %cst_19 = arith.constant dense<0.000000e+00> : vector<8x128xf32>
    %49 = vector.multi_reduction <add>, %48, %cst_19 [0] : vector<8x8x128xf32> to vector<8x128xf32>
    %cst_20 = arith.constant 8.000000e+00 : f32
    %50 = vector.broadcast %cst_20 : f32 to vector<8x128xf32>
    %51 = arith.divf %49, %50 : vector<8x128xf32>
    %52 = vector.shape_cast %51 : vector<8x128xf32> to vector<1x8x128xf32>
    %53 = vector.shape_cast %47 : vector<64x128xf32> to vector<8x8x128xf32>
    %54 = vector.broadcast %52 : vector<1x8x128xf32> to vector<8x8x128xf32>
    %55 = arith.mulf %54, %53 : vector<8x8x128xf32>
    %56 = vector.shape_cast %55 : vector<8x8x128xf32> to vector<64x128xf32>
    %57 = arith.truncf %56 : vector<64x128xf32> to vector<64x128xbf16>
    %c0_21 = arith.constant 0 : index
    %c0_22 = arith.constant 0 : index
    %c0_23 = arith.constant 0 : index
    %58 = vector.load %arg5[%c0_21, %c0_22, %c0_23] : memref<1x128x32xbf16, #tpu.memory_space<vmem>>, vector<1x128x32xbf16>
    %59 = vector.shape_cast %58 : vector<1x128x32xbf16> to vector<128x32xbf16>
    %cst_24 = arith.constant dense<0.000000e+00> : vector<64x32xf32>
    %60 = tpu.matmul %57, %59, %cst_24 {dimension_numbers = #tpu.dot_dimension_numbers<[1], [0], [0], [1], [0, 0, 1, 1], [], []>} : vector<64x128xbf16>, vector<128x32xbf16>, vector<64x32xf32> -> vector<64x32xf32>
    %61 = vector.extract_strided_slice %7 {offsets = [2, 0], sizes = [1, 32], strides = [1, 1]} : vector<12x32xf32> to vector<1x32xf32>
    %62 = vector.broadcast %61 : vector<1x32xf32> to vector<64x32xf32>
    %63 = arith.addf %60, %62 : vector<64x32xf32>
    %64 = arith.addf %33, %63 : vector<64x32xf32>
    %65 = vector.extract_strided_slice %7 {offsets = [3, 0], sizes = [1, 32], strides = [1, 1]} : vector<12x32xf32> to vector<1x32xf32>
    %66 = vector.extract_strided_slice %7 {offsets = [4, 0], sizes = [1, 32], strides = [1, 1]} : vector<12x32xf32> to vector<1x32xf32>
    %cst_25 = arith.constant dense<0.000000e+00> : vector<64xf32>
    %67 = vector.multi_reduction <add>, %64, %cst_25 [1] : vector<64x32xf32> to vector<64xf32>
    %68 = vector.shape_cast %67 : vector<64xf32> to vector<64x1xf32>
    %cst_26 = arith.constant 3.200000e+01 : f32
    %69 = vector.broadcast %cst_26 : f32 to vector<64x1xf32>
    %70 = arith.divf %68, %69 : vector<64x1xf32>
    %71 = vector.broadcast %70 : vector<64x1xf32> to vector<64x32xf32>
    %72 = arith.subf %64, %71 : vector<64x32xf32>
    %73 = arith.mulf %72, %72 : vector<64x32xf32>
    %cst_27 = arith.constant dense<0.000000e+00> : vector<64xf32>
    %74 = vector.multi_reduction <add>, %73, %cst_27 [1] : vector<64x32xf32> to vector<64xf32>
    %75 = vector.shape_cast %74 : vector<64xf32> to vector<64x1xf32>
    %cst_28 = arith.constant 3.200000e+01 : f32
    %76 = vector.broadcast %cst_28 : f32 to vector<64x1xf32>
    %77 = arith.divf %75, %76 : vector<64x1xf32>
    %78 = vector.broadcast %70 : vector<64x1xf32> to vector<64x32xf32>
    %79 = arith.subf %64, %78 : vector<64x32xf32>
    %cst_29 = arith.constant 9.99999974E-6 : f32
    %80 = vector.broadcast %cst_29 : f32 to vector<64x1xf32>
    %81 = arith.addf %77, %80 : vector<64x1xf32>
    %82 = math.rsqrt %81 : vector<64x1xf32>
    %83 = vector.broadcast %82 : vector<64x1xf32> to vector<64x32xf32>
    %84 = arith.mulf %79, %83 : vector<64x32xf32>
    %85 = vector.broadcast %65 : vector<1x32xf32> to vector<64x32xf32>
    %86 = arith.mulf %84, %85 : vector<64x32xf32>
    %87 = vector.broadcast %66 : vector<1x32xf32> to vector<64x32xf32>
    %88 = arith.addf %86, %87 : vector<64x32xf32>
    %89 = vector.extract_strided_slice %7 {offsets = [5, 0], sizes = [1, 32], strides = [1, 1]} : vector<12x32xf32> to vector<1x32xf32>
    %90 = vector.extract_strided_slice %7 {offsets = [6, 0], sizes = [1, 32], strides = [1, 1]} : vector<12x32xf32> to vector<1x32xf32>
    %cst_30 = arith.constant dense<0.000000e+00> : vector<64xf32>
    %91 = vector.multi_reduction <add>, %88, %cst_30 [1] : vector<64x32xf32> to vector<64xf32>
    %92 = vector.shape_cast %91 : vector<64xf32> to vector<64x1xf32>
    %cst_31 = arith.constant 3.200000e+01 : f32
    %93 = vector.broadcast %cst_31 : f32 to vector<64x1xf32>
    %94 = arith.divf %92, %93 : vector<64x1xf32>
    %95 = vector.broadcast %94 : vector<64x1xf32> to vector<64x32xf32>
    %96 = arith.subf %88, %95 : vector<64x32xf32>
    %97 = arith.mulf %96, %96 : vector<64x32xf32>
    %cst_32 = arith.constant dense<0.000000e+00> : vector<64xf32>
    %98 = vector.multi_reduction <add>, %97, %cst_32 [1] : vector<64x32xf32> to vector<64xf32>
    %99 = vector.shape_cast %98 : vector<64xf32> to vector<64x1xf32>
    %cst_33 = arith.constant 3.200000e+01 : f32
    %100 = vector.broadcast %cst_33 : f32 to vector<64x1xf32>
    %101 = arith.divf %99, %100 : vector<64x1xf32>
    %102 = vector.broadcast %94 : vector<64x1xf32> to vector<64x32xf32>
    %103 = arith.subf %88, %102 : vector<64x32xf32>
    %cst_34 = arith.constant 9.99999974E-6 : f32
    %104 = vector.broadcast %cst_34 : f32 to vector<64x1xf32>
    %105 = arith.addf %101, %104 : vector<64x1xf32>
    %106 = math.rsqrt %105 : vector<64x1xf32>
    %107 = vector.broadcast %106 : vector<64x1xf32> to vector<64x32xf32>
    %108 = arith.mulf %103, %107 : vector<64x32xf32>
    %109 = vector.broadcast %89 : vector<1x32xf32> to vector<64x32xf32>
    %110 = arith.mulf %108, %109 : vector<64x32xf32>
    %111 = vector.broadcast %90 : vector<1x32xf32> to vector<64x32xf32>
    %112 = arith.addf %110, %111 : vector<64x32xf32>
    %113 = arith.truncf %112 : vector<64x32xf32> to vector<64x32xbf16>
    %c0_35 = arith.constant 0 : index
    %c0_36 = arith.constant 0 : index
    %c0_37 = arith.constant 0 : index
    %114 = vector.load %arg4[%c0_35, %c0_36, %c0_37] : memref<1x32x512xbf16, #tpu.memory_space<vmem>>, vector<1x32x512xbf16>
    %115 = vector.shape_cast %114 : vector<1x32x512xbf16> to vector<32x512xbf16>
    %cst_38 = arith.constant dense<0.000000e+00> : vector<64x512xf32>
    %116 = tpu.matmul %113, %115, %cst_38 {dimension_numbers = #tpu.dot_dimension_numbers<[1], [0], [0], [1], [0, 0, 1, 1], [], []>} : vector<64x32xbf16>, vector<32x512xbf16>, vector<64x512xf32> -> vector<64x512xf32>
    %117 = vector.extract_strided_slice %116 {offsets = [0, 0], sizes = [64, 128], strides = [1, 1]} : vector<64x512xf32> to vector<64x128xf32>
    %118 = vector.shape_cast %117 : vector<64x128xf32> to vector<8x8x128xf32>
    %119 = vector.extract_strided_slice %116 {offsets = [0, 128], sizes = [64, 128], strides = [1, 1]} : vector<64x512xf32> to vector<64x128xf32>
    %120 = vector.shape_cast %119 : vector<64x128xf32> to vector<8x8x128xf32>
    %121 = vector.extract_strided_slice %116 {offsets = [0, 256], sizes = [64, 128], strides = [1, 1]} : vector<64x512xf32> to vector<64x128xf32>
    %122 = vector.shape_cast %121 : vector<64x128xf32> to vector<8x8x128xf32>
    %123 = vector.extract_strided_slice %116 {offsets = [0, 384], sizes = [64, 128], strides = [1, 1]} : vector<64x512xf32> to vector<64x128xf32>
    %124 = vector.extract_strided_slice %9 {offsets = [1, 0], sizes = [1, 128], strides = [1, 1]} : vector<2x128xf32> to vector<1x128xf32>
    %125 = vector.broadcast %124 : vector<1x128xf32> to vector<64x128xf32>
    %126 = arith.addf %123, %125 : vector<64x128xf32>
    %127 = arith.negf %126 : vector<64x128xf32>
    %128 = math.exp %127 : vector<64x128xf32>
    %cst_39 = arith.constant 1.000000e+00 : f32
    %129 = vector.broadcast %cst_39 : f32 to vector<64x128xf32>
    %130 = arith.addf %129, %128 : vector<64x128xf32>
    %131 = arith.divf %129, %130 : vector<64x128xf32>
    %132 = vector.shape_cast %131 : vector<64x128xf32> to vector<8x8x128xf32>
    %133 = vector.extract_strided_slice %118 {offsets = [0, 0, 0], sizes = [8, 8, 64], strides = [1, 1, 1]} : vector<8x8x128xf32> to vector<8x8x64xf32>
    %134 = arith.truncf %133 : vector<8x8x64xf32> to vector<8x8x64xbf16>
    %135 = vector.extract_strided_slice %120 {offsets = [0, 0, 0], sizes = [8, 8, 64], strides = [1, 1, 1]} : vector<8x8x128xf32> to vector<8x8x64xf32>
    %136 = arith.truncf %135 : vector<8x8x64xf32> to vector<8x8x64xbf16>
    "tpu.trace_start"() <{level = 10 : i32, message = "sid,sjd->sij"}> : () -> ()
    %cst_40 = arith.constant dense<0.000000e+00> : vector<8x8x8xf32>
    %137 = tpu.matmul %134, %136, %cst_40 {dimension_numbers = #tpu.dot_dimension_numbers<[2], [2], [1], [1], [0, 0, 0, 1, 1, 1], [0], [0]>} : vector<8x8x64xbf16>, vector<8x8x64xbf16>, vector<8x8x8xf32> -> vector<8x8x8xf32>
    "tpu.trace_stop"() : () -> ()
    %cst_41 = arith.constant dense<0xFF800000> : vector<8x8xf32>
    %138 = vector.multi_reduction <maximumf>, %137, %cst_41 [2] : vector<8x8x8xf32> to vector<8x8xf32>
    %139 = vector.shape_cast %138 : vector<8x8xf32> to vector<8x8x1xf32>
    %140 = vector.broadcast %139 : vector<8x8x1xf32> to vector<8x8x8xf32>
    %141 = arith.subf %137, %140 : vector<8x8x8xf32>
    %142 = math.exp %141 : vector<8x8x8xf32>
    %cst_42 = arith.constant dense<0.000000e+00> : vector<8x8xf32>
    %143 = vector.multi_reduction <add>, %142, %cst_42 [2] : vector<8x8x8xf32> to vector<8x8xf32>
    %144 = vector.shape_cast %143 : vector<8x8xf32> to vector<8x8x1xf32>
    %145 = tpu.reciprocal %144 {approx = true} : vector<8x8x1xf32> -> vector<8x8x1xf32>
    %146 = vector.broadcast %145 : vector<8x8x1xf32> to vector<8x8x8xf32>
    %147 = arith.mulf %142, %146 : vector<8x8x8xf32>
    %148 = arith.truncf %147 : vector<8x8x8xf32> to vector<8x8x8xbf16>
    %149 = vector.extract_strided_slice %122 {offsets = [0, 0, 0], sizes = [8, 8, 64], strides = [1, 1, 1]} : vector<8x8x128xf32> to vector<8x8x64xf32>
    %150 = arith.truncf %149 : vector<8x8x64xf32> to vector<8x8x64xbf16>
    "tpu.trace_start"() <{level = 10 : i32, message = "sij,sjd->sid"}> : () -> ()
    %cst_43 = arith.constant dense<0.000000e+00> : vector<8x8x64xf32>
    %151 = tpu.matmul %148, %150, %cst_43 {dimension_numbers = #tpu.dot_dimension_numbers<[2], [1], [1], [2], [0, 0, 0, 1, 1, 2], [0], [0]>} : vector<8x8x8xbf16>, vector<8x8x64xbf16>, vector<8x8x64xf32> -> vector<8x8x64xf32>
    "tpu.trace_stop"() : () -> ()
    %152 = vector.extract_strided_slice %118 {offsets = [0, 0, 64], sizes = [8, 8, 64], strides = [1, 1, 1]} : vector<8x8x128xf32> to vector<8x8x64xf32>
    %153 = arith.truncf %152 : vector<8x8x64xf32> to vector<8x8x64xbf16>
    %154 = vector.extract_strided_slice %120 {offsets = [0, 0, 64], sizes = [8, 8, 64], strides = [1, 1, 1]} : vector<8x8x128xf32> to vector<8x8x64xf32>
    %155 = arith.truncf %154 : vector<8x8x64xf32> to vector<8x8x64xbf16>
    "tpu.trace_start"() <{level = 10 : i32, message = "sid,sjd->sij"}> : () -> ()
    %cst_44 = arith.constant dense<0.000000e+00> : vector<8x8x8xf32>
    %156 = tpu.matmul %153, %155, %cst_44 {dimension_numbers = #tpu.dot_dimension_numbers<[2], [2], [1], [1], [0, 0, 0, 1, 1, 1], [0], [0]>} : vector<8x8x64xbf16>, vector<8x8x64xbf16>, vector<8x8x8xf32> -> vector<8x8x8xf32>
    "tpu.trace_stop"() : () -> ()
    %cst_45 = arith.constant dense<0xFF800000> : vector<8x8xf32>
    %157 = vector.multi_reduction <maximumf>, %156, %cst_45 [2] : vector<8x8x8xf32> to vector<8x8xf32>
    %158 = vector.shape_cast %157 : vector<8x8xf32> to vector<8x8x1xf32>
    %159 = vector.broadcast %158 : vector<8x8x1xf32> to vector<8x8x8xf32>
    %160 = arith.subf %156, %159 : vector<8x8x8xf32>
    %161 = math.exp %160 : vector<8x8x8xf32>
    %cst_46 = arith.constant dense<0.000000e+00> : vector<8x8xf32>
    %162 = vector.multi_reduction <add>, %161, %cst_46 [2] : vector<8x8x8xf32> to vector<8x8xf32>
    %163 = vector.shape_cast %162 : vector<8x8xf32> to vector<8x8x1xf32>
    %164 = tpu.reciprocal %163 {approx = true} : vector<8x8x1xf32> -> vector<8x8x1xf32>
    %165 = vector.broadcast %164 : vector<8x8x1xf32> to vector<8x8x8xf32>
    %166 = arith.mulf %161, %165 : vector<8x8x8xf32>
    %167 = arith.truncf %166 : vector<8x8x8xf32> to vector<8x8x8xbf16>
    %168 = vector.extract_strided_slice %122 {offsets = [0, 0, 64], sizes = [8, 8, 64], strides = [1, 1, 1]} : vector<8x8x128xf32> to vector<8x8x64xf32>
    %169 = arith.truncf %168 : vector<8x8x64xf32> to vector<8x8x64xbf16>
    "tpu.trace_start"() <{level = 10 : i32, message = "sij,sjd->sid"}> : () -> ()
    %cst_47 = arith.constant dense<0.000000e+00> : vector<8x8x64xf32>
    %170 = tpu.matmul %167, %169, %cst_47 {dimension_numbers = #tpu.dot_dimension_numbers<[2], [1], [1], [2], [0, 0, 0, 1, 1, 2], [0], [0]>} : vector<8x8x8xbf16>, vector<8x8x64xbf16>, vector<8x8x64xf32> -> vector<8x8x64xf32>
    "tpu.trace_stop"() : () -> ()
    %171 = tpu.concatenate %151, %170 in 2 : vector<8x8x64xf32>, vector<8x8x64xf32> -> vector<8x8x128xf32>
    %172 = arith.mulf %171, %132 : vector<8x8x128xf32>
    %173 = vector.shape_cast %172 : vector<8x8x128xf32> to vector<64x128xf32>
    %174 = arith.truncf %173 : vector<64x128xf32> to vector<64x128xbf16>
    %c0_48 = arith.constant 0 : index
    %c0_49 = arith.constant 0 : index
    %c0_50 = arith.constant 0 : index
    %175 = vector.load %arg6[%c0_48, %c0_49, %c0_50] : memref<1x128x32xbf16, #tpu.memory_space<vmem>>, vector<1x128x32xbf16>
    %176 = vector.shape_cast %175 : vector<1x128x32xbf16> to vector<128x32xbf16>
    %cst_51 = arith.constant dense<0.000000e+00> : vector<64x32xf32>
    %177 = tpu.matmul %174, %176, %cst_51 {dimension_numbers = #tpu.dot_dimension_numbers<[1], [0], [0], [1], [0, 0, 1, 1], [], []>} : vector<64x128xbf16>, vector<128x32xbf16>, vector<64x32xf32> -> vector<64x32xf32>
    %178 = vector.extract_strided_slice %7 {offsets = [7, 0], sizes = [1, 32], strides = [1, 1]} : vector<12x32xf32> to vector<1x32xf32>
    %179 = vector.broadcast %178 : vector<1x32xf32> to vector<64x32xf32>
    %180 = arith.addf %177, %179 : vector<64x32xf32>
    %181 = arith.addf %112, %180 : vector<64x32xf32>
    %182 = vector.extract_strided_slice %7 {offsets = [8, 0], sizes = [1, 32], strides = [1, 1]} : vector<12x32xf32> to vector<1x32xf32>
    %183 = vector.extract_strided_slice %7 {offsets = [9, 0], sizes = [1, 32], strides = [1, 1]} : vector<12x32xf32> to vector<1x32xf32>
    %cst_52 = arith.constant dense<0.000000e+00> : vector<64xf32>
    %184 = vector.multi_reduction <add>, %181, %cst_52 [1] : vector<64x32xf32> to vector<64xf32>
    %185 = vector.shape_cast %184 : vector<64xf32> to vector<64x1xf32>
    %cst_53 = arith.constant 3.200000e+01 : f32
    %186 = vector.broadcast %cst_53 : f32 to vector<64x1xf32>
    %187 = arith.divf %185, %186 : vector<64x1xf32>
    %188 = vector.broadcast %187 : vector<64x1xf32> to vector<64x32xf32>
    %189 = arith.subf %181, %188 : vector<64x32xf32>
    %190 = arith.mulf %189, %189 : vector<64x32xf32>
    %cst_54 = arith.constant dense<0.000000e+00> : vector<64xf32>
    %191 = vector.multi_reduction <add>, %190, %cst_54 [1] : vector<64x32xf32> to vector<64xf32>
    %192 = vector.shape_cast %191 : vector<64xf32> to vector<64x1xf32>
    %cst_55 = arith.constant 3.200000e+01 : f32
    %193 = vector.broadcast %cst_55 : f32 to vector<64x1xf32>
    %194 = arith.divf %192, %193 : vector<64x1xf32>
    %195 = vector.broadcast %187 : vector<64x1xf32> to vector<64x32xf32>
    %196 = arith.subf %181, %195 : vector<64x32xf32>
    %cst_56 = arith.constant 9.99999974E-6 : f32
    %197 = vector.broadcast %cst_56 : f32 to vector<64x1xf32>
    %198 = arith.addf %194, %197 : vector<64x1xf32>
    %199 = math.rsqrt %198 : vector<64x1xf32>
    %200 = vector.broadcast %199 : vector<64x1xf32> to vector<64x32xf32>
    %201 = arith.mulf %196, %200 : vector<64x32xf32>
    %202 = vector.broadcast %182 : vector<1x32xf32> to vector<64x32xf32>
    %203 = arith.mulf %201, %202 : vector<64x32xf32>
    %204 = vector.broadcast %183 : vector<1x32xf32> to vector<64x32xf32>
    %205 = arith.addf %203, %204 : vector<64x32xf32>
    %206 = arith.addf %205, %5 : vector<64x32xf32>
    %207 = vector.extract_strided_slice %7 {offsets = [10, 0], sizes = [1, 32], strides = [1, 1]} : vector<12x32xf32> to vector<1x32xf32>
    %208 = vector.extract_strided_slice %7 {offsets = [11, 0], sizes = [1, 32], strides = [1, 1]} : vector<12x32xf32> to vector<1x32xf32>
    %cst_57 = arith.constant dense<0.000000e+00> : vector<64xf32>
    %209 = vector.multi_reduction <add>, %206, %cst_57 [1] : vector<64x32xf32> to vector<64xf32>
    %210 = vector.shape_cast %209 : vector<64xf32> to vector<64x1xf32>
    %cst_58 = arith.constant 3.200000e+01 : f32
    %211 = vector.broadcast %cst_58 : f32 to vector<64x1xf32>
    %212 = arith.divf %210, %211 : vector<64x1xf32>
    %213 = vector.broadcast %212 : vector<64x1xf32> to vector<64x32xf32>
    %214 = arith.subf %206, %213 : vector<64x32xf32>
    %215 = arith.mulf %214, %214 : vector<64x32xf32>
    %cst_59 = arith.constant dense<0.000000e+00> : vector<64xf32>
    %216 = vector.multi_reduction <add>, %215, %cst_59 [1] : vector<64x32xf32> to vector<64xf32>
    %217 = vector.shape_cast %216 : vector<64xf32> to vector<64x1xf32>
    %cst_60 = arith.constant 3.200000e+01 : f32
    %218 = vector.broadcast %cst_60 : f32 to vector<64x1xf32>
    %219 = arith.divf %217, %218 : vector<64x1xf32>
    %220 = vector.broadcast %212 : vector<64x1xf32> to vector<64x32xf32>
    %221 = arith.subf %206, %220 : vector<64x32xf32>
    %cst_61 = arith.constant 9.99999974E-6 : f32
    %222 = vector.broadcast %cst_61 : f32 to vector<64x1xf32>
    %223 = arith.addf %219, %222 : vector<64x1xf32>
    %224 = math.rsqrt %223 : vector<64x1xf32>
    %225 = vector.broadcast %224 : vector<64x1xf32> to vector<64x32xf32>
    %226 = arith.mulf %221, %225 : vector<64x32xf32>
    %227 = vector.broadcast %207 : vector<1x32xf32> to vector<64x32xf32>
    %228 = arith.mulf %226, %227 : vector<64x32xf32>
    %229 = vector.broadcast %208 : vector<1x32xf32> to vector<64x32xf32>
    %230 = arith.addf %228, %229 : vector<64x32xf32>
    %231 = vector.shape_cast %230 : vector<64x32xf32> to vector<8x8x32xf32>
    %c0_62 = arith.constant 0 : index
    %c0_63 = arith.constant 0 : index
    %c0_64 = arith.constant 0 : index
    %c0_65 = arith.constant 0 : index
    %232 = vector.load %arg9[%c0_62, %c0_63, %c0_64, %c0_65] : memref<1x8x8x32xf32, #tpu.memory_space<vmem>>, vector<1x8x8x32xf32>
    %233 = vector.shape_cast %232 : vector<1x8x8x32xf32> to vector<8x8x32xf32>
    %234 = vector.shape_cast %231 : vector<8x8x32xf32> to vector<1x8x8x32xf32>
    tpu.vector_store %arg9[%c0_62, %c0_63, %c0_64, %c0_65], %234 {strides = array<i32>} : memref<1x8x8x32xf32, #tpu.memory_space<vmem>>, vector<1x8x8x32xf32>,
    return
  }
  func.func @transform_0(%arg0: i32, %arg1: i32) -> (i32, i32, i32, i32) {
    %c0_i32 = arith.constant 0 : i32
    %c0_i32_0 = arith.constant 0 : i32
    %c0_i32_1 = arith.constant 0 : i32
    %c0_i32_2 = arith.constant 0 : i32
    return %arg0, %c0_i32, %c0_i32_0, %c0_i32_1 : i32, i32, i32, i32
  }
  func.func @transform_1(%arg0: i32, %arg1: i32) -> (i32, i32, i32) {
    %c0_i32 = arith.constant 0 : i32
    %c0_i32_0 = arith.constant 0 : i32
    %c0_i32_1 = arith.constant 0 : i32
    return %arg1, %c0_i32, %c0_i32_0 : i32, i32, i32
  }
  func.func @transform_2(%arg0: i32, %arg1: i32) -> (i32, i32, i32) {
    %c0_i32 = arith.constant 0 : i32
    %c0_i32_0 = arith.constant 0 : i32
    %c0_i32_1 = arith.constant 0 : i32
    return %arg1, %c0_i32, %c0_i32_0 : i32, i32, i32
  }
  func.func @transform_3(%arg0: i32, %arg1: i32) -> (i32, i32, i32) {
    %c0_i32 = arith.constant 0 : i32
    %c0_i32_0 = arith.constant 0 : i32
    %c0_i32_1 = arith.constant 0 : i32
    return %arg1, %c0_i32, %c0_i32_0 : i32, i32, i32
  }
  func.func @transform_4(%arg0: i32, %arg1: i32) -> (i32, i32, i32) {
    %c0_i32 = arith.constant 0 : i32
    %c0_i32_0 = arith.constant 0 : i32
    %c0_i32_1 = arith.constant 0 : i32
    return %arg1, %c0_i32, %c0_i32_0 : i32, i32, i32
  }
  func.func @transform_5(%arg0: i32, %arg1: i32) -> (i32, i32, i32) {
    %c0_i32 = arith.constant 0 : i32
    %c0_i32_0 = arith.constant 0 : i32
    %c0_i32_1 = arith.constant 0 : i32
    return %arg1, %c0_i32, %c0_i32_0 : i32, i32, i32
  }
  func.func @transform_6(%arg0: i32, %arg1: i32) -> (i32, i32, i32) {
    %c0_i32 = arith.constant 0 : i32
    %c0_i32_0 = arith.constant 0 : i32
    %c0_i32_1 = arith.constant 0 : i32
    return %arg1, %c0_i32, %c0_i32_0 : i32, i32, i32
  }
  func.func @transform_7(%arg0: i32, %arg1: i32) -> (i32, i32, i32, i32) {
    %c0_i32 = arith.constant 0 : i32
    %c0_i32_0 = arith.constant 0 : i32
    %c0_i32_1 = arith.constant 0 : i32
    %c0_i32_2 = arith.constant 0 : i32
    return %arg0, %c0_i32, %c0_i32_0, %c0_i32_1 : i32, i32, i32, i32
  }
}

module attributes {stable_mosaic.version = 11 : i64} {
  func.func @_gnn_stack_kernel(%arg0: i32, %arg1: i32, %arg2: memref<1x8x32xf32, #tpu.memory_space<vmem>>, %arg3: memref<8x32xf32, #tpu.memory_space<vmem>>, %arg4: memref<32x32xbf16, #tpu.memory_space<vmem>>, %arg5: memref<1x32xf32, #tpu.memory_space<vmem>>, %arg6: memref<1x8x8xf32, #tpu.memory_space<vmem>>, %arg7: memref<1x32x32xbf16, #tpu.memory_space<vmem>>, %arg8: memref<1x5x32xf32, #tpu.memory_space<vmem>>, %arg9: memref<1x8x32xf32, #tpu.memory_space<vmem>>) attributes {dimension_semantics = [#tpu.dimension_semantics<parallel>, #tpu.dimension_semantics<arbitrary>], iteration_bounds = array<i64: 2, 1>, scalar_prefetch = 0 : i64, scratch_operands = 0 : i64, tpu.core_type = #tpu.core_type<tc>, window_params = [{transform_indices = @transform_0, window_bounds = array<i64: 1, 8, 32>}, {pipeline_mode = #tpu.pipeline_mode<synchronous>, transform_indices = @transform_1, window_bounds = array<i64: 8, 32>}, {pipeline_mode = #tpu.pipeline_mode<synchronous>, transform_indices = @transform_2, window_bounds = array<i64: 32, 32>}, {pipeline_mode = #tpu.pipeline_mode<synchronous>, transform_indices = @transform_3, window_bounds = array<i64: 1, 32>}, {transform_indices = @transform_4, window_bounds = array<i64: 1, 8, 8>}, {transform_indices = @transform_5, window_bounds = array<i64: 1, 32, 32>}, {transform_indices = @transform_6, window_bounds = array<i64: 1, 5, 32>}, {transform_indices = @transform_7, window_bounds = array<i64: 1, 8, 32>}]} {
    %c0_i32 = arith.constant 0 : i32
    %0 = arith.cmpi eq, %arg1, %c0_i32 : i32
    %1 = arith.extui %0 : i1 to i32
    %c0_i32_0 = arith.constant 0 : i32
    %2 = arith.cmpi ne, %1, %c0_i32_0 : i32
    scf.if %2 {
      %c0_26 = arith.constant 0 : index
      %c0_27 = arith.constant 0 : index
      %c0_28 = arith.constant 0 : index
      %75 = vector.load %arg2[%c0_26, %c0_27, %c0_28] : memref<1x8x32xf32, #tpu.memory_space<vmem>>, vector<1x8x32xf32>
      %76 = vector.shape_cast %75 : vector<1x8x32xf32> to vector<8x32xf32>
      %c0_29 = arith.constant 0 : index
      %c0_30 = arith.constant 0 : index
      %77 = vector.load %arg3[%c0_29, %c0_30] : memref<8x32xf32, #tpu.memory_space<vmem>>, vector<8x32xf32>
      %78 = arith.addf %76, %77 : vector<8x32xf32>
      %79 = arith.truncf %78 : vector<8x32xf32> to vector<8x32xbf16>
      %c0_31 = arith.constant 0 : index
      %c0_32 = arith.constant 0 : index
      %80 = vector.load %arg4[%c0_31, %c0_32] : memref<32x32xbf16, #tpu.memory_space<vmem>>, vector<32x32xbf16>
      %cst_33 = arith.constant dense<0.000000e+00> : vector<8x32xf32>
      %81 = tpu.matmul %79, %80, %cst_33 {dimension_numbers = #tpu.dot_dimension_numbers<[1], [0], [0], [1], [0, 0, 1, 1], [], []>} : vector<8x32xbf16>, vector<32x32xbf16>, vector<8x32xf32> -> vector<8x32xf32>
      %c0_34 = arith.constant 0 : index
      %c0_35 = arith.constant 0 : index
      %82 = vector.load %arg5[%c0_34, %c0_35] : memref<1x32xf32, #tpu.memory_space<vmem>>, vector<1x32xf32>
      %83 = vector.broadcast %82 : vector<1x32xf32> to vector<8x32xf32>
      %84 = arith.addf %81, %83 : vector<8x32xf32>
      %85 = arith.addf %84, %78 : vector<8x32xf32>
      %c0_36 = arith.constant 0 : index
      %c0_37 = arith.constant 0 : index
      %c0_38 = arith.constant 0 : index
      %86 = vector.load %arg9[%c0_36, %c0_37, %c0_38] : memref<1x8x32xf32, #tpu.memory_space<vmem>>, vector<1x8x32xf32>
      %87 = vector.shape_cast %86 : vector<1x8x32xf32> to vector<8x32xf32>
      %88 = vector.shape_cast %85 : vector<8x32xf32> to vector<1x8x32xf32>
      tpu.vector_store %arg9[%c0_36, %c0_37, %c0_38], %88 {strides = array<i32>} : memref<1x8x32xf32, #tpu.memory_space<vmem>>, vector<1x8x32xf32>,
    } else {
    }
    %c0 = arith.constant 0 : index
    %c0_1 = arith.constant 0 : index
    %c0_2 = arith.constant 0 : index
    %3 = vector.load %arg9[%c0, %c0_1, %c0_2] : memref<1x8x32xf32, #tpu.memory_space<vmem>>, vector<1x8x32xf32>
    %4 = vector.shape_cast %3 : vector<1x8x32xf32> to vector<8x32xf32>
    %c0_3 = arith.constant 0 : index
    %c0_4 = arith.constant 0 : index
    %c0_5 = arith.constant 0 : index
    %5 = vector.load %arg8[%c0_3, %c0_4, %c0_5] : memref<1x5x32xf32, #tpu.memory_space<vmem>>, vector<1x5x32xf32>
    %6 = vector.shape_cast %5 : vector<1x5x32xf32> to vector<5x32xf32>
    %7 = arith.truncf %4 : vector<8x32xf32> to vector<8x32xbf16>
    %c0_6 = arith.constant 0 : index
    %c0_7 = arith.constant 0 : index
    %c0_8 = arith.constant 0 : index
    %8 = vector.load %arg7[%c0_6, %c0_7, %c0_8] : memref<1x32x32xbf16, #tpu.memory_space<vmem>>, vector<1x32x32xbf16>
    %9 = vector.shape_cast %8 : vector<1x32x32xbf16> to vector<32x32xbf16>
    %cst = arith.constant dense<0.000000e+00> : vector<8x32xf32>
    %10 = tpu.matmul %7, %9, %cst {dimension_numbers = #tpu.dot_dimension_numbers<[1], [0], [0], [1], [0, 0, 1, 1], [], []>} : vector<8x32xbf16>, vector<32x32xbf16>, vector<8x32xf32> -> vector<8x32xf32>
    %11 = vector.extract_strided_slice %6 {offsets = [0, 0], sizes = [1, 32], strides = [1, 1]} : vector<5x32xf32> to vector<1x32xf32>
    %12 = vector.broadcast %11 : vector<1x32xf32> to vector<8x32xf32>
    %13 = arith.mulf %10, %12 : vector<8x32xf32>
    %cst_9 = arith.constant dense<0.000000e+00> : vector<8xf32>
    %14 = vector.multi_reduction <add>, %13, %cst_9 [1] : vector<8x32xf32> to vector<8xf32>
    %15 = vector.shape_cast %14 : vector<8xf32> to vector<8x1xf32>
    %16 = vector.extract_strided_slice %6 {offsets = [1, 0], sizes = [1, 32], strides = [1, 1]} : vector<5x32xf32> to vector<1x32xf32>
    %17 = vector.broadcast %16 : vector<1x32xf32> to vector<8x32xf32>
    %18 = arith.mulf %10, %17 : vector<8x32xf32>
    %cst_10 = arith.constant dense<0.000000e+00> : vector<8xf32>
    %19 = vector.multi_reduction <add>, %18, %cst_10 [1] : vector<8x32xf32> to vector<8xf32>
    %20 = vector.shape_cast %19 : vector<8xf32> to vector<8x1xf32>
    %21 = tpu.transpose %15, [1, 0] : vector<8x1xf32> -> vector<1x8xf32>
    %22 = vector.broadcast %20 : vector<8x1xf32> to vector<8x8xf32>
    %23 = vector.broadcast %21 : vector<1x8xf32> to vector<8x8xf32>
    %24 = arith.addf %22, %23 : vector<8x8xf32>
    %cst_11 = arith.constant 2.000000e-01 : f32
    %25 = vector.broadcast %cst_11 : f32 to vector<8x8xf32>
    %26 = arith.mulf %25, %24 : vector<8x8xf32>
    %27 = arith.maximumf %24, %26 : vector<8x8xf32>
    %c0_12 = arith.constant 0 : index
    %c0_13 = arith.constant 0 : index
    %c0_14 = arith.constant 0 : index
    %28 = vector.load %arg6[%c0_12, %c0_13, %c0_14] : memref<1x8x8xf32, #tpu.memory_space<vmem>>, vector<1x8x8xf32>
    %29 = vector.shape_cast %28 : vector<1x8x8xf32> to vector<8x8xf32>
    %30 = arith.addf %27, %29 : vector<8x8xf32>
    %cst_15 = arith.constant dense<0xFF800000> : vector<8xf32>
    %31 = vector.multi_reduction <maximumf>, %30, %cst_15 [1] : vector<8x8xf32> to vector<8xf32>
    %32 = vector.shape_cast %31 : vector<8xf32> to vector<8x1xf32>
    %33 = vector.broadcast %32 : vector<8x1xf32> to vector<8x8xf32>
    %34 = arith.subf %30, %33 : vector<8x8xf32>
    %35 = math.exp %34 : vector<8x8xf32>
    %cst_16 = arith.constant dense<0.000000e+00> : vector<8xf32>
    %36 = vector.multi_reduction <add>, %35, %cst_16 [1] : vector<8x8xf32> to vector<8xf32>
    %37 = vector.shape_cast %36 : vector<8xf32> to vector<8x1xf32>
    %38 = tpu.reciprocal %37 {approx = true} : vector<8x1xf32> -> vector<8x1xf32>
    %39 = vector.broadcast %38 : vector<8x1xf32> to vector<8x8xf32>
    %40 = arith.mulf %35, %39 : vector<8x8xf32>
    %41 = arith.truncf %40 : vector<8x8xf32> to vector<8x8xbf16>
    %42 = arith.truncf %10 : vector<8x32xf32> to vector<8x32xbf16>
    %cst_17 = arith.constant dense<0.000000e+00> : vector<8x32xf32>
    %43 = tpu.matmul %41, %42, %cst_17 {dimension_numbers = #tpu.dot_dimension_numbers<[1], [0], [0], [1], [0, 0, 1, 1], [], []>} : vector<8x8xbf16>, vector<8x32xbf16>, vector<8x32xf32> -> vector<8x32xf32>
    %44 = vector.extract_strided_slice %6 {offsets = [2, 0], sizes = [1, 32], strides = [1, 1]} : vector<5x32xf32> to vector<1x32xf32>
    %45 = vector.broadcast %44 : vector<1x32xf32> to vector<8x32xf32>
    %46 = arith.addf %43, %45 : vector<8x32xf32>
    %47 = arith.addf %46, %4 : vector<8x32xf32>
    %48 = vector.extract_strided_slice %6 {offsets = [3, 0], sizes = [1, 32], strides = [1, 1]} : vector<5x32xf32> to vector<1x32xf32>
    %49 = vector.extract_strided_slice %6 {offsets = [4, 0], sizes = [1, 32], strides = [1, 1]} : vector<5x32xf32> to vector<1x32xf32>
    %cst_18 = arith.constant dense<0.000000e+00> : vector<8xf32>
    %50 = vector.multi_reduction <add>, %47, %cst_18 [1] : vector<8x32xf32> to vector<8xf32>
    %51 = vector.shape_cast %50 : vector<8xf32> to vector<8x1xf32>
    %cst_19 = arith.constant 3.200000e+01 : f32
    %52 = vector.broadcast %cst_19 : f32 to vector<8x1xf32>
    %53 = arith.divf %51, %52 : vector<8x1xf32>
    %54 = vector.broadcast %53 : vector<8x1xf32> to vector<8x32xf32>
    %55 = arith.subf %47, %54 : vector<8x32xf32>
    %56 = arith.mulf %55, %55 : vector<8x32xf32>
    %cst_20 = arith.constant dense<0.000000e+00> : vector<8xf32>
    %57 = vector.multi_reduction <add>, %56, %cst_20 [1] : vector<8x32xf32> to vector<8xf32>
    %58 = vector.shape_cast %57 : vector<8xf32> to vector<8x1xf32>
    %cst_21 = arith.constant 3.200000e+01 : f32
    %59 = vector.broadcast %cst_21 : f32 to vector<8x1xf32>
    %60 = arith.divf %58, %59 : vector<8x1xf32>
    %61 = vector.broadcast %53 : vector<8x1xf32> to vector<8x32xf32>
    %62 = arith.subf %47, %61 : vector<8x32xf32>
    %cst_22 = arith.constant 9.99999974E-6 : f32
    %63 = vector.broadcast %cst_22 : f32 to vector<8x1xf32>
    %64 = arith.addf %60, %63 : vector<8x1xf32>
    %65 = math.rsqrt %64 : vector<8x1xf32>
    %66 = vector.broadcast %65 : vector<8x1xf32> to vector<8x32xf32>
    %67 = arith.mulf %62, %66 : vector<8x32xf32>
    %68 = vector.broadcast %48 : vector<1x32xf32> to vector<8x32xf32>
    %69 = arith.mulf %67, %68 : vector<8x32xf32>
    %70 = vector.broadcast %49 : vector<1x32xf32> to vector<8x32xf32>
    %71 = arith.addf %69, %70 : vector<8x32xf32>
    %c0_23 = arith.constant 0 : index
    %c0_24 = arith.constant 0 : index
    %c0_25 = arith.constant 0 : index
    %72 = vector.load %arg9[%c0_23, %c0_24, %c0_25] : memref<1x8x32xf32, #tpu.memory_space<vmem>>, vector<1x8x32xf32>
    %73 = vector.shape_cast %72 : vector<1x8x32xf32> to vector<8x32xf32>
    %74 = vector.shape_cast %71 : vector<8x32xf32> to vector<1x8x32xf32>
    tpu.vector_store %arg9[%c0_23, %c0_24, %c0_25], %74 {strides = array<i32>} : memref<1x8x32xf32, #tpu.memory_space<vmem>>, vector<1x8x32xf32>,
    return
  }
  func.func @transform_0(%arg0: i32, %arg1: i32) -> (i32, i32, i32) {
    %c0_i32 = arith.constant 0 : i32
    %c0_i32_0 = arith.constant 0 : i32
    %c0_i32_1 = arith.constant 0 : i32
    return %arg0, %c0_i32, %c0_i32_0 : i32, i32, i32
  }
  func.func @transform_1(%arg0: i32, %arg1: i32) -> (i32, i32) {
    %c0_i32 = arith.constant 0 : i32
    %c0_i32_0 = arith.constant 0 : i32
    %c0_i32_1 = arith.constant 0 : i32
    return %c0_i32, %c0_i32_0 : i32, i32
  }
  func.func @transform_2(%arg0: i32, %arg1: i32) -> (i32, i32) {
    %c0_i32 = arith.constant 0 : i32
    %c0_i32_0 = arith.constant 0 : i32
    %c0_i32_1 = arith.constant 0 : i32
    return %c0_i32, %c0_i32_0 : i32, i32
  }
  func.func @transform_3(%arg0: i32, %arg1: i32) -> (i32, i32) {
    %c0_i32 = arith.constant 0 : i32
    %c0_i32_0 = arith.constant 0 : i32
    %c0_i32_1 = arith.constant 0 : i32
    return %c0_i32, %c0_i32_0 : i32, i32
  }
  func.func @transform_4(%arg0: i32, %arg1: i32) -> (i32, i32, i32) {
    %c0_i32 = arith.constant 0 : i32
    %c0_i32_0 = arith.constant 0 : i32
    %c0_i32_1 = arith.constant 0 : i32
    return %arg0, %c0_i32, %c0_i32_0 : i32, i32, i32
  }
  func.func @transform_5(%arg0: i32, %arg1: i32) -> (i32, i32, i32) {
    %c0_i32 = arith.constant 0 : i32
    %c0_i32_0 = arith.constant 0 : i32
    %c0_i32_1 = arith.constant 0 : i32
    return %arg1, %c0_i32, %c0_i32_0 : i32, i32, i32
  }
  func.func @transform_6(%arg0: i32, %arg1: i32) -> (i32, i32, i32) {
    %c0_i32 = arith.constant 0 : i32
    %c0_i32_0 = arith.constant 0 : i32
    %c0_i32_1 = arith.constant 0 : i32
    return %arg1, %c0_i32, %c0_i32_0 : i32, i32, i32
  }
  func.func @transform_7(%arg0: i32, %arg1: i32) -> (i32, i32, i32) {
    %c0_i32 = arith.constant 0 : i32
    %c0_i32_0 = arith.constant 0 : i32
    %c0_i32_1 = arith.constant 0 : i32
    return %arg0, %c0_i32, %c0_i32_0 : i32, i32, i32
  }
}

module attributes {stable_mosaic.version = 11 : i64} {
  func.func @_interface_stack_kernel(%arg0: i32, %arg1: i32, %arg2: memref<1x16x32xf32, #tpu.memory_space<vmem>>, %arg3: memref<1x32x256xbf16, #tpu.memory_space<vmem>>, %arg4: memref<1x128x32xbf16, #tpu.memory_space<vmem>>, %arg5: memref<1x7x32xf32, #tpu.memory_space<vmem>>, %arg6: memref<1x1x128xf32, #tpu.memory_space<vmem>>, %arg7: memref<1x16x32xf32, #tpu.memory_space<vmem>>) attributes {dimension_semantics = [#tpu.dimension_semantics<parallel>, #tpu.dimension_semantics<arbitrary>], iteration_bounds = array<i64: 2, 1>, scalar_prefetch = 0 : i64, scratch_operands = 0 : i64, tpu.core_type = #tpu.core_type<tc>, window_params = [{transform_indices = @transform_0, window_bounds = array<i64: 1, 16, 32>}, {transform_indices = @transform_1, window_bounds = array<i64: 1, 32, 256>}, {transform_indices = @transform_2, window_bounds = array<i64: 1, 128, 32>}, {transform_indices = @transform_3, window_bounds = array<i64: 1, 7, 32>}, {transform_indices = @transform_4, window_bounds = array<i64: 1, 1, 128>}, {transform_indices = @transform_5, window_bounds = array<i64: 1, 16, 32>}]} {
    %c0_i32 = arith.constant 0 : i32
    %0 = arith.cmpi eq, %arg1, %c0_i32 : i32
    %1 = arith.extui %0 : i1 to i32
    %c0_i32_0 = arith.constant 0 : i32
    %2 = arith.cmpi ne, %1, %c0_i32_0 : i32
    scf.if %2 {
      %c0_37 = arith.constant 0 : index
      %c0_38 = arith.constant 0 : index
      %c0_39 = arith.constant 0 : index
      %112 = vector.load %arg2[%c0_37, %c0_38, %c0_39] : memref<1x16x32xf32, #tpu.memory_space<vmem>>, vector<1x16x32xf32>
      %c0_40 = arith.constant 0 : index
      %c0_41 = arith.constant 0 : index
      %c0_42 = arith.constant 0 : index
      %113 = vector.load %arg7[%c0_40, %c0_41, %c0_42] : memref<1x16x32xf32, #tpu.memory_space<vmem>>, vector<1x16x32xf32>
      tpu.vector_store %arg7[%c0_40, %c0_41, %c0_42], %112 {strides = array<i32>} : memref<1x16x32xf32, #tpu.memory_space<vmem>>, vector<1x16x32xf32>,
    } else {
    }
    %c0 = arith.constant 0 : index
    %c0_1 = arith.constant 0 : index
    %c0_2 = arith.constant 0 : index
    %3 = vector.load %arg7[%c0, %c0_1, %c0_2] : memref<1x16x32xf32, #tpu.memory_space<vmem>>, vector<1x16x32xf32>
    %4 = vector.shape_cast %3 : vector<1x16x32xf32> to vector<16x32xf32>
    %c0_3 = arith.constant 0 : index
    %c0_4 = arith.constant 0 : index
    %c0_5 = arith.constant 0 : index
    %5 = vector.load %arg5[%c0_3, %c0_4, %c0_5] : memref<1x7x32xf32, #tpu.memory_space<vmem>>, vector<1x7x32xf32>
    %6 = vector.shape_cast %5 : vector<1x7x32xf32> to vector<7x32xf32>
    %c0_6 = arith.constant 0 : index
    %c0_7 = arith.constant 0 : index
    %c0_8 = arith.constant 0 : index
    %7 = vector.load %arg6[%c0_6, %c0_7, %c0_8] : memref<1x1x128xf32, #tpu.memory_space<vmem>>, vector<1x1x128xf32>
    %8 = vector.shape_cast %7 : vector<1x1x128xf32> to vector<1x128xf32>
    %9 = vector.extract_strided_slice %6 {offsets = [0, 0], sizes = [1, 32], strides = [1, 1]} : vector<7x32xf32> to vector<1x32xf32>
    %10 = vector.extract_strided_slice %6 {offsets = [1, 0], sizes = [1, 32], strides = [1, 1]} : vector<7x32xf32> to vector<1x32xf32>
    %cst = arith.constant dense<0.000000e+00> : vector<16xf32>
    %11 = vector.multi_reduction <add>, %4, %cst [1] : vector<16x32xf32> to vector<16xf32>
    %12 = vector.shape_cast %11 : vector<16xf32> to vector<16x1xf32>
    %cst_9 = arith.constant 3.200000e+01 : f32
    %13 = vector.broadcast %cst_9 : f32 to vector<16x1xf32>
    %14 = arith.divf %12, %13 : vector<16x1xf32>
    %15 = vector.broadcast %14 : vector<16x1xf32> to vector<16x32xf32>
    %16 = arith.subf %4, %15 : vector<16x32xf32>
    %17 = arith.mulf %16, %16 : vector<16x32xf32>
    %cst_10 = arith.constant dense<0.000000e+00> : vector<16xf32>
    %18 = vector.multi_reduction <add>, %17, %cst_10 [1] : vector<16x32xf32> to vector<16xf32>
    %19 = vector.shape_cast %18 : vector<16xf32> to vector<16x1xf32>
    %cst_11 = arith.constant 3.200000e+01 : f32
    %20 = vector.broadcast %cst_11 : f32 to vector<16x1xf32>
    %21 = arith.divf %19, %20 : vector<16x1xf32>
    %22 = vector.broadcast %14 : vector<16x1xf32> to vector<16x32xf32>
    %23 = arith.subf %4, %22 : vector<16x32xf32>
    %cst_12 = arith.constant 9.99999974E-6 : f32
    %24 = vector.broadcast %cst_12 : f32 to vector<16x1xf32>
    %25 = arith.addf %21, %24 : vector<16x1xf32>
    %26 = math.rsqrt %25 : vector<16x1xf32>
    %27 = vector.broadcast %26 : vector<16x1xf32> to vector<16x32xf32>
    %28 = arith.mulf %23, %27 : vector<16x32xf32>
    %29 = vector.broadcast %9 : vector<1x32xf32> to vector<16x32xf32>
    %30 = arith.mulf %28, %29 : vector<16x32xf32>
    %31 = vector.broadcast %10 : vector<1x32xf32> to vector<16x32xf32>
    %32 = arith.addf %30, %31 : vector<16x32xf32>
    %33 = arith.truncf %32 : vector<16x32xf32> to vector<16x32xbf16>
    %c0_13 = arith.constant 0 : index
    %c0_14 = arith.constant 0 : index
    %c0_15 = arith.constant 0 : index
    %34 = vector.load %arg3[%c0_13, %c0_14, %c0_15] : memref<1x32x256xbf16, #tpu.memory_space<vmem>>, vector<1x32x256xbf16>
    %35 = vector.shape_cast %34 : vector<1x32x256xbf16> to vector<32x256xbf16>
    %cst_16 = arith.constant dense<0.000000e+00> : vector<16x256xf32>
    %36 = tpu.matmul %33, %35, %cst_16 {dimension_numbers = #tpu.dot_dimension_numbers<[1], [0], [0], [1], [0, 0, 1, 1], [], []>} : vector<16x32xbf16>, vector<32x256xbf16>, vector<16x256xf32> -> vector<16x256xf32>
    %37 = vector.extract_strided_slice %36 {offsets = [0, 0], sizes = [16, 128], strides = [1, 1]} : vector<16x256xf32> to vector<16x128xf32>
    %38 = vector.extract_strided_slice %36 {offsets = [0, 128], sizes = [16, 128], strides = [1, 1]} : vector<16x256xf32> to vector<16x128xf32>
    %39 = vector.broadcast %8 : vector<1x128xf32> to vector<16x128xf32>
    %40 = arith.addf %38, %39 : vector<16x128xf32>
    %41 = arith.negf %40 : vector<16x128xf32>
    %42 = math.exp %41 : vector<16x128xf32>
    %cst_17 = arith.constant 1.000000e+00 : f32
    %43 = vector.broadcast %cst_17 : f32 to vector<16x128xf32>
    %44 = arith.addf %43, %42 : vector<16x128xf32>
    %45 = arith.divf %43, %44 : vector<16x128xf32>
    %cst_18 = arith.constant dense<0.000000e+00> : vector<128xf32>
    %46 = vector.multi_reduction <add>, %37, %cst_18 [0] : vector<16x128xf32> to vector<128xf32>
    %47 = vector.shape_cast %46 : vector<128xf32> to vector<1x128xf32>
    %cst_19 = arith.constant 1.600000e+01 : f32
    %48 = vector.broadcast %cst_19 : f32 to vector<1x128xf32>
    %49 = arith.divf %47, %48 : vector<1x128xf32>
    %50 = vector.broadcast %49 : vector<1x128xf32> to vector<16x128xf32>
    %51 = arith.mulf %50, %45 : vector<16x128xf32>
    %52 = arith.truncf %51 : vector<16x128xf32> to vector<16x128xbf16>
    %c0_20 = arith.constant 0 : index
    %c0_21 = arith.constant 0 : index
    %c0_22 = arith.constant 0 : index
    %53 = vector.load %arg4[%c0_20, %c0_21, %c0_22] : memref<1x128x32xbf16, #tpu.memory_space<vmem>>, vector<1x128x32xbf16>
    %54 = vector.shape_cast %53 : vector<1x128x32xbf16> to vector<128x32xbf16>
    %cst_23 = arith.constant dense<0.000000e+00> : vector<16x32xf32>
    %55 = tpu.matmul %52, %54, %cst_23 {dimension_numbers = #tpu.dot_dimension_numbers<[1], [0], [0], [1], [0, 0, 1, 1], [], []>} : vector<16x128xbf16>, vector<128x32xbf16>, vector<16x32xf32> -> vector<16x32xf32>
    %56 = vector.extract_strided_slice %6 {offsets = [2, 0], sizes = [1, 32], strides = [1, 1]} : vector<7x32xf32> to vector<1x32xf32>
    %57 = vector.broadcast %56 : vector<1x32xf32> to vector<16x32xf32>
    %58 = arith.addf %55, %57 : vector<16x32xf32>
    %59 = arith.addf %32, %58 : vector<16x32xf32>
    %60 = vector.extract_strided_slice %6 {offsets = [3, 0], sizes = [1, 32], strides = [1, 1]} : vector<7x32xf32> to vector<1x32xf32>
    %61 = vector.extract_strided_slice %6 {offsets = [4, 0], sizes = [1, 32], strides = [1, 1]} : vector<7x32xf32> to vector<1x32xf32>
    %cst_24 = arith.constant dense<0.000000e+00> : vector<16xf32>
    %62 = vector.multi_reduction <add>, %59, %cst_24 [1] : vector<16x32xf32> to vector<16xf32>
    %63 = vector.shape_cast %62 : vector<16xf32> to vector<16x1xf32>
    %cst_25 = arith.constant 3.200000e+01 : f32
    %64 = vector.broadcast %cst_25 : f32 to vector<16x1xf32>
    %65 = arith.divf %63, %64 : vector<16x1xf32>
    %66 = vector.broadcast %65 : vector<16x1xf32> to vector<16x32xf32>
    %67 = arith.subf %59, %66 : vector<16x32xf32>
    %68 = arith.mulf %67, %67 : vector<16x32xf32>
    %cst_26 = arith.constant dense<0.000000e+00> : vector<16xf32>
    %69 = vector.multi_reduction <add>, %68, %cst_26 [1] : vector<16x32xf32> to vector<16xf32>
    %70 = vector.shape_cast %69 : vector<16xf32> to vector<16x1xf32>
    %cst_27 = arith.constant 3.200000e+01 : f32
    %71 = vector.broadcast %cst_27 : f32 to vector<16x1xf32>
    %72 = arith.divf %70, %71 : vector<16x1xf32>
    %73 = vector.broadcast %65 : vector<16x1xf32> to vector<16x32xf32>
    %74 = arith.subf %59, %73 : vector<16x32xf32>
    %cst_28 = arith.constant 9.99999974E-6 : f32
    %75 = vector.broadcast %cst_28 : f32 to vector<16x1xf32>
    %76 = arith.addf %72, %75 : vector<16x1xf32>
    %77 = math.rsqrt %76 : vector<16x1xf32>
    %78 = vector.broadcast %77 : vector<16x1xf32> to vector<16x32xf32>
    %79 = arith.mulf %74, %78 : vector<16x32xf32>
    %80 = vector.broadcast %60 : vector<1x32xf32> to vector<16x32xf32>
    %81 = arith.mulf %79, %80 : vector<16x32xf32>
    %82 = vector.broadcast %61 : vector<1x32xf32> to vector<16x32xf32>
    %83 = arith.addf %81, %82 : vector<16x32xf32>
    %84 = arith.addf %83, %4 : vector<16x32xf32>
    %85 = vector.extract_strided_slice %6 {offsets = [5, 0], sizes = [1, 32], strides = [1, 1]} : vector<7x32xf32> to vector<1x32xf32>
    %86 = vector.extract_strided_slice %6 {offsets = [6, 0], sizes = [1, 32], strides = [1, 1]} : vector<7x32xf32> to vector<1x32xf32>
    %cst_29 = arith.constant dense<0.000000e+00> : vector<16xf32>
    %87 = vector.multi_reduction <add>, %84, %cst_29 [1] : vector<16x32xf32> to vector<16xf32>
    %88 = vector.shape_cast %87 : vector<16xf32> to vector<16x1xf32>
    %cst_30 = arith.constant 3.200000e+01 : f32
    %89 = vector.broadcast %cst_30 : f32 to vector<16x1xf32>
    %90 = arith.divf %88, %89 : vector<16x1xf32>
    %91 = vector.broadcast %90 : vector<16x1xf32> to vector<16x32xf32>
    %92 = arith.subf %84, %91 : vector<16x32xf32>
    %93 = arith.mulf %92, %92 : vector<16x32xf32>
    %cst_31 = arith.constant dense<0.000000e+00> : vector<16xf32>
    %94 = vector.multi_reduction <add>, %93, %cst_31 [1] : vector<16x32xf32> to vector<16xf32>
    %95 = vector.shape_cast %94 : vector<16xf32> to vector<16x1xf32>
    %cst_32 = arith.constant 3.200000e+01 : f32
    %96 = vector.broadcast %cst_32 : f32 to vector<16x1xf32>
    %97 = arith.divf %95, %96 : vector<16x1xf32>
    %98 = vector.broadcast %90 : vector<16x1xf32> to vector<16x32xf32>
    %99 = arith.subf %84, %98 : vector<16x32xf32>
    %cst_33 = arith.constant 9.99999974E-6 : f32
    %100 = vector.broadcast %cst_33 : f32 to vector<16x1xf32>
    %101 = arith.addf %97, %100 : vector<16x1xf32>
    %102 = math.rsqrt %101 : vector<16x1xf32>
    %103 = vector.broadcast %102 : vector<16x1xf32> to vector<16x32xf32>
    %104 = arith.mulf %99, %103 : vector<16x32xf32>
    %105 = vector.broadcast %85 : vector<1x32xf32> to vector<16x32xf32>
    %106 = arith.mulf %104, %105 : vector<16x32xf32>
    %107 = vector.broadcast %86 : vector<1x32xf32> to vector<16x32xf32>
    %108 = arith.addf %106, %107 : vector<16x32xf32>
    %c0_34 = arith.constant 0 : index
    %c0_35 = arith.constant 0 : index
    %c0_36 = arith.constant 0 : index
    %109 = vector.load %arg7[%c0_34, %c0_35, %c0_36] : memref<1x16x32xf32, #tpu.memory_space<vmem>>, vector<1x16x32xf32>
    %110 = vector.shape_cast %109 : vector<1x16x32xf32> to vector<16x32xf32>
    %111 = vector.shape_cast %108 : vector<16x32xf32> to vector<1x16x32xf32>
    tpu.vector_store %arg7[%c0_34, %c0_35, %c0_36], %111 {strides = array<i32>} : memref<1x16x32xf32, #tpu.memory_space<vmem>>, vector<1x16x32xf32>,
    return
  }
  func.func @transform_0(%arg0: i32, %arg1: i32) -> (i32, i32, i32) {
    %c0_i32 = arith.constant 0 : i32
    %c0_i32_0 = arith.constant 0 : i32
    %c0_i32_1 = arith.constant 0 : i32
    return %arg0, %c0_i32, %c0_i32_0 : i32, i32, i32
  }
  func.func @transform_1(%arg0: i32, %arg1: i32) -> (i32, i32, i32) {
    %c0_i32 = arith.constant 0 : i32
    %c0_i32_0 = arith.constant 0 : i32
    %c0_i32_1 = arith.constant 0 : i32
    return %arg1, %c0_i32, %c0_i32_0 : i32, i32, i32
  }
  func.func @transform_2(%arg0: i32, %arg1: i32) -> (i32, i32, i32) {
    %c0_i32 = arith.constant 0 : i32
    %c0_i32_0 = arith.constant 0 : i32
    %c0_i32_1 = arith.constant 0 : i32
    return %arg1, %c0_i32, %c0_i32_0 : i32, i32, i32
  }
  func.func @transform_3(%arg0: i32, %arg1: i32) -> (i32, i32, i32) {
    %c0_i32 = arith.constant 0 : i32
    %c0_i32_0 = arith.constant 0 : i32
    %c0_i32_1 = arith.constant 0 : i32
    return %arg1, %c0_i32, %c0_i32_0 : i32, i32, i32
  }
  func.func @transform_4(%arg0: i32, %arg1: i32) -> (i32, i32, i32) {
    %c0_i32 = arith.constant 0 : i32
    %c0_i32_0 = arith.constant 0 : i32
    %c0_i32_1 = arith.constant 0 : i32
    return %arg1, %c0_i32, %c0_i32_0 : i32, i32, i32
  }
  func.func @transform_5(%arg0: i32, %arg1: i32) -> (i32, i32, i32) {
    %c0_i32 = arith.constant 0 : i32
    %c0_i32_0 = arith.constant 0 : i32
    %c0_i32_1 = arith.constant 0 : i32
    return %arg0, %c0_i32, %c0_i32_0 : i32, i32, i32
  }
}

</mosaic_0001>

<bundles_post_ra>
// kernel: mcs_forward.9
= control target key start
LH: loop header
LB: loop body
LE: loop exit
PB: predicated region body
PF: predicated region fallthrough
CT: control target
= control target key end

     0   :  { %10 = vsyncpa [#allocation3], 0  ;;  %s1292_s0 = inlined_call_operand.vmem [shape: f32[2,16,32], index: 0, kind: input, shape index: {}]   ;;  %s1293_s1 = inlined_call_operand.vmem [shape: bf16[1,32,256], index: 1, kind: input, shape index: {}]   ;;  %s1294_s2 = inlined_call_operand.vmem [shape: bf16[1,128,32], index: 2, kind: input, shape index: {}]   ;;  %s1295_s3 = inlined_call_operand.vmem [shape: f32[1,7,32], index: 3, kind: input, shape index: {}]   ;;  %s1296_s4 = inlined_call_operand.vmem [shape: f32[1,1,128], index: 4, kind: input, shape index: {}]   ;;  %s1297_s5 = inlined_call_operand.hbm [shape: f32[2,16,32], index: 5, kind: output, shape index: {}]  }
   0x1   :  { %12 = vsyncpa [#allocation3 + $0x1], 0  ;;  %s1069_s18 = smov 0   ;;  %s1071_s19 = smov 0  }
   0x2   :  { %s1073_s20 = smov 0   ;;  %s1075_s21 = smov 0  }
   0x3   :  { %s1077_s22 = smov 0   ;;  %s1079_s23 = smov 0  }
   0x4 LB: > { %s795_s24 = sadd.s32 4294967295, %s1031_s23   ;;  %s796_s25 = sadd.s32 4294967294, %s1031_s23   ;;  %s1031_s23 = sphi %s1079_s23, %s18_s23   ;;  %s1027_s22 = sphi %s1077_s22, %s1304_s22   ;;  %s1023_s21 = sphi %s1075_s21, %s1303_s21   ;;  %s1019_s20 = sphi %s1073_s20, %s1302_s20   ;;  %s1015_s19 = sphi %s1071_s19, %s1301_s19   ;;  %s1011_s18 = sphi %s1069_s18, %s1300_s18  }
   0x5   : > { %s30_s26 = sadd.s32 1, %s1027_s22  ;;  %s167_s27 = sadd.s32 1, %s1019_s20 }
   0x6   : > { %p32_p0 = scmp.ge.s32.totalorder %s30_s26, 2  ;;  %p177_p1 = scmp.ne.s32.totalorder %s1019_s20, %s1015_s19 }
   0x7   : > { %p178_p2 = scmp.eq.s32.totalorder %s795_s24, 1  ;;  %p183_p3 = scmp.ne.s32.totalorder %s1015_s19, %s1011_s18 }
   0x8   : > { %s1306_s26 = smov (%p32_p0, %s30_s26), 0  ;;  %p184_p5 = scmp.eq.s32.totalorder %s796_s25, 1 }
   0x9   : > { %p1109_p4 = por %p178_p2, %p177_p1  ;;  %s164_s29 = ssub.s32 %s1027_s22, %s1306_s26 }
   0xa   : > { %p803_p6 = scmp.ge.s32.totalorder %s1031_s23, 1  ;;  %p165_p7 = scmp.eq.s32.totalorder %s164_s29, 0 }
   0xb   : > { %p1116_p8 = por %p184_p5, %p183_p3  ;;  %p239_p9 = scmp.lt.s32.totalorder %s1031_s23, 3 }
   0xc   : > { %s1122_s6 = scalar_select %p165_p7, %s1019_s20, %s167_s27  }
   0xd   : > { %p240_p10 = pnand %p803_p6, %p239_p9 }
   0xe   : > { %s281_s7 = sand.u32 (!%p240_p10), 1, %s1015_s19   ;;  %p284_p11 = scmp.lt.s32.totalorder (!%p240_p10), %s1023_s21, 1  ;;  %vm313_vm0 = vcmask (!%p240_p10), 261120   ;;  %v919_v16 = vld [vmem:[%s1293_s1 + $0x4] ss:$8 sps:$4 sm:$0xff] (!%p240_p10)   ;;  %v1033_v20 = vmov (!%p240_p10), 0   ;;  %v348_v25 = vlaneseq (!%p240_p10) }
   0xf   : > { %243 = sbr.rel (%p240_p10) target bundleno = 1462 (0x5b6), region = 40  ;;  %s804_s8 = sshll.u32 (!%p240_p10), %s281_s7, 4  ;;  %v921_v17 = vld [vmem:[%s1293_s1] ss:$8 sps:$4 sm:$0xff] (!%p240_p10)   ;;  %388 = vmatprep.subr.bf16.mxu0 (!%p240_p10), %v919_v16  ;;  %v922_v18 = vld [vmem:[%s1293_s1 + $0x14] ss:$8 sps:$4 sm:$0xff] (!%p240_p10)   ;;  %420 = vmatprep.mubr.bf16.mxu0 (!%p240_p10), %v1033_v20 }
  0x10   : > { %s1132_s14 = scalar_lea.vmem (!%p240_p10), [#allocation2], %s804_s8  ;;  %389 = vmatpush1.bf16.msra.mxu0 (!%p240_p10), %v921_v17  ;;  %v924_v19 = vld [vmem:[%s1293_s1 + $0x10] ss:$8 sps:$4 sm:$0xff] (!%p240_p10)   ;;  %v1164_v28 = vshrl.u32 (!%p240_p10), %v348_v25, 7  ;;  %v1170_v30 = vld [vmem:[%s1295_s3] sm:$0x7f] (!%p240_p10) }
  0x11   : > { %390 = vmatprep.subr.bf16.mxu0 (!%p240_p10), %v922_v18  ;;  %v925_v43 = vld [vmem:[%s1294_s2] sm:$0xff] (!%p240_p10)   ;;  %v1034_v44 = vmov (!%p240_p10), 0.0   ;;  %v926_v45 = vld [vmem:[%s1294_s2 + $0x8] sm:$0xff] (!%p240_p10)   ;;  %v927_v46 = vld [vmem:[%s1294_s2 + $0x10] sm:$0xff] (!%p240_p10)   ;;  %vm1035_vm1 = vmmov (!%p240_p10), 0   ;;  %s829_s17 = sshll.u32 (!%p240_p10), %s1023_s21, 8 }
  0x12   : > { %v350_v29 = vsub.s32 (!%p240_p10), 0, %v1164_v28  ;;  %v356_v34 = vsub.s32 (!%p240_p10), 1, %v1164_v28  ;;  %839 = vmatprep.subr.bf16.mxu1 (!%p240_p10), %v1034_v44  ;;  %v928_v47 = vld [vmem:[%s1294_s2 + $0x18] sm:$0xff] (!%p240_p10)   ;;  %v929_v48 = vld [vmem:[%s1294_s2 + $0x20] sm:$0xff] (!%p240_p10)   ;;  %v930_v49 = vld [vmem:[%s1294_s2 + $0x28] sm:$0xff] (!%p240_p10)   ;;  %855 = vmatprep.mubr.msk.bf16.mxu1 (!%p240_p10), %vm1035_vm1, %v1034_v44  ;;  %v481_v16 = vsub.s32 (!%p240_p10), 2, %v1164_v28  ;;  %s1236_s29 = scalar_lea.hbm (!%p240_p10), %s1297_s5, %s829_s17 }
  0x13   : > { %840 = vmatpush3.bf16.msra.mxu1 (!%p240_p10), %v925_v43  ;;  %v931_v50 = vld [vmem:[%s1294_s2 + $0x30] sm:$0xff] (!%p240_p10)   ;;  %v932_v51 = vld [vmem:[%s1294_s2 + $0x38] sm:$0xff] (!%p240_p10)   ;;  %v812_v52 = vld [vmem:[%s1296_s4] ss:$0 sm:$0xff] (!%p240_p10)  ;;  %s668_s24 = sshll.u32 (!%p240_p10), %s1132_s14, 4  ;;  %s1238_s24 = int_to_ptr.vmem [resolvable:$true] %s668_s24 }
  0x14   : > { %391 = vmatpush1.bf16.msra.mxu0 (!%p240_p10), %v924_v19  ;;  %v351_v33 = vrot.slane (!%p240_p10), %v1170_v30, %v350_v29  ;;  %v357_v38 = vrot.slane (!%p240_p10), %v1170_v30, %v356_v34  ;;  %841 = vmatprep.subr.bf16.mxu1 (!%p240_p10), %v1034_v44  ;;  %v482_v17 = vrot.slane (!%p240_p10), %v1170_v30, %v481_v16  ;;  %s953_s8 = scalar_lea.vmem (!%p240_p10), %s1238_s24, 256 }
  0x15   : > { %p954_p12 = scmp.ne.s32.totalorder (!%p240_p10), %s1238_s24, %s953_s8 }
  0x16   : > { %s285_s9 = scalar_select %p284_p11, %s1023_s21, 1 }
  0x17   : > { %842 = vmatpush3.bf16.msra.mxu1 %v926_v45  ;;  %s1246_s21 = scalar_lea.sflag [#allocation3], %s281_s7  ;;  %p955_p13 = pnand %p954_p12, %p1109_p4 }
  0x18   : > { %s828_s10 = sshll.u32 %s285_s9, 4  ;;  %843 = vmatprep.subr.bf16.mxu1 %v1034_v44  ;;  %s1036_s9 = smov [#allocation2]  }
  0x19   : > { %s288_s13 = scalar_lea.vmem %s1292_s0, %s828_s10  ;;  %p956_p0 = pneg %p955_p13 }
  0x1a   : > { %v311_v0 = vld [vmem:[%s288_s13] sm:$0xff]  ;;  %v312_v1 = vld [vmem:[%s288_s13 + $0x8] sm:$0xff]  ;;  %s957_s10 = sshll.u32 %s1036_s9, 4  ;;  %s958_s10 = int_to_ptr.vmem [resolvable:$false] %s957_s10 }
  0x1b   : > { %314 = vst.msk [vmem:[%s1132_s14] sm:$0xff] %vm313_vm0, %v311_v0  ;;  %315 = vst.msk [vmem:[%s1132_s14 + $0x8] sm:$0xff] %vm313_vm0, %v312_v1  ;;  %844 = vmatpush3.bf16.msra.mxu1 %v927_v46  ;;  %v602_v46 = vsub.s32 3, %v1164_v28  ;;  %s959_s11 = scalar_lea.vmem %s958_s10, 512  ;;  %p960_p1 = scmp.lt.s32.totalorder %s1238_s24, %s958_s10 }
  0x1c   : > { %845 = vmatprep.subr.bf16.mxu1 %v1034_v44  ;;  %p961_p2 = scmp.lt.s32.totalorder %s959_s11, %s953_s8 }
  0x1e   : > { %p962_p3 = por %p961_p2, %p960_p1 }
  0x1f   : > { %846 = vmatpush3.bf16.msra.mxu1 %v928_v47  ;;  %v608_v47 = vsub.s32 4, %v1164_v28 }
  0x20   : > { %847 = vmatprep.subr.bf16.mxu1 %v1034_v44  ;;  %p963_p5 = pnand %p962_p3, %p956_p0 }
  0x22   : > { %v1139_v2 = vld [vmem:[%s1132_s14] sm:$0xff]  ;;  %v1142_v3 = vld [vmem:[%s1132_s14 + $0x8] sm:$0xff] }
  0x23   : > { %v321_v4 = vsel %vm313_vm0, %v1139_v2, 0.0  ;;  %v324_v5 = vsel %vm313_vm0, %v1142_v3, 0.0  ;;  %848 = vmatpush3.bf16.msra.mxu1 %v929_v48  ;;  %v603_v48 = vrot.slane %v1170_v30, %v602_v46 }
  0x24   : > { %322 = vadd.xlane.f32.xlu0 %v321_v4  ;;  %849 = vmatprep.subr.bf16.mxu1 %v1034_v44 }
  0x27   : > { %850 = vmatpush3.bf16.msra.mxu1 %v930_v49 }
  0x28   : > { %325 = vadd.xlane.f32.xlu0 %v324_v5  ;;  %851 = vmatprep.subr.bf16.mxu1 %v1034_v44 }
  0x2b   : > { %852 = vmatpush3.bf16.msra.mxu1 %v931_v50 }
  0x2c   : > { %853 = vmatprep.subr.bf16.mxu1 %v1034_v44 }
  0x2f   : > { %854 = vmatpush3.bf16.msra.mxu1 %v932_v51  ;;  %v609_v51 = vrot.slane %v1170_v30, %v608_v47 }
  0xb1   : > { %v323_v6 = vpop.xlane.xlu0 %322 }
  0xb2   : > { %v328_v7 = vmul.f32 0.03125, %v323_v6 }
  0xb4   : > { %v330_v8 = vsub.f32 %v1139_v2, %v328_v7 }
  0xb5   : > { %v326_v9 = vpop.xlane.xlu0 %325 }
  0xb6   : > { %v329_v10 = vmul.f32 0.03125, %v326_v9  ;;  %v332_v11 = vmul.f32 %v330_v8, %v330_v8 }
  0xb8   : > { %v331_v12 = vsub.f32 %v1142_v3, %v329_v10  ;;  %v334_v13 = vsel %vm313_vm0, %v332_v11, 0.0 }
  0xb9   : > { %335 = vadd.xlane.f32.xlu1 %v334_v13 }
  0xba   : > { %v333_v14 = vmul.f32 %v331_v12, %v331_v12 }
  0xbc   : > { %v337_v15 = vsel %vm313_vm0, %v333_v14, 0.0 }
  0xbd   : > { %338 = vadd.xlane.f32.xlu1 %v337_v15 }
 0x146   : > { %v336_v21 = vpop.xlane.xlu1 %335 }
 0x147   : > { %v340_v22 = vmul.f32 0.03125, %v336_v21 }
 0x149   : > { %v342_v23 = vadd.f32 1e-05, %v340_v22 }
 0x14a   : > { %v339_v24 = vpop.xlane.xlu1 %338 }
 0x14b   : > { %933 = vrsqrt.f32 %v342_v23  ;;  %v341_v26 = vmul.f32 0.03125, %v339_v24 }
 0x14d   : > { %v343_v27 = vadd.f32 1e-05, %v341_v26 }
 0x14f   : > { %935 = vrsqrt.f32 %v343_v27 }
 0x155   : > { %v934_v31 = vpop.eup %933 }
 0x156   : > { %v346_v32 = vmul.f32 %v934_v31, %v330_v8 }
 0x158   : > { %v352_v37 = vmul.f32 %v351_v33, %v346_v32 }
 0x159   : > { %v936_v35 = vpop.eup %935 }
 0x15a   : > { %v347_v36 = vmul.f32 %v936_v35, %v331_v12  ;;  %v1175_v40 = vadd.f32 %v357_v38, %v352_v37 }
 0x15c   : > { %v353_v39 = vmul.f32 %v351_v33, %v347_v36 }
 0x15e   : > { %v1177_v41 = vadd.f32 %v357_v38, %v353_v39 }
 0x160   : > { %v360_v42 = vpack.c.bf16 %v1177_v41, %v1175_v40 }
 0x162   : > { %811 = vmatmul.mubr.msk.bf16.vlgmr.msra.gmra.mrb[0].mxu0 %vm313_vm0, %v360_v42 }
 0x235   : > { %v422_v53 = vpop.f32.mrb[0].mxu0 }
 0x236   : > { %v424_v54 = vpop.f32.mrb[1].mxu0 }
 0x237   : > { %v437_v55 = vadd.f32 %v812_v52, %v424_v54  ;;  %v426_v56 = vpop.f32.mrb[2].mxu0 }
 0x238   : > { %v451_v57 = vadd.f32 %v426_v56, %v422_v53  ;;  %v428_v58 = vpop.f32.mrb[3].mxu0 }
 0x239   : > { %v813_v59 = vmul.f32 -1.442695, %v437_v55  ;;  %v438_v60 = vadd.f32 %v812_v52, %v428_v58 }
 0x23a   : > { %v452_v61 = vrot.slane %v451_v57, 4 }
 0x23b   : > { %937 = vpow2.f32 %v813_v59  ;;  %v814_v62 = vmul.f32 -1.442695, %v438_v60 }
 0x23c   : > { %v453_v63 = vadd.f32 %v452_v61, %v451_v57 }
 0x23d   : > { %939 = vpow2.f32 %v814_v62 }
 0x23e   : > { %v454_v0 = vrot.slane %v453_v63, 2 }
 0x240   : > { %v455_v4 = vadd.f32 %v454_v0, %v453_v63 }
 0x242   : > { %v456_v8 = vrot.slane %v455_v4, 1 }
 0x244   : > { %v457_v9 = vadd.f32 %v456_v8, %v455_v4 }
 0x245   : > { %v938_v1 = vpop.eup %937 }
 0x246   : > { %v445_v5 = vadd.f32 1.0, %v938_v1  ;;  %v459_v10 = vmul.f32 0.0625, %v457_v9 }
 0x247   : > { %v940_v6 = vpop.eup %939 }
 0x248   : > { %941 = vrcp.f32 %v445_v5  ;;  %v446_v7 = vadd.f32 1.0, %v940_v6 }
 0x24a   : > { %943 = vrcp.f32 %v446_v7 }
 0x252   : > { %v942_v11 = vpop.eup %941 }
 0x253   : > { %v460_v12 = vmul.f32 %v942_v11, %v459_v10 }
 0x254   : > { %v944_v13 = vpop.eup %943 }
 0x255   : > { %v461_v14 = vmul.f32 %v944_v13, %v459_v10 }
 0x257   : > { %v462_v15 = vpack.c.bf16 %v461_v14, %v460_v12  ;;  %v642_v14 = vsub.s32 5, %v1164_v28 }
 0x259   : > { %856 = vmatmul.mubr.bf16.vlgmr.msra.gmra.mrb[0].mxu1 %v462_v15  ;;  %v648_v15 = vsub.s32 6, %v1164_v28  ;;  %v643_v16 = vrot.slane %v1170_v30, %v642_v14 }
 0x32c   : > { %v565_v18 = vpop.f32.mrb[0].mxu1 }
 0x32d   : > { %v566_v19 = vadd.f32 %v565_v18, %v482_v17  ;;  %v857_v20 = vpop.f32.mrb[1].mxu1  ;;  %v649_v18 = vrot.slane %v1170_v30, %v648_v15 }
 0x32e   : > { %v568_v21 = vpop.f32.mrb[2].mxu1 }
 0x32f   : > { %v569_v22 = vadd.f32 %v568_v21, %v482_v17  ;;  %v858_v23 = vpop.f32.mrb[3].mxu1  ;;  %v572_v24 = vadd.f32 %v566_v19, %v1175_v40 }
 0x331   : > { %v574_v25 = vsel %vm313_vm0, %v572_v24, 0.0  ;;  %v573_v26 = vadd.f32 %v569_v22, %v1177_v41 }
 0x332   : > { %575 = vadd.xlane.f32.xlu0 %v574_v25 }
 0x333   : > { %v577_v27 = vsel %vm313_vm0, %v573_v26, 0.0 }
 0x334   : > { %578 = vadd.xlane.f32.xlu1 %v577_v27 }
 0x3bf   : > { %v576_v29 = vpop.xlane.xlu0 %575 }
 0x3c0   : > { %v580_v31 = vmul.f32 0.03125, %v576_v29 }
 0x3c1   : > { %v579_v32 = vpop.xlane.xlu1 %578 }
 0x3c2   : > { %v582_v33 = vsub.f32 %v572_v24, %v580_v31  ;;  %v581_v34 = vmul.f32 0.03125, %v579_v32 }
 0x3c4   : > { %v583_v35 = vsub.f32 %v573_v26, %v581_v34  ;;  %v584_v36 = vmul.f32 %v582_v33, %v582_v33 }
 0x3c6   : > { %v586_v37 = vsel %vm313_vm0, %v584_v36, 0.0  ;;  %v585_v38 = vmul.f32 %v583_v35, %v583_v35 }
 0x3c7   : > { %587 = vadd.xlane.f32.xlu0 %v586_v37 }
 0x3c8   : > { %v589_v39 = vsel %vm313_vm0, %v585_v38, 0.0 }
 0x3c9   : > { %590 = vadd.xlane.f32.xlu1 %v589_v39 }
 0x454   : > { %v588_v40 = vpop.xlane.xlu0 %587 }
 0x455   : > { %v592_v41 = vmul.f32 0.03125, %v588_v40 }
 0x456   : > { %v591_v42 = vpop.xlane.xlu1 %590 }
 0x457   : > { %v594_v43 = vadd.f32 1e-05, %v592_v41  ;;  %v593_v44 = vmul.f32 0.03125, %v591_v42 }
 0x459   : > { %945 = vrsqrt.f32 %v594_v43  ;;  %v595_v45 = vadd.f32 1e-05, %v593_v44 }
 0x45b   : > { %947 = vrsqrt.f32 %v595_v45 }
 0x463   : > { %v946_v49 = vpop.eup %945 }
 0x464   : > { %v598_v50 = vmul.f32 %v946_v49, %v582_v33 }
 0x465   : > { %v948_v52 = vpop.eup %947 }
 0x466   : > { %v604_v53 = vmul.f32 %v603_v48, %v598_v50  ;;  %v599_v54 = vmul.f32 %v948_v52, %v583_v35 }
 0x468   : > { %v610_v55 = vadd.f32 %v609_v51, %v604_v53  ;;  %v605_v56 = vmul.f32 %v603_v48, %v599_v54 }
 0x46a   : > { %v612_v57 = vadd.f32 %v610_v55, %v1139_v2  ;;  %v611_v58 = vadd.f32 %v609_v51, %v605_v56 }
 0x46c   : > { %v614_v59 = vsel %vm313_vm0, %v612_v57, 0.0  ;;  %v613_v60 = vadd.f32 %v611_v58, %v1142_v3 }
 0x46d   : > { %615 = vadd.xlane.f32.xlu0 %v614_v59 }
 0x46e   : > { %v617_v61 = vsel %vm313_vm0, %v613_v60, 0.0 }
 0x46f   : > { %618 = vadd.xlane.f32.xlu1 %v617_v61 }
 0x4fa   : > { %v616_v62 = vpop.xlane.xlu0 %615 }
 0x4fb   : > { %v620_v63 = vmul.f32 0.03125, %v616_v62 }
 0x4fc   : > { %v619_v0 = vpop.xlane.xlu1 %618 }
 0x4fd   : > { %v622_v1 = vsub.f32 %v612_v57, %v620_v63  ;;  %v621_v4 = vmul.f32 0.03125, %v619_v0 }
 0x4ff   : > { %v623_v5 = vsub.f32 %v613_v60, %v621_v4  ;;  %v624_v6 = vmul.f32 %v622_v1, %v622_v1 }
 0x501   : > { %v626_v7 = vsel %vm313_vm0, %v624_v6, 0.0  ;;  %v625_v8 = vmul.f32 %v623_v5, %v623_v5 }
 0x502   : > { %627 = vadd.xlane.f32.xlu0 %v626_v7 }
 0x503   : > { %v629_v2 = vsel %vm313_vm0, %v625_v8, 0.0 }
 0x504   : > { %630 = vadd.xlane.f32.xlu1 %v629_v2 }
 0x58f   : > { %v628_v9 = vpop.xlane.xlu0 %627 }
 0x590   : > { %v632_v3 = vmul.f32 0.03125, %v628_v9 }
 0x591   : > { %v631_v10 = vpop.xlane.xlu1 %630 }
 0x592   : > { %v634_v11 = vadd.f32 1e-05, %v632_v3  ;;  %v633_v12 = vmul.f32 0.03125, %v631_v10 }
 0x594   : > { %949 = vrsqrt.f32 %v634_v11  ;;  %v635_v13 = vadd.f32 1e-05, %v633_v12 }
 0x596   : > { %951 = vrsqrt.f32 %v635_v13 }
 0x59e   : > { %v950_v17 = vpop.eup %949 }
 0x59f   : > { %v638_v19 = vmul.f32 %v950_v17, %v622_v1 }
 0x5a0   : > { %v952_v20 = vpop.eup %951 }
 0x5a1   : > { %v644_v21 = vmul.f32 %v643_v16, %v638_v19  ;;  %v639_v22 = vmul.f32 %v952_v20, %v623_v5 }
 0x5a3   : > { %v650_v23 = vadd.f32 %v649_v18, %v644_v21  ;;  %v645_v24 = vmul.f32 %v643_v16, %v639_v22 }
 0x5a5   : > { %652 = vst.msk [vmem:[%s1132_s14] sm:$0xff] %vm313_vm0, %v650_v23  ;;  %v651_v28 = vadd.f32 %v649_v18, %v645_v24 }
 0x5a7   : > { %653 = vst.msk [vmem:[%s1132_s14 + $0x8] sm:$0xff] %vm313_vm0, %v651_v28 }
 0x5a8   : > { %966 = shalt.err (!%p963_p5)
}
 0x5a9   : > { %s967_s7 = scalar_lea.hbm %s1236_s29, 256  ;;  %s971_s13 = scalar_lea.hbm %s1297_s5, 512 }
 0x5aa   : > { %p968_p6 = scmp.ne.s32.totalorder %s1236_s29, %s967_s7  ;;  %p972_p10 = scmp.lt.u32.totalorder %s1236_s29, %s1297_s5 }
 0x5ab   : > { %p973_p11 = scmp.lt.u32.totalorder %s971_s13, %s967_s7  ;;  %p975_p13 = scmp.lt.u32.totalorder %s967_s7, %s1236_s29 }
 0x5ac   : > { %p969_p7 = pnand %p968_p6, %p1109_p4 }
 0x5ad   : > { %p974_p12 = por %p973_p11, %p972_p10 }
 0x5ae   : > { %p970_p9 = pneg %p969_p7 }
 0x5af   : > { %p976_p0 = por %p975_p13, %p974_p12 }
 0x5b1   : > { %p977_p1 = pnand %p976_p0, %p970_p9 }
 0x5b3   : > { %980 = shalt.err (!%p977_p1)
}
 0x5b4   : > { %s1037_s17 = smov 128   ;;  %s1038_s25 = smov 8  }
 0x5b5   : > { %859 = dma.vmem_to_hbm [thread:$0]  (%p1109_p4), %s1238_s24, 256, %s1236_s29, %s1246_s21, %s1037_s17, %s1037_s17, %s1038_s25  }
 0x5b6 PF: > { %p865_p2 = scmp.ge.s32.totalorder %s1031_s23, 2  ;;  %s683_s27 = sand.u32 1, %s1011_s18  }
 0x5b7   : > { %s684_s8 = scalar_lea.sflag [#allocation3], %s683_s27 }
 0x5b8   : > { %p862_p3 = pnand %p865_p2, %p1116_p8 }
 0x5ba   : > { %1006 = dma.done.wait (!%p862_p3), %s684_s8, 256  }
 0x5bb   : > { %1008 = vsyncadd (!%p862_p3), %s684_s8, 4294967040  ;;  %s18_s23 = sadd.s32 1, %s1031_s23   ;;  %s1300_s18 = smov %s1015_s19 }
 0x5bc   : > { %p15_p5 = scmp.ge.s32.totalorder %s18_s23, 4   ;;  %s1301_s19 = smov %s1019_s20 }
 0x5bd   : > { %s1302_s20 = smov %s1122_s6  ;;  %s1303_s21 = smov %s1027_s22 }
 0x5be   : > { %s1304_s22 = smov %s1306_s26  ;;  %17 = sbr.rel (!%p15_p5) target bundleno = 4 (0x4), region = 91 }
 0x5c5   :  { %689 = vsyncpa [#allocation3], 1 }
 0x5c6   :  { %691 = vsyncpa [#allocation3 + $0x1], 1 }

// kernel: mcs_forward.6
= control target key start
LH: loop header
LB: loop body
LE: loop exit
PB: predicated region body
PF: predicated region fallthrough
CT: control target
= control target key end

     0   :  { %s885_s24 = smov 0   ;;  %s887_s25 = smov 0   ;;  %s980_s0 = inlined_call_operand.vmem [shape: f32[2,8,32], index: 0, kind: input, shape index: {}]   ;;  %s981_s1 = inlined_call_operand.vmem [shape: f32[8,32], index: 1, kind: input, shape index: {}]   ;;  %s982_s2 = inlined_call_operand.vmem [shape: bf16[32,32], index: 2, kind: input, shape index: {}]   ;;  %s983_s3 = inlined_call_operand.vmem [shape: f32[1,32], index: 3, kind: input, shape index: {}]   ;;  %s984_s4 = inlined_call_operand.vmem [shape: f32[2,8,8], index: 4, kind: input, shape index: {}]   ;;  %s985_s5 = inlined_call_operand.vmem [shape: bf16[1,32,32], index: 5, kind: input, shape index: {}]   ;;  %s986_s6 = inlined_call_operand.vmem [shape: f32[1,5,32], index: 6, kind: input, shape index: {}]   ;;  %s987_s7 = inlined_call_operand.vmem [shape: f32[2,8,32], index: 7, kind: output, shape index: {}]  }
   0x1   :  { %s889_s26 = smov 0  }
   0x2 LB: > { %s29_s27 = sadd.s32 1, %s837_s25  ;;  %p739_p0 = scmp.ge.s32.totalorder %s841_s26, 1  ;;  %s841_s26 = sphi %s889_s26, %s17_s26   ;;  %s837_s25 = sphi %s887_s25, %s989_s25   ;;  %s833_s24 = sphi %s885_s24, %s988_s24  }
   0x3   : > { %p31_p1 = scmp.ge.s32.totalorder %s29_s27, 2  ;;  %p276_p2 = scmp.lt.s32.totalorder %s841_s26, 3 }
   0x5   : > { %s991_s27 = smov (%p31_p1, %s29_s27), 0  ;;  %p277_p3 = pnand %p739_p0, %p276_p2 }
   0x6   : > { %v809_v0 = vld [vmem:[%s982_s2] sm:$0xff] (!%p277_p3)   ;;  %v843_v1 = vmov (!%p277_p3), 0.0   ;;  %v810_v2 = vld [vmem:[%s982_s2 + $0x8] sm:$0xff] (!%p277_p3)   ;;  %vm844_vm0 = vmmov (!%p277_p3), 0   ;;  %p319_p4 = scmp.lt.s32.totalorder (!%p277_p3), %s833_s24, 1  ;;  %vm372_vm1 = vcmask (!%p277_p3), 261120   ;;  %v481_v18 = vlaneseq (!%p277_p3) }
   0x7   : > { %280 = sbr.rel (%p277_p3) target bundleno = 1590 (0x636), region = 48  ;;  %761 = vmatprep.subr.bf16.mxu0 (!%p277_p3), %v843_v1  ;;  %769 = vmatprep.subr.bf16.mxu1 (!%p277_p3), %v843_v1  ;;  %v346_v3 = vld [vmem:[%s981_s1] sm:$0xff] (!%p277_p3)  ;;  %v812_v8 = vld [vmem:[%s985_s5 + $0x8] sm:$0xff] (!%p277_p3)   ;;  %vm559_vm2 = vcmask (!%p277_p3), 1043456   ;;  %vm538_vm3 = vcmask (!%p277_p3), 64512  }
   0x8   : > { %762 = vmatpush3.bf16.msra.mxu0 (!%p277_p3), %v809_v0  ;;  %765 = vmatprep.mubr.msk.bf16.mxu0 (!%p277_p3), %vm844_vm0, %v843_v1  ;;  %v811_v7 = vld [vmem:[%s985_s5] sm:$0xff] (!%p277_p3)   ;;  %v941_v19 = vshrl.u32 (!%p277_p3), %v481_v18, 7 }
   0x9   : > { %763 = vmatprep.subr.bf16.mxu0 (!%p277_p3), %v843_v1  ;;  %773 = vmatprep.mubr.msk.bf16.mxu1 (!%p277_p3), %vm844_vm0, %v843_v1  ;;  %v743_v9 = vld [vmem:[%s983_s3] ss:$0 sm:$0xff] (!%p277_p3) }
   0xa   : > { %770 = vmatpush3.bf16.msra.mxu1 (!%p277_p3), %v811_v7  ;;  %v483_v20 = vsub.s32 (!%p277_p3), 0, %v941_v19  ;;  %v947_v21 = vld [vmem:[%s986_s6] sm:$0x1f] (!%p277_p3)  ;;  %v491_v22 = vsub.s32 (!%p277_p3), 1, %v941_v19  ;;  %v554_v54 = vsub.s32 (!%p277_p3), 2, %v941_v19  ;;  %v620_v7 = vsub.s32 (!%p277_p3), 3, %v941_v19 }
   0xb   : > { %771 = vmatprep.subr.bf16.mxu1 (!%p277_p3), %v843_v1 }
   0xc   : > { %764 = vmatpush3.bf16.msra.mxu0 (!%p277_p3), %v810_v2  ;;  %v484_v23 = vrot.slane (!%p277_p3), %v947_v21, %v483_v20  ;;  %v492_v24 = vrot.slane (!%p277_p3), %v947_v21, %v491_v22  ;;  %v555_v55 = vrot.slane (!%p277_p3), %v947_v21, %v554_v54 }
   0xd   : > { %777 = vmatprep.subr.bf16.mxu0 (!%p277_p3), %v843_v1 }
   0xe   : > { %s993_s24 = smov (!%p319_p4, %s833_s24), 1  ;;  %772 = vmatpush3.bf16.msra.mxu1 %v812_v8  ;;  %v625_v8 = vsub.s32 4, %v941_v19 }
   0xf   : > { %s911_s9 = sshll.u32 %s993_s24, 3 }
  0x10   : > { %s322_s14 = scalar_lea.vmem %s980_s0, %s911_s9  ;;  %s935_s23 = scalar_lea.vmem %s987_s7, %s911_s9 }
  0x11   : > { %v345_v4 = vld [vmem:[%s322_s14] sm:$0xff]  ;;  %s326_s8 = scalar_lea.vmem %s984_s4, %s911_s9 }
  0x12   : > { %v347_v5 = vadd.f32 %v346_v3, %v345_v4  ;;  %v536_v41 = vld [vmem:[%s326_s8] sm:$0xff] }
  0x14   : > { %v348_v6 = vpack.c.bf16 %v347_v5, %v347_v5 }
  0x16   : > { %766 = vmatmul.mubr.msk.bf16.vlgmr.msra.gmra.mrb[0].mxu0 %vm372_vm1, %v348_v6 }
  0x17   : > { %779 = vmatprep.mubr.msk.bf16.mxu0 %vm844_vm0, %v843_v1 }
  0xe9   : > { %v410_v10 = vpop.f32.mrb[0].mxu0 }
  0xea   : > { %v411_v11 = vadd.f32 %v743_v9, %v410_v10  ;;  %v767_v12 = vpop.f32.mrb[1].mxu0  ;;  %v621_v9 = vrot.slane %v947_v21, %v620_v7 }
  0xeb   : > { %v413_v13 = vpop.f32.mrb[2].mxu0 }
  0xec   : > { %v416_v14 = vadd.f32 %v411_v11, %v347_v5  ;;  %v768_v15 = vpop.f32.mrb[3].mxu0  ;;  %v626_v11 = vrot.slane %v947_v21, %v625_v8 }
  0xee   : > { %417 = vst.msk [vmem:[%s935_s23] sm:$0xff] %vm372_vm1, %v416_v14 }
  0xf5   : > { %v418_v16 = vld [vmem:[%s935_s23] sm:$0xff] }
  0xf6   : > { %v420_v17 = vpack.c.bf16 %v418_v16, %v418_v16 }
  0xf8   : > { %774 = vmatmul.mubr.msk.bf16.vlgmr.msra.gmra.mrb[0].mxu1 %vm372_vm1, %v420_v17 }
 0x1cb   : > { %v475_v25 = vpop.f32.mrb[0].mxu1 }
 0x1cc   : > { %v551_v26 = vpack.c.bf16 %v475_v25, %v475_v25  ;;  %v775_v27 = vpop.f32.mrb[1].mxu1  ;;  %v485_v28 = vmul.f32 %v484_v23, %v475_v25  ;;  %v493_v33 = vmul.f32 %v492_v24, %v475_v25 }
 0x1cd   : > { %v478_v29 = vpop.f32.mrb[2].mxu1 }
 0x1ce   : > { %v776_v30 = vpop.f32.mrb[3].mxu1  ;;  %v561_v31 = vsel %vm559_vm2, %v551_v26, 0  ;;  %v486_v32 = vsel %vm372_vm1, %v485_v28, 0.0  ;;  %v494_v34 = vsel %vm372_vm1, %v493_v33, 0.0 }
 0x1cf   : > { %778 = vmatpush3.bf16.msra.mxu0 %v561_v31  ;;  %487 = vadd.xlane.f32.xlu0 %v486_v32 }
 0x1d3   : > { %495 = vadd.xlane.f32.xlu0 %v494_v34 }
 0x25c   : > { %v488_v35 = vpop.xlane.xlu0 %487 }
 0x25d   : > { %497 = vxpose.xlu1.b32.start.end [1/1] (short) (narrow) %v488_v35, 8 }
 0x260   : > { %v496_v38 = vpop.xlane.xlu0 %495 }
 0x2dd   : > { %v513_v36 = vpop.trf.xlu1 }
 0x2de   : > { %v532_v37 = vrot.slane %v513_v36, %v483_v20 }
 0x2e0   : > { %v533_v39 = vadd.f32 %v532_v37, %v496_v38 }
 0x2e2   : > { %v534_v40 = vmul.f32 0.2, %v533_v39 }
 0x2e4   : > { %v535_v42 = vmax.f32 %v533_v39, %v534_v40 }
 0x2e6   : > { %v537_v43 = vadd.f32 %v536_v41, %v535_v42 }
 0x2e8   : > { %v539_v44 = vsel %vm538_vm3, %v537_v43, -inf }
 0x2e9   : > { %540 = vmax.xlane.f32.xlu1 %v539_v44 }
 0x376   : > { %v541_v45 = vpop.xlane.xlu1 %540 }
 0x377   : > { %v542_v46 = vsub.f32 %v537_v43, %v541_v45 }
 0x379   : > { %v543_v47 = vmul.f32 1.442695, %v542_v46 }
 0x37b   : > { %813 = vpow2.f32 %v543_v47 }
 0x385   : > { %v814_v48 = vpop.eup %813 }
 0x386   : > { %v545_v49 = vsel %vm538_vm3, %v814_v48, 0.0 }
 0x387   : > { %546 = vadd.xlane.f32.xlu0 %v545_v49 }
 0x414   : > { %v547_v50 = vpop.xlane.xlu0 %546 }
 0x415   : > { %815 = vrcp.f32 %v547_v50 }
 0x41f   : > { %v816_v51 = vpop.eup %815 }
 0x420   : > { %v549_v52 = vmul.f32 %v816_v51, %v814_v48 }
 0x422   : > { %v550_v53 = vpack.c.bf16 %v549_v52, %v549_v52 }
 0x424   : > { %780 = vmatmul.mubr.msk.bf16.vlgmr.msra.gmra.mrb[4].mxu0 %vm538_vm3, %v550_v53 }
 0x4f7   : > { %v597_v56 = vpop.f32.mrb[4].mxu0 }
 0x4f8   : > { %v598_v57 = vadd.f32 %v597_v56, %v555_v55  ;;  %v781_v58 = vpop.f32.mrb[5].mxu0 }
 0x4f9   : > { %v600_v59 = vpop.f32.mrb[6].mxu0 }
 0x4fa   : > { %v782_v60 = vpop.f32.mrb[7].mxu0  ;;  %v603_v61 = vadd.f32 %v598_v57, %v418_v16 }
 0x4fc   : > { %v604_v62 = vsel %vm372_vm1, %v603_v61, 0.0 }
 0x4fd   : > { %605 = vadd.xlane.f32.xlu0 %v604_v62 }
 0x58a   : > { %v606_v63 = vpop.xlane.xlu0 %605 }
 0x58b   : > { %v608_v0 = vmul.f32 0.03125, %v606_v63 }
 0x58d   : > { %v609_v1 = vsub.f32 %v603_v61, %v608_v0 }
 0x58f   : > { %v610_v2 = vmul.f32 %v609_v1, %v609_v1 }
 0x591   : > { %v611_v3 = vsel %vm372_vm1, %v610_v2, 0.0 }
 0x592   : > { %612 = vadd.xlane.f32.xlu0 %v611_v3 }
 0x61f   : > { %v613_v4 = vpop.xlane.xlu0 %612 }
 0x620   : > { %v614_v5 = vmul.f32 0.03125, %v613_v4 }
 0x622   : > { %v615_v6 = vadd.f32 1e-05, %v614_v5 }
 0x624   : > { %817 = vrsqrt.f32 %v615_v6 }
 0x62e   : > { %v818_v10 = vpop.eup %817 }
 0x62f   : > { %v617_v12 = vmul.f32 %v818_v10, %v609_v1 }
 0x631   : > { %v622_v13 = vmul.f32 %v621_v9, %v617_v12 }
 0x633   : > { %v627_v14 = vadd.f32 %v626_v11, %v622_v13 }
 0x635   : > { %628 = vst.msk [vmem:[%s935_s23] sm:$0xff] %vm372_vm1, %v627_v14 }
 0x636 PF: > { %s17_s26 = sadd.s32 1, %s841_s26   ;;  %s988_s24 = smov %s837_s25 }
 0x637   : > { %p14_p5 = scmp.ge.s32.totalorder %s17_s26, 4   ;;  %s989_s25 = smov %s991_s27 }
 0x639   :  { %16 = sbr.rel (!%p14_p5) target bundleno = 2 (0x2), region = 91 }

// kernel: mcs_forward.5
= control target key start
LH: loop header
LB: loop body
LE: loop exit
PB: predicated region body
PF: predicated region fallthrough
CT: control target
= control target key end

     0   :  { %s4601_s24 = smov 0   ;;  %s4603_s25 = smov 0   ;;  %s5716_s0 = inlined_call_operand.vmem [shape: f32[2,8,8,32], index: 0, kind: input, shape index: {}]   ;;  %s5717_s1 = inlined_call_operand.vmem [shape: bf16[1,32,256], index: 1, kind: input, shape index: {}]   ;;  %s5718_s2 = inlined_call_operand.vmem [shape: bf16[1,32,512], index: 2, kind: input, shape index: {}]   ;;  %s5719_s3 = inlined_call_operand.vmem [shape: bf16[1,128,32], index: 3, kind: input, shape index: {}]   ;;  %s5720_s4 = inlined_call_operand.vmem [shape: bf16[1,128,32], index: 4, kind: input, shape index: {}]   ;;  %s5721_s5 = inlined_call_operand.vmem [shape: f32[1,12,32], index: 5, kind: input, shape index: {}]   ;;  %s5722_s6 = inlined_call_operand.vmem [shape: f32[1,2,128], index: 6, kind: input, shape index: {}]   ;;  %s5723_s7 = inlined_call_operand.vmem [shape: f32[2,8,8,32], index: 7, kind: output, shape index: {}]  }
   0x1   :  { %s4605_s26 = smov 0  }
   0x2 LB: > { %s29_s27 = sadd.s32 1, %s4551_s25  ;;  %p3824_p0 = scmp.ge.s32.totalorder %s4555_s26, 1  ;;  %s4555_s26 = sphi %s4605_s26, %s17_s26   ;;  %s4551_s25 = sphi %s4603_s25, %s5741_s25   ;;  %s4547_s24 = sphi %s4601_s24, %s5740_s24  }
   0x3   : > { %p31_p1 = scmp.ge.s32.totalorder %s29_s27, 2  ;;  %p308_p2 = scmp.lt.s32.totalorder %s4555_s26, 3 }
   0x5   : > { %s5743_s27 = smov (%p31_p1, %s29_s27), 0  ;;  %p309_p3 = pnand %p3824_p0, %p308_p2 }
   0x7   : > { %312 = sbr.rel (%p309_p3) target bundleno = 4074 (0xfea), region = 48 }
   0xe   : > { %p369_p4 = scmp.lt.s32.totalorder %s4547_s24, 1  ;;  %vm421_vm0 = vcmask 261120   ;;  %vm4559_vm1 = vmmov 0   ;;  %vm1448_vm2 = vcmask 523264   ;;  %vm1925_vm3 = vcmask 1043456   ;;  %s4560_s20 = smov 64  }
   0xf   : > { %vm1817_vm4 = vcmask 64512  }
  0x10   : > { %s5745_s24 = smov (!%p369_p4, %s4547_s24), 1 }
  0x11   : > { %s3919_s28 = sshll.u32 %s5745_s24, 6 }
  0x12   : > { %s373_s8 = scalar_lea.vmem %s5716_s0, %s3919_s28  ;;  %s4625_s11 = scalar_lea.vmem %s5723_s7, %s3919_s28 }
  0x13   : > { %v413_v0 = vld [vmem:[%s373_s8] sm:$0xff]  ;;  %v415_v1 = vld [vmem:[%s373_s8 + $0x10] sm:$0xff]  ;;  %v414_v2 = vld [vmem:[%s373_s8 + $0x8] sm:$0xff] }
  0x14   : > { %422 = vst.msk [vmem:[%s4625_s11] sm:$0xff] %vm421_vm0, %v413_v0  ;;  %424 = vst.msk [vmem:[%s4625_s11 + $0x10] sm:$0xff] %vm421_vm0, %v415_v1  ;;  %v416_v3 = vld [vmem:[%s373_s8 + $0x18] sm:$0xff]  ;;  %v417_v4 = vld [vmem:[%s373_s8 + $0x20] sm:$0xff] }
  0x15   : > { %423 = vst.msk [vmem:[%s4625_s11 + $0x8] sm:$0xff] %vm421_vm0, %v414_v2  ;;  %v418_v5 = vld [vmem:[%s373_s8 + $0x28] sm:$0xff]  ;;  %425 = vst.msk [vmem:[%s4625_s11 + $0x18] sm:$0xff] %vm421_vm0, %v416_v3  ;;  %v419_v6 = vld [vmem:[%s373_s8 + $0x30] sm:$0xff] }
  0x16   : > { %426 = vst.msk [vmem:[%s4625_s11 + $0x20] sm:$0xff] %vm421_vm0, %v417_v4  ;;  %427 = vst.msk [vmem:[%s4625_s11 + $0x28] sm:$0xff] %vm421_vm0, %v418_v5  ;;  %v420_v7 = vld [vmem:[%s373_s8 + $0x38] sm:$0xff]  ;;  %v4281_v0 = vld [vmem:[%s5717_s1 + $0x4] ss:$8 sps:$4 sm:$0xff]   ;;  %v4557_v4 = vmov 0  }
  0x17   : > { %428 = vst.msk [vmem:[%s4625_s11 + $0x30] sm:$0xff] %vm421_vm0, %v419_v6  ;;  %429 = vst.msk [vmem:[%s4625_s11 + $0x38] sm:$0xff] %vm421_vm0, %v420_v7  ;;  %v4283_v1 = vld [vmem:[%s5717_s1] ss:$8 sps:$4 sm:$0xff]   ;;  %611 = vmatprep.subr.bf16.mxu0 %v4281_v0  ;;  %v4284_v2 = vld [vmem:[%s5717_s1 + $0x14] ss:$8 sps:$4 sm:$0xff]   ;;  %643 = vmatprep.mubr.bf16.mxu0 %v4557_v4 }
  0x18   : > { %612 = vmatpush1.bf16.msra.mxu0 %v4283_v1  ;;  %v4286_v3 = vld [vmem:[%s5717_s1 + $0x10] ss:$8 sps:$4 sm:$0xff]   ;;  %1288 = vmatprep.mubr.bf16.mxu1 %v4557_v4 }
  0x19   : > { %613 = vmatprep.subr.bf16.mxu0 %v4284_v2 }
  0x1b   : > { %v430_v8 = vld [vmem:[%s4625_s11] sm:$0xff]  ;;  %v432_v9 = vld [vmem:[%s4625_s11 + $0x10] sm:$0xff] }
  0x1c   : > { %v431_v10 = vld [vmem:[%s4625_s11 + $0x8] sm:$0xff]  ;;  %v442_v11 = vsel %vm421_vm0, %v430_v8, 0.0  ;;  %v448_v12 = vsel %vm421_vm0, %v432_v9, 0.0  ;;  %v433_v13 = vld [vmem:[%s4625_s11 + $0x18] sm:$0xff]  ;;  %614 = vmatpush1.bf16.msra.mxu0 %v4286_v3 }
  0x1d   : > { %443 = vadd.xlane.f32.xlu0 %v442_v11  ;;  %449 = vadd.xlane.f32.xlu1 %v448_v12  ;;  %v445_v14 = vsel %vm421_vm0, %v431_v10, 0.0  ;;  %v434_v15 = vld [vmem:[%s4625_s11 + $0x20] sm:$0xff]  ;;  %v451_v16 = vsel %vm421_vm0, %v433_v13, 0.0  ;;  %v435_v17 = vld [vmem:[%s4625_s11 + $0x28] sm:$0xff] }
  0x1e   : > { %v454_v18 = vsel %vm421_vm0, %v434_v15, 0.0  ;;  %v457_v19 = vsel %vm421_vm0, %v435_v17, 0.0  ;;  %v436_v20 = vld [vmem:[%s4625_s11 + $0x30] sm:$0xff]  ;;  %v437_v21 = vld [vmem:[%s4625_s11 + $0x38] sm:$0xff] }
  0x1f   : > { %v460_v22 = vsel %vm421_vm0, %v436_v20, 0.0  ;;  %v463_v23 = vsel %vm421_vm0, %v437_v21, 0.0 }
  0x21   : > { %446 = vadd.xlane.f32.xlu0 %v445_v14  ;;  %452 = vadd.xlane.f32.xlu1 %v451_v16 }
  0x25   : > { %455 = vadd.xlane.f32.xlu0 %v454_v18  ;;  %458 = vadd.xlane.f32.xlu1 %v457_v19 }
  0x29   : > { %461 = vadd.xlane.f32.xlu0 %v460_v22  ;;  %464 = vadd.xlane.f32.xlu1 %v463_v23 }
  0xaa   : > { %v444_v24 = vpop.xlane.xlu0 %443  ;;  %v450_v25 = vpop.xlane.xlu1 %449 }
  0xab   : > { %v467_v26 = vmul.f32 0.03125, %v444_v24  ;;  %v469_v27 = vmul.f32 0.03125, %v450_v25  ;;  %v4721_v24 = vld [vmem:[%s5721_s5] sm:$0xff] }
  0xad   : > { %v4659_v28 = vsub.f32 %v430_v8, %v467_v26  ;;  %v4661_v29 = vsub.f32 %v432_v9, %v469_v27 }
  0xae   : > { %v447_v30 = vpop.xlane.xlu0 %446  ;;  %v453_v31 = vpop.xlane.xlu1 %452 }
  0xaf   : > { %v468_v32 = vmul.f32 0.03125, %v447_v30  ;;  %v470_v33 = vmul.f32 0.03125, %v453_v31  ;;  %v483_v34 = vmul.f32 %v4659_v28, %v4659_v28  ;;  %v485_v35 = vmul.f32 %v4661_v29, %v4661_v29 }
  0xb1   : > { %v4667_v36 = vsub.f32 %v431_v10, %v468_v32  ;;  %v4669_v37 = vsub.f32 %v433_v13, %v470_v33  ;;  %v491_v38 = vsel %vm421_vm0, %v483_v34, 0.0  ;;  %v497_v41 = vsel %vm421_vm0, %v485_v35, 0.0 }
  0xb2   : > { %492 = vadd.xlane.f32.xlu0 %v491_v38  ;;  %v456_v39 = vpop.xlane.xlu0 %455  ;;  %v459_v40 = vpop.xlane.xlu1 %458  ;;  %v547_v10 = vlaneseq }
  0xb3   : > { %v471_v42 = vmul.f32 0.03125, %v456_v39  ;;  %v472_v43 = vmul.f32 0.03125, %v459_v40  ;;  %v484_v44 = vmul.f32 %v4667_v36, %v4667_v36  ;;  %v486_v45 = vmul.f32 %v4669_v37, %v4669_v37 }
  0xb5   : > { %v4677_v46 = vsub.f32 %v434_v15, %v471_v42  ;;  %v4679_v47 = vsub.f32 %v435_v17, %v472_v43  ;;  %v494_v48 = vsel %vm421_vm0, %v484_v44, 0.0  ;;  %v500_v51 = vsel %vm421_vm0, %v486_v45, 0.0 }
  0xb6   : > { %498 = vadd.xlane.f32.xlu0 %v497_v41  ;;  %495 = vadd.xlane.f32.xlu1 %v494_v48  ;;  %v462_v49 = vpop.xlane.xlu0 %461  ;;  %v465_v50 = vpop.xlane.xlu1 %464  ;;  %v4713_v17 = vshrl.u32 %v547_v10, 7  ;;  %v4288_v10 = vld [vmem:[%s5719_s3 + $0x8] sm:$0xff]  }
  0xb7   : > { %v473_v52 = vmul.f32 0.03125, %v462_v49  ;;  %v474_v53 = vmul.f32 0.03125, %v465_v50  ;;  %v487_v54 = vmul.f32 %v4677_v46, %v4677_v46  ;;  %v488_v55 = vmul.f32 %v4679_v47, %v4679_v47 }
  0xb8   : > { %v4716_v22 = vsub.s32 0, %v4713_v17  ;;  %v4727_v34 = vsub.s32 1, %v4713_v17 }
  0xb9   : > { %v4687_v56 = vsub.f32 %v436_v20, %v473_v52  ;;  %v4689_v57 = vsub.f32 %v437_v21, %v474_v53  ;;  %v503_v58 = vsel %vm421_vm0, %v487_v54, 0.0  ;;  %v506_v59 = vsel %vm421_vm0, %v488_v55, 0.0 }
  0xba   : > { %501 = vadd.xlane.f32.xlu1 %v500_v51  ;;  %504 = vadd.xlane.f32.xlu0 %v503_v58  ;;  %5731 = vst [vmem:[#allocation2_spill] sm:$0xff] %v4716_v22  ;;  %v550_v33 = vrot.slane %v4721_v24, %v4716_v22  ;;  %5732 = vst [vmem:[#allocation3_spill] sm:$0xff] %v4727_v34  ;;  %v562_v42 = vrot.slane %v4721_v24, %v4727_v34 }
  0xbb   : > { %v489_v60 = vmul.f32 %v4687_v56, %v4687_v56  ;;  %v490_v61 = vmul.f32 %v4689_v57, %v4689_v57 }
  0xbd   : > { %v509_v62 = vsel %vm421_vm0, %v489_v60, 0.0  ;;  %v512_v63 = vsel %vm421_vm0, %v490_v61, 0.0 }
  0xbe   : > { %507 = vadd.xlane.f32.xlu1 %v506_v59  ;;  %510 = vadd.xlane.f32.xlu0 %v509_v62 }
  0xc2   : > { %513 = vadd.xlane.f32.xlu1 %v512_v63 }
 0x13f   : > { %v493_v5 = vpop.xlane.xlu0 %492 }
 0x140   : > { %v515_v6 = vmul.f32 0.03125, %v493_v5 }
 0x142   : > { %v523_v7 = vadd.f32 1e-05, %v515_v6 }
 0x143   : > { %v496_v8 = vpop.xlane.xlu1 %495  ;;  %v499_v9 = vpop.xlane.xlu0 %498 }
 0x144   : > { %4315 = vrsqrt.f32 %v523_v7  ;;  %v516_v11 = vmul.f32 0.03125, %v496_v8  ;;  %v517_v12 = vmul.f32 0.03125, %v499_v9 }
 0x146   : > { %v524_v13 = vadd.f32 1e-05, %v516_v11  ;;  %v525_v14 = vadd.f32 1e-05, %v517_v12  ;;  %v4289_v11 = vld [vmem:[%s5719_s3 + $0x10] sm:$0xff]   ;;  %v4290_v12 = vld [vmem:[%s5719_s3 + $0x18] sm:$0xff]  }
 0x147   : > { %v502_v15 = vpop.xlane.xlu1 %501  ;;  %v505_v16 = vpop.xlane.xlu0 %504 }
 0x148   : > { %4317 = vrsqrt.f32 %v524_v13  ;;  %v518_v18 = vmul.f32 0.03125, %v502_v15  ;;  %v519_v20 = vmul.f32 0.03125, %v505_v16  ;;  %v4291_v13 = vld [vmem:[%s5719_s3 + $0x20] sm:$0xff]   ;;  %v4293_v15 = vld [vmem:[%s5719_s3 + $0x30] sm:$0xff]   ;;  %v4294_v16 = vld [vmem:[%s5719_s3 + $0x38] sm:$0xff]  }
 0x149   : > { %4319 = vrsqrt.f32 %v525_v14  ;;  %v4292_v14 = vld [vmem:[%s5719_s3 + $0x28] sm:$0xff]  }
 0x14a   : > { %v526_v19 = vadd.f32 1e-05, %v518_v18  ;;  %v527_v26 = vadd.f32 1e-05, %v519_v20  ;;  %v440_v18 = vld [vmem:[%s5722_s6] sm:$0x3] }
 0x14b   : > { %v508_v21 = vpop.xlane.xlu1 %507  ;;  %v511_v30 = vpop.xlane.xlu0 %510 }
 0x14c   : > { %4321 = vrsqrt.f32 %v526_v19  ;;  %v520_v23 = vmul.f32 0.03125, %v508_v21  ;;  %v521_v39 = vmul.f32 0.03125, %v511_v30  ;;  %v687_v19 = vrot.slane %v440_v18, %v4716_v22 }
 0x14e   : > { %v4316_v25 = vpop.eup %4315  ;;  %v528_v27 = vadd.f32 1e-05, %v520_v23  ;;  %v529_v48 = vadd.f32 1e-05, %v521_v39 }
 0x14f   : > { %v514_v31 = vpop.xlane.xlu1 %513  ;;  %v539_v32 = vmul.f32 %v4316_v25, %v4659_v28 }
 0x150   : > { %4323 = vrsqrt.f32 %v528_v27  ;;  %v522_v35 = vmul.f32 0.03125, %v514_v31 }
 0x151   : > { %4325 = vrsqrt.f32 %v527_v26  ;;  %v551_v41 = vmul.f32 %v550_v33, %v539_v32 }
 0x152   : > { %v4318_v38 = vpop.eup %4317  ;;  %v530_v44 = vadd.f32 1e-05, %v522_v35 }
 0x153   : > { %v540_v40 = vmul.f32 %v4318_v38, %v4667_v36  ;;  %v4320_v43 = vpop.eup %4319  ;;  %v4732_v49 = vadd.f32 %v562_v42, %v551_v41 }
 0x154   : > { %v541_v51 = vmul.f32 %v4320_v43, %v4661_v29  ;;  %4327 = vrsqrt.f32 %v530_v44 }
 0x155   : > { %v552_v28 = vmul.f32 %v550_v33, %v540_v40  ;;  %4329 = vrsqrt.f32 %v529_v48 }
 0x156   : > { %v4322_v45 = vpop.eup %4321  ;;  %v553_v55 = vmul.f32 %v550_v33, %v541_v51 }
 0x157   : > { %v4734_v50 = vadd.f32 %v562_v42, %v552_v28  ;;  %v542_v52 = vmul.f32 %v4322_v45, %v4669_v37 }
 0x158   : > { %v4745_v29 = vadd.f32 %v562_v42, %v553_v55 }
 0x159   : > { %v571_v36 = vpack.c.bf16 %v4734_v50, %v4732_v49  ;;  %v554_v53 = vmul.f32 %v550_v33, %v542_v52 }
 0x15a   : > { %v4324_v54 = vpop.eup %4323 }
 0x15b   : > { %3833 = vmatmul.mubr.msk.bf16.vlgmr.msra.gmra.mrb[0].mxu0 %vm421_vm0, %v571_v36  ;;  %v4326_v58 = vpop.eup %4325  ;;  %v4742_v59 = vadd.f32 %v562_v42, %v554_v53  ;;  %v544_v60 = vmul.f32 %v4324_v54, %v4679_v47 }
 0x15c   : > { %653 = vmatprep.mubr.bf16.mxu0 %v4557_v4  ;;  %v543_v37 = vmul.f32 %v4326_v58, %v4677_v46 }
 0x15d   : > { %v572_v61 = vpack.c.bf16 %v4742_v59, %v4745_v29  ;;  %v556_v62 = vmul.f32 %v550_v33, %v544_v60 }
 0x15e   : > { %v4328_v63 = vpop.eup %4327  ;;  %v555_v0 = vmul.f32 %v550_v33, %v543_v37 }
 0x15f   : > { %v4330_v1 = vpop.eup %4329  ;;  %v4752_v2 = vadd.f32 %v562_v42, %v556_v62  ;;  %v546_v3 = vmul.f32 %v4328_v63, %v4689_v57 }
 0x160   : > { %v4755_v47 = vadd.f32 %v562_v42, %v555_v0  ;;  %v545_v5 = vmul.f32 %v4330_v1, %v4687_v56  ;;  %v4287_v56 = vld [vmem:[%s5719_s3] sm:$0xff]  }
 0x161   : > { %v558_v6 = vmul.f32 %v550_v33, %v546_v3  ;;  %4009 = vmatprep.subr.bf16.mxu0 %v4287_v56 }
 0x162   : > { %v573_v46 = vpack.c.bf16 %v4752_v2, %v4755_v47  ;;  %v557_v7 = vmul.f32 %v550_v33, %v545_v5  ;;  %4010 = vmatpush3.bf16.msra.mxu0 %v4287_v56 }
 0x163   : > { %3834 = vmatmul.mubr.msk.bf16.gmra.mrb[4].mxu0 %vm421_vm0, %v572_v61  ;;  %v4762_v8 = vadd.f32 %v562_v42, %v558_v6  ;;  %4011 = vmatprep.subr.bf16.mxu0 %v4288_v10 }
 0x164   : > { %663 = vmatprep.mubr.bf16.mxu0 %v4557_v4  ;;  %v4764_v9 = vadd.f32 %v562_v42, %v557_v7 }
 0x166   : > { %v574_v57 = vpack.c.bf16 %v4762_v8, %v4764_v9  ;;  %4012 = vmatpush3.bf16.msra.mxu0 %v4288_v10 }
 0x167   : > { %4013 = vmatprep.subr.bf16.mxu0 %v4289_v11 }
 0x16a   : > { %4014 = vmatpush3.bf16.msra.mxu0 %v4289_v11 }
 0x16b   : > { %3835 = vmatmul.mubr.msk.bf16.gmra.mrb[8].mxu0 %vm421_vm0, %v573_v46  ;;  %4015 = vmatprep.subr.bf16.mxu0 %v4290_v12 }
 0x16c   : > { %673 = vmatprep.mubr.bf16.mxu0 %v4557_v4 }
 0x16e   : > { %4016 = vmatpush3.bf16.msra.mxu0 %v4290_v12 }
 0x16f   : > { %4017 = vmatprep.subr.bf16.mxu0 %v4291_v13 }
 0x172   : > { %4018 = vmatpush3.bf16.msra.mxu0 %v4291_v13 }
 0x173   : > { %3836 = vmatmul.mubr.msk.bf16.gmra.mrb[12].mxu0 %vm421_vm0, %v574_v57  ;;  %4019 = vmatprep.subr.bf16.mxu0 %v4292_v14 }
 0x176   : > { %4020 = vmatpush3.bf16.msra.mxu0 %v4292_v14 }
 0x177   : > { %4021 = vmatprep.subr.bf16.mxu0 %v4293_v15 }
 0x17a   : > { %4022 = vmatpush3.bf16.msra.mxu0 %v4293_v15 }
 0x17b   : > { %4023 = vmatprep.subr.bf16.mxu0 %v4294_v16 }
 0x17e   : > { %4024 = vmatpush3.bf16.msra.mxu0 %v4294_v16 }
 0x22e   : > { %v645_v20 = vpop.f32.mrb[0].mxu0 }
 0x22f   : > { %v647_v21 = vpop.f32.mrb[1].mxu0 }
 0x230   : > { %v688_v23 = vadd.f32 %v687_v19, %v647_v21  ;;  %v649_v25 = vpop.f32.mrb[2].mxu0 }
 0x231   : > { %v744_v26 = vadd.f32 %v649_v25, %v645_v20  ;;  %v651_v27 = vpop.f32.mrb[3].mxu0 }
 0x232   : > { %v3837_v30 = vmul.f32 -1.442695, %v688_v23  ;;  %v689_v31 = vadd.f32 %v687_v19, %v651_v27 }
 0x234   : > { %4331 = vpow2.f32 %v3837_v30  ;;  %v3838_v32 = vmul.f32 -1.442695, %v689_v31 }
 0x236   : > { %4333 = vpow2.f32 %v3838_v32  ;;  %v655_v33 = vpop.f32.mrb[4].mxu0 }
 0x237   : > { %v745_v35 = vadd.f32 %v744_v26, %v655_v33  ;;  %v657_v38 = vpop.f32.mrb[5].mxu0 }
 0x238   : > { %v690_v39 = vadd.f32 %v687_v19, %v657_v38  ;;  %v659_v40 = vpop.f32.mrb[6].mxu0 }
 0x239   : > { %v746_v41 = vadd.f32 %v745_v35, %v659_v40  ;;  %v661_v42 = vpop.f32.mrb[7].mxu0 }
 0x23a   : > { %v3839_v43 = vmul.f32 -1.442695, %v690_v39  ;;  %v691_v44 = vadd.f32 %v687_v19, %v661_v42 }
 0x23c   : > { %4335 = vpow2.f32 %v3839_v43  ;;  %v3840_v28 = vmul.f32 -1.442695, %v691_v44 }
 0x23e   : > { %v4332_v45 = vpop.eup %4331  ;;  %4337 = vpow2.f32 %v3840_v28  ;;  %v665_v48 = vpop.f32.mrb[8].mxu0 }
 0x23f   : > { %v720_v51 = vadd.f32 1.0, %v4332_v45  ;;  %v747_v52 = vadd.f32 %v746_v41, %v665_v48  ;;  %v667_v36 = vpop.f32.mrb[9].mxu0 }
 0x240   : > { %v4334_v53 = vpop.eup %4333  ;;  %v692_v54 = vadd.f32 %v687_v19, %v667_v36  ;;  %v669_v55 = vpop.f32.mrb[10].mxu0 }
 0x241   : > { %4339 = vrcp.f32 %v720_v51  ;;  %v721_v58 = vadd.f32 1.0, %v4334_v53  ;;  %v748_v60 = vadd.f32 %v747_v52, %v669_v55  ;;  %v671_v37 = vpop.f32.mrb[11].mxu0 }
 0x242   : > { %v3841_v61 = vmul.f32 -1.442695, %v692_v54  ;;  %v693_v62 = vadd.f32 %v687_v19, %v671_v37  ;;  %v5725_v54 = vsub.s32 2, %v4713_v17 }
 0x243   : > { %4341 = vrcp.f32 %v721_v58 }
 0x244   : > { %4343 = vpow2.f32 %v3841_v61  ;;  %v3842_v63 = vmul.f32 -1.442695, %v693_v62  ;;  %v784_v55 = vrot.slane %v4721_v24, %v5725_v54 }
 0x246   : > { %v4336_v0 = vpop.eup %4335  ;;  %4345 = vpow2.f32 %v3842_v63  ;;  %v675_v1 = vpop.f32.mrb[12].mxu0 }
 0x247   : > { %v722_v3 = vadd.f32 1.0, %v4336_v0  ;;  %v749_v5 = vadd.f32 %v748_v60, %v675_v1  ;;  %v677_v46 = vpop.f32.mrb[13].mxu0 }
 0x248   : > { %v4338_v6 = vpop.eup %4337  ;;  %v694_v7 = vadd.f32 %v687_v19, %v677_v46  ;;  %v679_v57 = vpop.f32.mrb[14].mxu0 }
 0x249   : > { %4347 = vrcp.f32 %v722_v3  ;;  %v723_v56 = vadd.f32 1.0, %v4338_v6  ;;  %v750_v10 = vadd.f32 %v749_v5, %v679_v57  ;;  %v681_v11 = vpop.f32.mrb[15].mxu0 }
 0x24a   : > { %v3843_v12 = vmul.f32 -1.442695, %v694_v7  ;;  %v695_v13 = vadd.f32 %v687_v19, %v681_v11 }
 0x24b   : > { %v4340_v14 = vpop.eup %4339  ;;  %4349 = vrcp.f32 %v723_v56  ;;  %v752_v15 = vmul.f32 0.125, %v750_v10 }
 0x24c   : > { %4351 = vpow2.f32 %v3843_v12  ;;  %v3844_v16 = vmul.f32 -1.442695, %v695_v13 }
 0x24d   : > { %v4342_v18 = vpop.eup %4341  ;;  %v753_v20 = vmul.f32 %v4340_v14, %v752_v15 }
 0x24e   : > { %v4344_v21 = vpop.eup %4343  ;;  %4353 = vpow2.f32 %v3844_v16  ;;  %v754_v23 = vmul.f32 %v4342_v18, %v752_v15 }
 0x24f   : > { %v724_v25 = vadd.f32 1.0, %v4344_v21 }
 0x250   : > { %v4346_v26 = vpop.eup %4345  ;;  %v761_v27 = vpack.c.bf16 %v754_v23, %v753_v20 }
 0x251   : > { %4355 = vrcp.f32 %v724_v25  ;;  %v725_v30 = vadd.f32 1.0, %v4346_v26 }
 0x252   : > { %4025 = vmatprep.mubr.bf16.mxu0 %v761_v27 }
 0x253   : > { %v4348_v31 = vpop.eup %4347  ;;  %4357 = vrcp.f32 %v725_v30 }
 0x254   : > { %v755_v32 = vmul.f32 %v4348_v31, %v752_v15 }
 0x255   : > { %v4350_v19 = vpop.eup %4349 }
 0x256   : > { %v4352_v33 = vpop.eup %4351  ;;  %v756_v35 = vmul.f32 %v4350_v19, %v752_v15 }
 0x257   : > { %v726_v38 = vadd.f32 1.0, %v4352_v33 }
 0x258   : > { %v4354_v39 = vpop.eup %4353  ;;  %v762_v40 = vpack.c.bf16 %v756_v35, %v755_v32 }
 0x259   : > { %4359 = vrcp.f32 %v726_v38  ;;  %v727_v41 = vadd.f32 1.0, %v4354_v39 }
 0x25a   : > { %4026 = vmatmul.mubr.bf16.vlgmr.msra.gmra.mrb[16].mxu0 %v762_v40 }
 0x25b   : > { %v4356_v42 = vpop.eup %4355  ;;  %4361 = vrcp.f32 %v727_v41 }
 0x25c   : > { %v757_v43 = vmul.f32 %v4356_v42, %v752_v15 }
 0x25d   : > { %v4358_v44 = vpop.eup %4357 }
 0x25e   : > { %v758_v28 = vmul.f32 %v4358_v44, %v752_v15 }
 0x260   : > { %v763_v45 = vpack.c.bf16 %v758_v28, %v757_v43 }
 0x262   : > { %4029 = vmatprep.mubr.bf16.mxu0 %v763_v45 }
 0x263   : > { %v4360_v48 = vpop.eup %4359 }
 0x264   : > { %v759_v51 = vmul.f32 %v4360_v48, %v752_v15 }
 0x265   : > { %v4362_v52 = vpop.eup %4361 }
 0x266   : > { %v760_v36 = vmul.f32 %v4362_v52, %v752_v15 }
 0x268   : > { %v764_v53 = vpack.c.bf16 %v760_v36, %v759_v51 }
 0x26a   : > { %4030 = vmatmul.mubr.bf16.gmra.mrb[20].mxu0 %v764_v53 }
 0x26b   : > { %1258 = vmatprep.mubr.bf16.mxu0 %v4557_v4 }
 0x32d   : > { %v4027_v58 = vpop.f32.mrb[16].mxu0 }
 0x32e   : > { %v867_v60 = vpop.f32.mrb[17].mxu0  ;;  %v876_v37 = vadd.f32 %v4027_v58, %v784_v55 }
 0x32f   : > { %v868_v61 = vadd.f32 %v867_v60, %v784_v55  ;;  %v4028_v62 = vpop.f32.mrb[18].mxu0 }
 0x330   : > { %v870_v63 = vpop.f32.mrb[19].mxu0  ;;  %v879_v0 = vadd.f32 %v4028_v62, %v784_v55  ;;  %v900_v6 = vadd.f32 %v876_v37, %v4745_v29 }
 0x331   : > { %v871_v1 = vadd.f32 %v870_v63, %v784_v55  ;;  %v898_v3 = vadd.f32 %v868_v61, %v4732_v49 }
 0x332   : > { %v901_v57 = vadd.f32 %v879_v0, %v4742_v59  ;;  %v912_v56 = vsel %vm421_vm0, %v900_v6, 0.0 }
 0x333   : > { %v906_v5 = vsel %vm421_vm0, %v898_v3, 0.0  ;;  %v899_v46 = vadd.f32 %v871_v1, %v4734_v50 }
 0x334   : > { %907 = vadd.xlane.f32.xlu0 %v906_v5  ;;  %v915_v10 = vsel %vm421_vm0, %v901_v57, 0.0 }
 0x335   : > { %v909_v7 = vsel %vm421_vm0, %v899_v46, 0.0 }
 0x336   : > { %910 = vadd.xlane.f32.xlu1 %v909_v7 }
 0x338   : > { %913 = vadd.xlane.f32.xlu0 %v912_v56 }
 0x33a   : > { %916 = vadd.xlane.f32.xlu1 %v915_v10 }
 0x33d   : > { %v4031_v11 = vpop.f32.mrb[20].mxu0 }
 0x33e   : > { %v883_v49 = vpop.f32.mrb[21].mxu0  ;;  %v892_v12 = vadd.f32 %v4031_v11, %v784_v55 }
 0x33f   : > { %v884_v13 = vadd.f32 %v883_v49, %v784_v55  ;;  %v4032_v14 = vpop.f32.mrb[22].mxu0 }
 0x340   : > { %v886_v50 = vpop.f32.mrb[23].mxu0  ;;  %v895_v15 = vadd.f32 %v4032_v14, %v784_v55  ;;  %v904_v20 = vadd.f32 %v892_v12, %v4764_v9 }
 0x341   : > { %v887_v29 = vadd.f32 %v886_v50, %v784_v55  ;;  %v902_v16 = vadd.f32 %v884_v13, %v4755_v47 }
 0x342   : > { %v905_v23 = vadd.f32 %v895_v15, %v4762_v8  ;;  %v924_v25 = vsel %vm421_vm0, %v904_v20, 0.0 }
 0x343   : > { %v918_v18 = vsel %vm421_vm0, %v902_v16, 0.0  ;;  %v903_v59 = vadd.f32 %v887_v29, %v4752_v2 }
 0x344   : > { %919 = vadd.xlane.f32.xlu0 %v918_v18  ;;  %v927_v26 = vsel %vm421_vm0, %v905_v23, 0.0 }
 0x345   : > { %v921_v21 = vsel %vm421_vm0, %v903_v59, 0.0 }
 0x346   : > { %922 = vadd.xlane.f32.xlu1 %v921_v21 }
 0x348   : > { %925 = vadd.xlane.f32.xlu0 %v924_v25 }
 0x34a   : > { %928 = vadd.xlane.f32.xlu1 %v927_v26 }
 0x3c1   : > { %v908_v27 = vpop.xlane.xlu0 %907 }
 0x3c2   : > { %v930_v47 = vmul.f32 0.03125, %v908_v27 }
 0x3c3   : > { %v911_v30 = vpop.xlane.xlu1 %910 }
 0x3c4   : > { %v4818_v31 = vsub.f32 %v898_v3, %v930_v47  ;;  %v931_v2 = vmul.f32 0.03125, %v911_v30 }
 0x3c5   : > { %v914_v32 = vpop.xlane.xlu0 %913 }
 0x3c6   : > { %v4820_v9 = vsub.f32 %v899_v46, %v931_v2  ;;  %v932_v19 = vmul.f32 0.03125, %v914_v32  ;;  %v946_v8 = vmul.f32 %v4818_v31, %v4818_v31 }
 0x3c7   : > { %v917_v33 = vpop.xlane.xlu1 %916 }
 0x3c8   : > { %v4824_v35 = vsub.f32 %v900_v6, %v932_v19  ;;  %v933_v38 = vmul.f32 0.03125, %v917_v33  ;;  %v954_v39 = vsel %vm421_vm0, %v946_v8, 0.0  ;;  %v947_v40 = vmul.f32 %v4820_v9, %v4820_v9 }
 0x3c9   : > { %955 = vadd.xlane.f32.xlu0 %v954_v39 }
 0x3ca   : > { %v4829_v41 = vsub.f32 %v901_v57, %v933_v38  ;;  %v957_v42 = vsel %vm421_vm0, %v947_v40, 0.0  ;;  %v948_v43 = vmul.f32 %v4824_v35, %v4824_v35 }
 0x3cb   : > { %958 = vadd.xlane.f32.xlu1 %v957_v42 }
 0x3cc   : > { %v960_v44 = vsel %vm421_vm0, %v948_v43, 0.0  ;;  %v949_v28 = vmul.f32 %v4829_v41, %v4829_v41 }
 0x3cd   : > { %961 = vadd.xlane.f32.xlu0 %v960_v44 }
 0x3ce   : > { %v963_v45 = vsel %vm421_vm0, %v949_v28, 0.0 }
 0x3cf   : > { %964 = vadd.xlane.f32.xlu1 %v963_v45 }
 0x3d1   : > { %v920_v48 = vpop.xlane.xlu0 %919 }
 0x3d2   : > { %v934_v51 = vmul.f32 0.03125, %v920_v48 }
 0x3d3   : > { %v923_v52 = vpop.xlane.xlu1 %922 }
 0x3d4   : > { %v4838_v36 = vsub.f32 %v902_v16, %v934_v51  ;;  %v935_v53 = vmul.f32 0.03125, %v923_v52 }
 0x3d5   : > { %v926_v55 = vpop.xlane.xlu0 %925 }
 0x3d6   : > { %v4840_v58 = vsub.f32 %v903_v59, %v935_v53  ;;  %v936_v60 = vmul.f32 0.03125, %v926_v55  ;;  %v950_v37 = vmul.f32 %v4838_v36, %v4838_v36  ;;  %v5724_v59 = vsub.s32 3, %v4713_v17 }
 0x3d7   : > { %v929_v61 = vpop.xlane.xlu1 %928 }
 0x3d8   : > { %v4844_v62 = vsub.f32 %v904_v20, %v936_v60  ;;  %v937_v63 = vmul.f32 0.03125, %v929_v61  ;;  %v966_v0 = vsel %vm421_vm0, %v950_v37, 0.0  ;;  %v951_v1 = vmul.f32 %v4840_v58, %v4840_v58 }
 0x3d9   : > { %967 = vadd.xlane.f32.xlu0 %v966_v0  ;;  %v1024_v20 = vsub.s32 4, %v4713_v17  ;;  %v1013_v21 = vrot.slane %v4721_v24, %v5724_v59 }
 0x3da   : > { %v4849_v3 = vsub.f32 %v905_v23, %v937_v63  ;;  %v969_v5 = vsel %vm421_vm0, %v951_v1, 0.0  ;;  %v952_v46 = vmul.f32 %v4844_v62, %v4844_v62 }
 0x3db   : > { %970 = vadd.xlane.f32.xlu1 %v969_v5  ;;  %v1025_v27 = vrot.slane %v4721_v24, %v1024_v20 }
 0x3dc   : > { %v972_v6 = vsel %vm421_vm0, %v952_v46, 0.0  ;;  %v953_v7 = vmul.f32 %v4849_v3, %v4849_v3 }
 0x3dd   : > { %973 = vadd.xlane.f32.xlu0 %v972_v6 }
 0x3de   : > { %v975_v57 = vsel %vm421_vm0, %v953_v7, 0.0 }
 0x3df   : > { %976 = vadd.xlane.f32.xlu1 %v975_v57 }
 0x456   : > { %v956_v56 = vpop.xlane.xlu0 %955 }
 0x457   : > { %v978_v10 = vmul.f32 0.03125, %v956_v56 }
 0x458   : > { %v959_v11 = vpop.xlane.xlu1 %958 }
 0x459   : > { %v986_v49 = vadd.f32 1e-05, %v978_v10  ;;  %v979_v12 = vmul.f32 0.03125, %v959_v11 }
 0x45a   : > { %v962_v13 = vpop.xlane.xlu0 %961 }
 0x45b   : > { %4363 = vrsqrt.f32 %v986_v49  ;;  %v987_v14 = vadd.f32 1e-05, %v979_v12  ;;  %v980_v50 = vmul.f32 0.03125, %v962_v13 }
 0x45c   : > { %v965_v15 = vpop.xlane.xlu1 %964 }
 0x45d   : > { %4365 = vrsqrt.f32 %v987_v14  ;;  %v988_v29 = vadd.f32 1e-05, %v980_v50  ;;  %v981_v16 = vmul.f32 0.03125, %v965_v15 }
 0x45f   : > { %4367 = vrsqrt.f32 %v988_v29  ;;  %v989_v18 = vadd.f32 1e-05, %v981_v16 }
 0x461   : > { %4369 = vrsqrt.f32 %v989_v18 }
 0x465   : > { %v4364_v23 = vpop.eup %4363 }
 0x466   : > { %v968_v25 = vpop.xlane.xlu0 %967  ;;  %v1002_v26 = vmul.f32 %v4364_v23, %v4818_v31 }
 0x467   : > { %v4366_v47 = vpop.eup %4365  ;;  %v982_v30 = vmul.f32 0.03125, %v968_v25 }
 0x468   : > { %v971_v2 = vpop.xlane.xlu1 %970  ;;  %v1014_v32 = vmul.f32 %v1013_v21, %v1002_v26  ;;  %v1003_v19 = vmul.f32 %v4366_v47, %v4820_v9 }
 0x469   : > { %v4368_v8 = vpop.eup %4367  ;;  %v990_v33 = vadd.f32 1e-05, %v982_v30  ;;  %v983_v38 = vmul.f32 0.03125, %v971_v2 }
 0x46a   : > { %v974_v39 = vpop.xlane.xlu0 %973  ;;  %v1026_v40 = vadd.f32 %v1025_v27, %v1014_v32  ;;  %v1015_v42 = vmul.f32 %v1013_v21, %v1003_v19  ;;  %v1004_v43 = vmul.f32 %v4368_v8, %v4824_v35 }
 0x46b   : > { %v4370_v44 = vpop.eup %4369  ;;  %4371 = vrsqrt.f32 %v990_v33  ;;  %v991_v28 = vadd.f32 1e-05, %v983_v38  ;;  %v984_v31 = vmul.f32 0.03125, %v974_v39 }
 0x46c   : > { %v977_v45 = vpop.xlane.xlu1 %976  ;;  %v1034_v48 = vsel %vm421_vm0, %v1026_v40, 0.0  ;;  %v1027_v51 = vadd.f32 %v1025_v27, %v1015_v42  ;;  %v1016_v52 = vmul.f32 %v1013_v21, %v1004_v43  ;;  %v1005_v53 = vmul.f32 %v4370_v44, %v4829_v41 }
 0x46d   : > { %4373 = vrsqrt.f32 %v991_v28  ;;  %v992_v9 = vadd.f32 1e-05, %v984_v31  ;;  %v985_v55 = vmul.f32 0.03125, %v977_v45  ;;  %1035 = vadd.xlane.f32.xlu0 %v1034_v48 }
 0x46e   : > { %v1037_v60 = vsel %vm421_vm0, %v1027_v51, 0.0  ;;  %v1028_v37 = vadd.f32 %v1025_v27, %v1016_v52  ;;  %v1017_v61 = vmul.f32 %v1013_v21, %v1005_v53 }
 0x46f   : > { %4375 = vrsqrt.f32 %v992_v9  ;;  %v993_v35 = vadd.f32 1e-05, %v985_v55  ;;  %1038 = vadd.xlane.f32.xlu1 %v1037_v60 }
 0x470   : > { %v1040_v63 = vsel %vm421_vm0, %v1028_v37, 0.0  ;;  %v1029_v0 = vadd.f32 %v1025_v27, %v1017_v61 }
 0x471   : > { %4377 = vrsqrt.f32 %v993_v35  ;;  %1041 = vadd.xlane.f32.xlu0 %v1040_v63 }
 0x472   : > { %v1043_v1 = vsel %vm421_vm0, %v1029_v0, 0.0 }
 0x473   : > { %1044 = vadd.xlane.f32.xlu1 %v1043_v1 }
 0x475   : > { %v4372_v41 = vpop.eup %4371 }
 0x476   : > { %v1006_v5 = vmul.f32 %v4372_v41, %v4838_v36 }
 0x477   : > { %v4374_v46 = vpop.eup %4373 }
 0x478   : > { %v1018_v6 = vmul.f32 %v1013_v21, %v1006_v5  ;;  %v1007_v7 = vmul.f32 %v4374_v46, %v4840_v58 }
 0x479   : > { %v4376_v57 = vpop.eup %4375 }
 0x47a   : > { %v1030_v56 = vadd.f32 %v1025_v27, %v1018_v6  ;;  %v1019_v10 = vmul.f32 %v1013_v21, %v1007_v7  ;;  %v1008_v11 = vmul.f32 %v4376_v57, %v4844_v62  ;;  %v4297_v6 = vld [vmem:[%s5718_s2 + $0x4] ss:$16 sps:$4 sm:$0xff]   ;;  %v4295_v7 = vld [vmem:[%s5718_s2] ss:$16 sps:$4 sm:$0xff]  }
 0x47b   : > { %v4378_v49 = vpop.eup %4377  ;;  %1226 = vmatprep.subr.bf16.mxu0 %v4297_v6  ;;  %4249 = vmatprep.subr.bf16.mxu1 %v4297_v6  ;;  %v4300_v57 = vld [vmem:[%s5718_s2 + $0x24] ss:$16 sps:$4 sm:$0xff]  }
 0x47c   : > { %v1046_v12 = vsel %vm421_vm0, %v1030_v56, 0.0  ;;  %v1031_v13 = vadd.f32 %v1025_v27, %v1019_v10  ;;  %v1020_v14 = vmul.f32 %v1013_v21, %v1008_v11  ;;  %v1009_v50 = vmul.f32 %v4378_v49, %v4849_v3  ;;  %1227 = vmatpush1.bf16.msra.mxu0 %v4295_v7  ;;  %4251 = vmatpush1.bf16.msra.mxu1 %v4295_v7  ;;  %v4303_v10 = vld [vmem:[%s5718_s2 + $0xc] ss:$16 sps:$4 sm:$0xff]  }
 0x47d   : > { %1047 = vadd.xlane.f32.xlu0 %v1046_v12  ;;  %1228 = vmatprep.subr.bf16.mxu0 %v4300_v57 }
 0x47e   : > { %v1049_v15 = vsel %vm421_vm0, %v1031_v13, 0.0  ;;  %v1032_v36 = vadd.f32 %v1025_v27, %v1020_v14  ;;  %v1021_v29 = vmul.f32 %v1013_v21, %v1009_v50  ;;  %4250 = vmatprep.subr.bf16.mxu1 %v4300_v57 }
 0x47f   : > { %1050 = vadd.xlane.f32.xlu1 %v1049_v15 }
 0x480   : > { %v1052_v58 = vsel %vm421_vm0, %v1032_v36, 0.0  ;;  %v1033_v16 = vadd.f32 %v1025_v27, %v1021_v29 }
 0x481   : > { %1053 = vadd.xlane.f32.xlu0 %v1052_v58 }
 0x482   : > { %v1055_v18 = vsel %vm421_vm0, %v1033_v16, 0.0 }
 0x483   : > { %1056 = vadd.xlane.f32.xlu1 %v1055_v18 }
 0x4fa   : > { %v1036_v62 = vpop.xlane.xlu0 %1035 }
 0x4fb   : > { %v1058_v20 = vmul.f32 0.03125, %v1036_v62  ;;  %v1140_v62 = vsub.s32 5, %v4713_v17 }
 0x4fc   : > { %v1039_v23 = vpop.xlane.xlu1 %1038 }
 0x4fd   : > { %v4880_v25 = vsub.f32 %v1026_v40, %v1058_v20  ;;  %v1059_v26 = vmul.f32 0.03125, %v1039_v23  ;;  %v1141_v20 = vrot.slane %v4721_v24, %v1140_v62  ;;  %v1152_v23 = vsub.s32 6, %v4713_v17 }
 0x4fe   : > { %v1042_v3 = vpop.xlane.xlu0 %1041 }
 0x4ff   : > { %v4882_v47 = vsub.f32 %v1027_v51, %v1059_v26  ;;  %v1060_v30 = vmul.f32 0.03125, %v1042_v3  ;;  %v1074_v21 = vmul.f32 %v4880_v25, %v4880_v25 }
 0x500   : > { %v1045_v2 = vpop.xlane.xlu1 %1044 }
 0x501   : > { %v4886_v32 = vsub.f32 %v1028_v37, %v1060_v30  ;;  %v1061_v27 = vmul.f32 0.03125, %v1045_v2  ;;  %v1082_v19 = vsel %vm421_vm0, %v1074_v21, 0.0  ;;  %v1075_v8 = vmul.f32 %v4882_v47, %v4882_v47 }
 0x502   : > { %1083 = vadd.xlane.f32.xlu0 %v1082_v19 }
 0x503   : > { %v4891_v33 = vsub.f32 %v1029_v0, %v1061_v27  ;;  %v1085_v38 = vsel %vm421_vm0, %v1075_v8, 0.0  ;;  %v1076_v39 = vmul.f32 %v4886_v32, %v4886_v32  ;;  %v1153_v27 = vrot.slane %v4721_v24, %v1152_v23 }
 0x504   : > { %1086 = vadd.xlane.f32.xlu1 %v1085_v38 }
 0x505   : > { %v1088_v40 = vsel %vm421_vm0, %v1076_v39, 0.0  ;;  %v1077_v42 = vmul.f32 %v4891_v33, %v4891_v33 }
 0x506   : > { %1089 = vadd.xlane.f32.xlu0 %v1088_v40 }
 0x507   : > { %v1091_v43 = vsel %vm421_vm0, %v1077_v42, 0.0 }
 0x508   : > { %1092 = vadd.xlane.f32.xlu1 %v1091_v43 }
 0x50a   : > { %v1048_v44 = vpop.xlane.xlu0 %1047 }
 0x50b   : > { %v1062_v28 = vmul.f32 0.03125, %v1048_v44 }
 0x50c   : > { %v1051_v31 = vpop.xlane.xlu1 %1050 }
 0x50d   : > { %v4900_v45 = vsub.f32 %v1030_v56, %v1062_v28  ;;  %v1063_v48 = vmul.f32 0.03125, %v1051_v31  ;;  %v4298_v56 = vld [vmem:[%s5718_s2 + $0x20] ss:$16 sps:$4 sm:$0xff]  }
 0x50e   : > { %v1054_v51 = vpop.xlane.xlu0 %1053  ;;  %1229 = vmatpush1.bf16.msra.mxu0 %v4298_v56  ;;  %4252 = vmatpush1.bf16.msra.mxu1 %v4298_v56 }
 0x50f   : > { %v4902_v52 = vsub.f32 %v1031_v13, %v1063_v48  ;;  %v1064_v53 = vmul.f32 0.03125, %v1054_v51  ;;  %v1078_v9 = vmul.f32 %v4900_v45, %v4900_v45  ;;  %1299 = vmatprep.subr.bf16.mxu1 %v4303_v10 }
 0x510   : > { %v1057_v55 = vpop.xlane.xlu1 %1056 }
 0x511   : > { %v4906_v60 = vsub.f32 %v1032_v36, %v1064_v53  ;;  %v1065_v37 = vmul.f32 0.03125, %v1057_v55  ;;  %v1094_v61 = vsel %vm421_vm0, %v1078_v9, 0.0  ;;  %v1079_v35 = vmul.f32 %v4902_v52, %v4902_v52 }
 0x512   : > { %1095 = vadd.xlane.f32.xlu0 %v1094_v61 }
 0x513   : > { %v4911_v63 = vsub.f32 %v1033_v16, %v1065_v37  ;;  %v1097_v0 = vsel %vm421_vm0, %v1079_v35, 0.0  ;;  %v1080_v1 = vmul.f32 %v4906_v60, %v4906_v60 }
 0x514   : > { %1098 = vadd.xlane.f32.xlu1 %v1097_v0 }
 0x515   : > { %v1100_v41 = vsel %vm421_vm0, %v1080_v1, 0.0  ;;  %v1081_v5 = vmul.f32 %v4911_v63, %v4911_v63 }
 0x516   : > { %1101 = vadd.xlane.f32.xlu0 %v1100_v41 }
 0x517   : > { %v1103_v46 = vsel %vm421_vm0, %v1081_v5, 0.0 }
 0x518   : > { %1104 = vadd.xlane.f32.xlu1 %v1103_v46 }
 0x58f   : > { %v1084_v11 = vpop.xlane.xlu0 %1083 }
 0x590   : > { %v1106_v49 = vmul.f32 0.03125, %v1084_v11 }
 0x591   : > { %v1087_v12 = vpop.xlane.xlu1 %1086 }
 0x592   : > { %v1114_v13 = vadd.f32 1e-05, %v1106_v49  ;;  %v1107_v14 = vmul.f32 0.03125, %v1087_v12 }
 0x593   : > { %v1090_v50 = vpop.xlane.xlu0 %1089 }
 0x594   : > { %4379 = vrsqrt.f32 %v1114_v13  ;;  %v1115_v15 = vadd.f32 1e-05, %v1107_v14  ;;  %v1108_v36 = vmul.f32 0.03125, %v1090_v50 }
 0x595   : > { %v1093_v29 = vpop.xlane.xlu1 %1092 }
 0x596   : > { %4381 = vrsqrt.f32 %v1115_v15  ;;  %v1116_v58 = vadd.f32 1e-05, %v1108_v36  ;;  %v1109_v16 = vmul.f32 0.03125, %v1093_v29  ;;  %v4306_v36 = vld [vmem:[%s5718_s2 + $0x2c] ss:$16 sps:$4 sm:$0xff]  }
 0x597   : > { %v4304_v29 = vld [vmem:[%s5718_s2 + $0x28] ss:$16 sps:$4 sm:$0xff]  }
 0x598   : > { %4383 = vrsqrt.f32 %v1116_v58  ;;  %v1117_v18 = vadd.f32 1e-05, %v1109_v16  ;;  %v5726_v58 = vmov 0.0  }
 0x599   : > { %4033 = vmatprep.subr.bf16.mxu0 %v5726_v58 }
 0x59a   : > { %4385 = vrsqrt.f32 %v1117_v18 }
 0x59e   : > { %v4380_v26 = vpop.eup %4379 }
 0x59f   : > { %v1130_v3 = vmul.f32 %v4380_v26, %v4880_v25  ;;  %v1096_v30 = vpop.xlane.xlu0 %1095 }
 0x5a0   : > { %v4382_v21 = vpop.eup %4381  ;;  %v1110_v2 = vmul.f32 0.03125, %v1096_v30 }
 0x5a1   : > { %v1142_v19 = vmul.f32 %v1141_v20, %v1130_v3  ;;  %v1131_v8 = vmul.f32 %v4382_v21, %v4882_v47  ;;  %v1099_v38 = vpop.xlane.xlu1 %1098 }
 0x5a2   : > { %v4384_v39 = vpop.eup %4383  ;;  %v1118_v40 = vadd.f32 1e-05, %v1110_v2  ;;  %v1111_v42 = vmul.f32 0.03125, %v1099_v38 }
 0x5a3   : > { %v1143_v43 = vmul.f32 %v1141_v20, %v1131_v8  ;;  %v1102_v44 = vpop.xlane.xlu0 %1101  ;;  %v4941_v51 = vadd.f32 %v1153_v27, %v1142_v19  ;;  %v1132_v24 = vmul.f32 %v4384_v39, %v4886_v32 }
 0x5a4   : > { %v4386_v28 = vpop.eup %4385  ;;  %4387 = vrsqrt.f32 %v1118_v40  ;;  %v1119_v31 = vadd.f32 1e-05, %v1111_v42  ;;  %v1112_v48 = vmul.f32 0.03125, %v1102_v44 }
 0x5a5   : > { %v4943_v25 = vadd.f32 %v1153_v27, %v1143_v43  ;;  %v1105_v53 = vpop.xlane.xlu1 %1104  ;;  %v1133_v9 = vmul.f32 %v4386_v28, %v4891_v33  ;;  %v1144_v0 = vmul.f32 %v1141_v20, %v1132_v24 }
 0x5a6   : > { %4389 = vrsqrt.f32 %v1119_v31  ;;  %v1120_v47 = vadd.f32 1e-05, %v1112_v48  ;;  %v1113_v55 = vmul.f32 0.03125, %v1105_v53 }
 0x5a7   : > { %v1162_v37 = vpack.c.bf16 %v4943_v25, %v4941_v51  ;;  %v1145_v61 = vmul.f32 %v1141_v20, %v1133_v9  ;;  %v4953_v32 = vadd.f32 %v1153_v27, %v1144_v0 }
 0x5a8   : > { %4391 = vrsqrt.f32 %v1120_v47  ;;  %v1121_v35 = vadd.f32 1e-05, %v1113_v55 }
 0x5a9   : > { %3861 = vmatmul.mubr.msk.bf16.vlgmr.msra.gmra.mrb[24].mxu0 %vm421_vm0, %v1162_v37  ;;  %v4951_v1 = vadd.f32 %v1153_v27, %v1145_v61 }
 0x5aa   : > { %4393 = vrsqrt.f32 %v1121_v35  ;;  %1268 = vmatprep.mubr.bf16.mxu0 %v4557_v4 }
 0x5ab   : > { %v1163_v41 = vpack.c.bf16 %v4951_v1, %v4953_v32 }
 0x5ae   : > { %v4388_v33 = vpop.eup %4387 }
 0x5af   : > { %v1134_v5 = vmul.f32 %v4388_v33, %v4900_v45 }
 0x5b0   : > { %v4390_v46 = vpop.eup %4389 }
 0x5b1   : > { %3862 = vmatmul.mubr.msk.bf16.gmra.mrb[28].mxu0 %vm421_vm0, %v1163_v41  ;;  %v1135_v6 = vmul.f32 %v4390_v46, %v4902_v52  ;;  %v1146_v7 = vmul.f32 %v1141_v20, %v1134_v5 }
 0x5b2   : > { %v4392_v57 = vpop.eup %4391  ;;  %1278 = vmatprep.mubr.bf16.mxu0 %v4557_v4 }
 0x5b3   : > { %v1136_v56 = vmul.f32 %v4392_v57, %v4906_v60  ;;  %v1147_v10 = vmul.f32 %v1141_v20, %v1135_v6  ;;  %v4963_v12 = vadd.f32 %v1153_v27, %v1146_v7  ;;  %v4301_v60 = vld [vmem:[%s5718_s2 + $0x8] ss:$16 sps:$4 sm:$0xff]  }
 0x5b4   : > { %v4394_v11 = vpop.eup %4393 }
 0x5b5   : > { %v1137_v49 = vmul.f32 %v4394_v11, %v4911_v63  ;;  %v4965_v13 = vadd.f32 %v1153_v27, %v1147_v10  ;;  %v1148_v45 = vmul.f32 %v1141_v20, %v1136_v56 }
 0x5b7   : > { %v1164_v14 = vpack.c.bf16 %v4965_v13, %v4963_v12  ;;  %v1149_v50 = vmul.f32 %v1141_v20, %v1137_v49  ;;  %v4970_v52 = vadd.f32 %v1153_v27, %v1148_v45 }
 0x5b9   : > { %3863 = vmatmul.mubr.msk.bf16.gmra.mrb[32].mxu0 %vm421_vm0, %v1164_v14  ;;  %v4972_v15 = vadd.f32 %v1153_v27, %v1149_v50 }
 0x5ba   : > { %4035 = vmatprep.mubr.msk.bf16.mxu0 %vm4559_vm1, %v5726_v58 }
 0x5bb   : > { %5733 = vst [vmem:[#allocation4_spill] sm:$0xff] %v4972_v15  ;;  %v1165_v63 = vpack.c.bf16 %v4972_v15, %v4970_v52 }
 0x5bd   : > { %3864 = vmatmul.mubr.msk.bf16.vlgmr.msra.gmra.mrb[0].mxu1 %vm421_vm0, %v1165_v63 }
 0x5be   : > { %1300 = vmatpush1.bf16.msra.mxu1 %v4301_v60  ;;  %1331 = vmatprep.mubr.bf16.mxu1 %v4557_v4 }
 0x5bf   : > { %1301 = vmatprep.subr.bf16.mxu1 %v4306_v36 }
 0x5c2   : > { %1302 = vmatpush1.bf16.msra.mxu1 %v4304_v29 }
 0x5c3   : > { %4045 = vmatprep.subr.bf16.mxu1 %v5726_v58 }
 0x5c5   : > { %3865 = vmatmul.mubr.msk.bf16.vlgmr.msra.gmra.mrb[4].mxu1 %vm421_vm0, %v1162_v37 }
 0x5c6   : > { %1341 = vmatprep.mubr.bf16.mxu1 %v4557_v4 }
 0x5cd   : > { %3866 = vmatmul.mubr.msk.bf16.gmra.mrb[8].mxu1 %vm421_vm0, %v1163_v41 }
 0x5ce   : > { %1351 = vmatprep.mubr.bf16.mxu1 %v4557_v4 }
 0x5d5   : > { %3867 = vmatmul.mubr.msk.bf16.gmra.mrb[12].mxu1 %vm421_vm0, %v1164_v14 }
 0x5d6   : > { %1361 = vmatprep.mubr.bf16.mxu1 %v4557_v4 }
 0x5dd   : > { %3868 = vmatmul.mubr.msk.bf16.gmra.mrb[16].mxu1 %vm421_vm0, %v1165_v63 }
 0x5de   : > { %4047 = vmatprep.mubr.msk.bf16.mxu1 %vm4559_vm1, %v5726_v58 }
 0x67c   : > { %v1260_v16 = vpop.f32.mrb[24].mxu0 }
 0x67d   : > { %v1262_v18 = vpop.f32.mrb[25].mxu0  ;;  %v5007_v21 = vpack.c.bf16 %v1260_v16, %v1260_v16 }
 0x67e   : > { %v5000_v62 = vpack.c.bf16 %v1262_v18, %v1262_v18  ;;  %v1264_v4 = vpop.f32.mrb[26].mxu0 }
 0x67f   : > { %v1266_v20 = vpop.f32.mrb[27].mxu0  ;;  %v5023_v43 = vpack.c.bf16 %v1264_v4, %v1264_v4 }
 0x680   : > { %v1453_v23 = vsel %vm1448_vm2, %v5000_v62, 0  ;;  %v5005_v26 = vpack.c.bf16 %v1266_v20, %v1266_v20 }
 0x681   : > { %4034 = vmatpush3.bf16.xpose.msra.mxu0 %v1453_v23 }
 0x682   : > { %4039 = vmatprep.subr.bf16.mxu0 %v5726_v58  ;;  %v1499_v8 = vsel %vm1448_vm2, %v5005_v26, 0 }
 0x684   : > { %v1270_v3 = vpop.f32.mrb[28].mxu0 }
 0x685   : > { %v1272_v30 = vpop.f32.mrb[29].mxu0  ;;  %v5025_v44 = vpack.c.bf16 %v1270_v3, %v1270_v3 }
 0x686   : > { %v5009_v2 = vpack.c.bf16 %v1272_v30, %v1272_v30  ;;  %v1274_v27 = vpop.f32.mrb[30].mxu0  ;;  %v4523_v30 = vld [vmem:[%s5722_s6] sm:$0x3] }
 0x687   : > { %v1276_v19 = vpop.f32.mrb[31].mxu0  ;;  %v5047_v0 = vpack.c.bf16 %v1274_v27, %v1274_v27  ;;  %v5122_v27 = vrot.slane %v4523_v30, %v4727_v34 }
 0x688   : > { %v1545_v38 = vsel %vm1448_vm2, %v5009_v2, 0  ;;  %4036 = vmatmul.mubr.msk.bf16.vlgmr.msra.gmra.mrb[36].mxu0 %vm1448_vm2, %v5007_v21  ;;  %v5021_v39 = vpack.c.bf16 %v1276_v19, %v1276_v19 }
 0x689   : > { %4040 = vmatpush3.bf16.xpose.msra.mxu0 %v1499_v8  ;;  %4046 = vmatpush3.bf16.xpose.msra.mxu1 %v1545_v38 }
 0x68a   : > { %4041 = vmatprep.mubr.msk.bf16.mxu0 %vm4559_vm1, %v5726_v58  ;;  %4051 = vmatprep.subr.bf16.mxu0 %v5726_v58  ;;  %v1591_v53 = vsel %vm1448_vm2, %v5021_v39, 0 }
 0x68b   : > { %4057 = vmatprep.subr.bf16.mxu1 %v5726_v58 }
 0x68c   : > { %v1280_v40 = vpop.f32.mrb[32].mxu0 }
 0x68d   : > { %v1282_v42 = vpop.f32.mrb[33].mxu0  ;;  %v5049_v33 = vpack.c.bf16 %v1280_v40, %v1280_v40 }
 0x68e   : > { %v5027_v28 = vpack.c.bf16 %v1282_v42, %v1282_v42  ;;  %v1284_v31 = vpop.f32.mrb[34].mxu0 }
 0x68f   : > { %v1286_v48 = vpop.f32.mrb[35].mxu0  ;;  %v5073_v11 = vpack.c.bf16 %v1284_v31, %v1284_v31 }
 0x690   : > { %v1637_v24 = vsel %vm1448_vm2, %v5027_v28, 0  ;;  %v1290_v9 = vpop.f32.mrb[0].mxu1  ;;  %4042 = vmatmul.mubr.msk.bf16.vlgmr.msra.gmra.mrb[40].mxu0 %vm1448_vm2, %v5023_v43  ;;  %4048 = vmatmul.mubr.msk.bf16.vlgmr.msra.gmra.mrb[20].mxu1 %vm1448_vm2, %v5025_v44  ;;  %v5043_v61 = vpack.c.bf16 %v1286_v48, %v1286_v48 }
 0x691   : > { %v1292_v47 = vpop.f32.mrb[1].mxu1  ;;  %4052 = vmatpush3.bf16.xpose.msra.mxu0 %v1591_v53  ;;  %4058 = vmatpush3.bf16.xpose.msra.mxu1 %v1637_v24  ;;  %v5075_v49 = vpack.c.bf16 %v1290_v9, %v1290_v9 }
 0x692   : > { %v1294_v55 = vpop.f32.mrb[2].mxu1  ;;  %4053 = vmatprep.mubr.msk.bf16.mxu0 %vm4559_vm1, %v5726_v58  ;;  %4059 = vmatprep.mubr.msk.bf16.mxu1 %vm4559_vm1, %v5726_v58  ;;  %v5045_v35 = vpack.c.bf16 %v1292_v47, %v1292_v47  ;;  %v1683_v41 = vsel %vm1448_vm2, %v5043_v61, 0 }
 0x693   : > { %v1296_v37 = vpop.f32.mrb[3].mxu1  ;;  %4063 = vmatprep.subr.bf16.mxu0 %v5726_v58  ;;  %4069 = vmatprep.subr.bf16.mxu1 %v5726_v58  ;;  %v5101_v16 = vpack.c.bf16 %v1294_v55, %v1294_v55 }
 0x694   : > { %v1729_v5 = vsel %vm1448_vm2, %v5045_v35, 0  ;;  %v5069_v56 = vpack.c.bf16 %v1296_v37, %v1296_v37 }
 0x696   : > { %v1775_v45 = vsel %vm1448_vm2, %v5069_v56, 0 }
 0x698   : > { %v1333_v46 = vpop.f32.mrb[4].mxu1  ;;  %4054 = vmatmul.mubr.msk.bf16.vlgmr.msra.gmra.mrb[44].mxu0 %vm1448_vm2, %v5047_v0  ;;  %4060 = vmatmul.mubr.msk.bf16.vlgmr.msra.gmra.mrb[24].mxu1 %vm1448_vm2, %v5049_v33 }
 0x699   : > { %v5059_v6 = vpop.f32.mrb[5].mxu1  ;;  %4064 = vmatpush3.bf16.xpose.msra.mxu0 %v1683_v41  ;;  %4070 = vmatpush3.bf16.xpose.msra.mxu1 %v1729_v5  ;;  %v5071_v10 = vpack.c.bf16 %v1333_v46, %v1333_v46 }
 0x69a   : > { %v1337_v7 = vpop.f32.mrb[6].mxu1  ;;  %4065 = vmatprep.mubr.msk.bf16.mxu0 %vm4559_vm1, %v5726_v58  ;;  %4071 = vmatprep.mubr.msk.bf16.mxu1 %vm4559_vm1, %v5726_v58 }
 0x69b   : > { %v5065_v57 = vpop.f32.mrb[7].mxu1  ;;  %4075 = vmatprep.subr.bf16.mxu0 %v5726_v58  ;;  %4081 = vmatprep.subr.bf16.mxu1 %v5726_v58  ;;  %v1927_v14 = vsel %vm1925_vm3, %v5071_v10, 0  ;;  %v5099_v29 = vpack.c.bf16 %v1337_v7, %v1337_v7 }
 0x69d   : > { %v1973_v18 = vsel %vm1925_vm3, %v5099_v29, 0 }
 0x6a0   : > { %v5081_v50 = vpop.f32.mrb[8].mxu1  ;;  %4066 = vmatmul.mubr.msk.bf16.vlgmr.msra.gmra.mrb[48].mxu0 %vm1448_vm2, %v5073_v11  ;;  %4072 = vmatmul.mubr.msk.bf16.vlgmr.msra.gmra.mrb[28].mxu1 %vm1448_vm2, %v5075_v49 }
 0x6a1   : > { %v5087_v60 = vpop.f32.mrb[9].mxu1  ;;  %4076 = vmatpush3.bf16.xpose.msra.mxu0 %v1775_v45  ;;  %4082 = vmatpush3.bf16.msra.mxu1 %v1927_v14 }
 0x6a2   : > { %v5089_v63 = vpop.f32.mrb[10].mxu1  ;;  %4077 = vmatprep.mubr.msk.bf16.mxu0 %vm4559_vm1, %v5726_v58  ;;  %4087 = vmatprep.subr.bf16.mxu0 %v5726_v58 }
 0x6a3   : > { %v5094_v36 = vpop.f32.mrb[11].mxu1  ;;  %4083 = vmatprep.mubr.msk.bf16.mxu1 %vm4559_vm1, %v5726_v58  ;;  %4093 = vmatprep.subr.bf16.mxu1 %v5726_v58 }
 0x6a8   : > { %v5105_v4 = vpop.f32.mrb[12].mxu1  ;;  %4078 = vmatmul.mubr.msk.bf16.vlgmr.msra.gmra.mrb[52].mxu0 %vm1448_vm2, %v5101_v16 }
 0x6a9   : > { %v5109_v20 = vpop.f32.mrb[13].mxu1  ;;  %4088 = vmatpush3.bf16.msra.mxu0 %v1973_v18  ;;  %4089 = vmatprep.mubr.msk.bf16.mxu0 %vm4559_vm1, %v5726_v58 }
 0x6aa   : > { %v5113_v23 = vpop.f32.mrb[14].mxu1  ;;  %4099 = vmatprep.subr.bf16.mxu0 %v5726_v58 }
 0x6ab   : > { %v5116_v3 = vpop.f32.mrb[15].mxu1 }
 0x6b0   : > { %v5124_v19 = vpop.f32.mrb[16].mxu1 }
 0x6b1   : > { %v1365_v8 = vpop.f32.mrb[17].mxu1 }
 0x6b2   : > { %v5127_v38 = vadd.f32 %v5122_v27, %v1365_v8  ;;  %v5129_v40 = vpop.f32.mrb[18].mxu1 }
 0x6b3   : > { %v1369_v42 = vpop.f32.mrb[19].mxu1 }
 0x6b4   : > { %v5132_v31 = vadd.f32 %v5122_v27, %v1369_v42 }
 0x75b   : > { %v1489_v48 = vpop.f32.mrb[36].mxu0 }
 0x75c   : > { %v4037_v53 = vpop.f32.mrb[37].mxu0  ;;  %v1818_v24 = vsel %vm1817_vm4, %v1489_v48, -inf }
 0x75d   : > { %1819 = vmax.xlane.f32.xlu0 %v1818_v24  ;;  %v1492_v9 = vpop.f32.mrb[38].mxu0 }
 0x75e   : > { %v4038_v47 = vpop.f32.mrb[39].mxu0 }
 0x763   : > { %v1535_v55 = vpop.f32.mrb[40].mxu0  ;;  %v1581_v37 = vpop.f32.mrb[20].mxu1 }
 0x764   : > { %v4043_v41 = vpop.f32.mrb[41].mxu0  ;;  %v4049_v5 = vpop.f32.mrb[21].mxu1  ;;  %v1821_v46 = vsel %vm1817_vm4, %v1535_v55, -inf  ;;  %v1824_v7 = vsel %vm1817_vm4, %v1581_v37, -inf }
 0x765   : > { %1822 = vmax.xlane.f32.xlu1 %v1821_v46  ;;  %v1538_v45 = vpop.f32.mrb[42].mxu0  ;;  %1825 = vmax.xlane.f32.xlu0 %v1824_v7  ;;  %v1584_v14 = vpop.f32.mrb[22].mxu1 }
 0x766   : > { %v4044_v18 = vpop.f32.mrb[43].mxu0  ;;  %v4050_v30 = vpop.f32.mrb[23].mxu1 }
 0x76b   : > { %v1627_v8 = vpop.f32.mrb[44].mxu0  ;;  %v1673_v42 = vpop.f32.mrb[24].mxu1 }
 0x76c   : > { %v4055_v53 = vpop.f32.mrb[45].mxu0  ;;  %v4061_v24 = vpop.f32.mrb[25].mxu1  ;;  %v1827_v9 = vsel %vm1817_vm4, %v1627_v8, -inf  ;;  %v1830_v47 = vsel %vm1817_vm4, %v1673_v42, -inf }
 0x76d   : > { %1828 = vmax.xlane.f32.xlu1 %v1827_v9  ;;  %v1630_v41 = vpop.f32.mrb[46].mxu0  ;;  %1831 = vmax.xlane.f32.xlu0 %v1830_v47  ;;  %v1676_v5 = vpop.f32.mrb[26].mxu1 }
 0x76e   : > { %v4056_v59 = vpop.f32.mrb[47].mxu0  ;;  %v4062_v54 = vpop.f32.mrb[27].mxu1 }
 0x773   : > { %v1719_v46 = vpop.f32.mrb[48].mxu0  ;;  %v1765_v45 = vpop.f32.mrb[28].mxu1 }
 0x774   : > { %v4067_v7 = vpop.f32.mrb[49].mxu0  ;;  %v4073_v14 = vpop.f32.mrb[29].mxu1  ;;  %v1833_v18 = vsel %vm1817_vm4, %v1719_v46, -inf  ;;  %v1836_v30 = vsel %vm1817_vm4, %v1765_v45, -inf }
 0x775   : > { %1834 = vmax.xlane.f32.xlu1 %v1833_v18  ;;  %v1722_v53 = vpop.f32.mrb[50].mxu0  ;;  %1837 = vmax.xlane.f32.xlu0 %v1836_v30  ;;  %v1768_v24 = vpop.f32.mrb[30].mxu1 }
 0x776   : > { %v4068_v58 = vpop.f32.mrb[51].mxu0  ;;  %v4074_v34 = vpop.f32.mrb[31].mxu1 }
 0x77b   : > { %v5141_v9 = vpop.f32.mrb[52].mxu0 }
 0x77c   : > { %v4079_v47 = vpop.f32.mrb[53].mxu0  ;;  %v1839_v54 = vsel %vm1817_vm4, %v5141_v9, -inf }
 0x77d   : > { %1840 = vmax.xlane.f32.xlu1 %v1839_v54  ;;  %v1814_v59 = vpop.f32.mrb[54].mxu0 }
 0x77e   : > { %v4080_v41 = vpop.f32.mrb[55].mxu0 }
 0x7ea   : > { %v1820_v5 = vpop.xlane.xlu0 %1819 }
 0x7eb   : > { %v1842_v7 = vsub.f32 %v1489_v48, %v1820_v5 }
 0x7ed   : > { %v1850_v14 = vmul.f32 1.442695, %v1842_v7 }
 0x7ef   : > { %4395 = vpow2.f32 %v1850_v14 }
 0x7f2   : > { %v1823_v22 = vpop.xlane.xlu1 %1822  ;;  %v1826_v18 = vpop.xlane.xlu0 %1825 }
 0x7f3   : > { %v1843_v53 = vsub.f32 %v1535_v55, %v1823_v22  ;;  %v1844_v30 = vsub.f32 %v1581_v37, %v1826_v18 }
 0x7f5   : > { %v1852_v24 = vmul.f32 1.442695, %v1843_v53  ;;  %v1854_v58 = vmul.f32 1.442695, %v1844_v30 }
 0x7f7   : > { %4397 = vpow2.f32 %v1852_v24 }
 0x7f8   : > { %4399 = vpow2.f32 %v1854_v58 }
 0x7f9   : > { %v5145_v34 = vpop.eup %4395 }
 0x7fa   : > { %v1829_v47 = vpop.xlane.xlu1 %1828  ;;  %v1832_v15 = vpop.xlane.xlu0 %1831  ;;  %v1866_v54 = vsel %vm1817_vm4, %v5145_v34, 0.0 }
 0x7fb   : > { %v1845_v59 = vsub.f32 %v1627_v8, %v1829_v47  ;;  %v1846_v41 = vsub.f32 %v1673_v42, %v1832_v15  ;;  %1867 = vadd.xlane.f32.xlu0 %v1866_v54 }
 0x7fd   : > { %v1856_v48 = vmul.f32 1.442695, %v1845_v59  ;;  %v1858_v5 = vmul.f32 1.442695, %v1846_v41 }
 0x7ff   : > { %4401 = vpow2.f32 %v1856_v48 }
 0x800   : > { %4403 = vpow2.f32 %v1858_v5 }
 0x801   : > { %v5149_v22 = vpop.eup %4397 }
 0x802   : > { %v5151_v55 = vpop.eup %4399  ;;  %v1835_v37 = vpop.xlane.xlu1 %1834  ;;  %v1869_v14 = vsel %vm1817_vm4, %v5149_v22, 0.0 }
 0x803   : > { %v1838_v7 = vpop.xlane.xlu0 %1837  ;;  %v1847_v18 = vsub.f32 %v1719_v46, %v1835_v37  ;;  %1870 = vadd.xlane.f32.xlu1 %v1869_v14  ;;  %v1872_v15 = vsel %vm1817_vm4, %v5151_v55, 0.0 }
 0x804   : > { %v1848_v53 = vsub.f32 %v1765_v45, %v1838_v7  ;;  %1873 = vadd.xlane.f32.xlu0 %v1872_v15 }
 0x805   : > { %v1860_v8 = vmul.f32 1.442695, %v1847_v18 }
 0x806   : > { %v1862_v42 = vmul.f32 1.442695, %v1848_v53  ;;  %v5244_v53 = vpack.c.bf16 %v5113_v23, %v5113_v23 }
 0x807   : > { %4405 = vpow2.f32 %v1860_v8  ;;  %v5250_v8 = vpack.c.bf16 %v5124_v19, %v5124_v19 }
 0x808   : > { %4407 = vpow2.f32 %v1862_v42 }
 0x809   : > { %v5157_v30 = vpop.eup %4401  ;;  %v2203_v23 = vsel %vm1925_vm3, %v5250_v8, 0 }
 0x80a   : > { %v5159_v24 = vpop.eup %4403  ;;  %v1875_v58 = vsel %vm1817_vm4, %v5157_v30, 0.0  ;;  %v1841_v41 = vpop.xlane.xlu1 %1840 }
 0x80b   : > { %1876 = vadd.xlane.f32.xlu1 %v1875_v58  ;;  %v1878_v46 = vsel %vm1817_vm4, %v5159_v24, 0.0  ;;  %v1849_v48 = vsub.f32 %v5141_v9, %v1841_v41  ;;  %v5228_v9 = vpack.c.bf16 %v5105_v4, %v5105_v4 }
 0x80c   : > { %1879 = vadd.xlane.f32.xlu0 %v1878_v46 }
 0x80d   : > { %v1864_v5 = vmul.f32 1.442695, %v1849_v48 }
 0x80f   : > { %4409 = vpow2.f32 %v1864_v5 }
 0x811   : > { %v5165_v45 = vpop.eup %4405 }
 0x812   : > { %v5167_v47 = vpop.eup %4407  ;;  %v1881_v54 = vsel %vm1817_vm4, %v5165_v45, 0.0 }
 0x813   : > { %1882 = vadd.xlane.f32.xlu1 %v1881_v54  ;;  %v1884_v59 = vsel %vm1817_vm4, %v5167_v47, 0.0  ;;  %v2157_v54 = vsel %vm1925_vm3, %v5244_v53, 0 }
 0x814   : > { %1885 = vadd.xlane.f32.xlu0 %v1884_v59 }
 0x824   : > { %2347 = vrot.lane.b32.xlu1 %v5005_v26, %s4560_s20 }
 0x828   : > { %2292 = vrot.lane.b32.xlu1 %v5007_v21, %s4560_s20 }
 0x82a   : > { %2295 = vrot.lane.b32.xlu0 %v5000_v62, %s4560_s20  ;;  %v5192_v62 = vpop.eup %4409 }
 0x82b   : > { %v1887_v26 = vsel %vm1817_vm4, %v5192_v62, 0.0 }
 0x82e   : > { %2399 = vrot.lane.b32.xlu0 %v5009_v2, %s4560_s20 }
 0x832   : > { %2396 = vrot.lane.b32.xlu0 %v5025_v44, %s4560_s20  ;;  %v5212_v44 = vpack.c.bf16 %v5081_v50, %v5081_v50  ;;  %v5223_v50 = vpack.c.bf16 %v5089_v63, %v5089_v63  ;;  %v2111_v63 = vsel %vm1925_vm3, %v5228_v9, 0 }
 0x834   : > { %v2065_v14 = vsel %vm1925_vm3, %v5223_v50, 0 }
 0x836   : > { %2503 = vrot.lane.b32.xlu0 %v5027_v28, %s4560_s20 }
 0x83a   : > { %2500 = vrot.lane.b32.xlu0 %v5049_v33, %s4560_s20 }
 0x83e   : > { %2607 = vrot.lane.b32.xlu0 %v5045_v35, %s4560_s20  ;;  %v2019_v35 = vsel %vm1925_vm3, %v5212_v44, 0 }
 0x842   : > { %2604 = vrot.lane.b32.xlu0 %v5075_v49, %s4560_s20 }
 0x84c   : > { %1888 = vadd.xlane.f32.xlu1 %v1887_v26 }
 0x85d   : > { %2344 = vrot.lane.b32.xlu1 %v5023_v43, %s4560_s20 }
 0x861   : > { %2451 = vrot.lane.b32.xlu1 %v5021_v39, %s4560_s20 }
 0x865   : > { %2448 = vrot.lane.b32.xlu1 %v5047_v0, %s4560_s20 }
 0x869   : > { %2555 = vrot.lane.b32.xlu1 %v5043_v61, %s4560_s20 }
 0x86d   : > { %2552 = vrot.lane.b32.xlu1 %v5073_v11, %s4560_s20 }
 0x871   : > { %2659 = vrot.lane.b32.xlu1 %v5069_v56, %s4560_s20  ;;  %v5734_v56 = vmov 0.0  }
 0x875   : > { %2656 = vrot.lane.b32.xlu1 %v5101_v16, %s4560_s20 }
 0x888   : > { %v1868_v21 = vpop.xlane.xlu0 %1867 }
 0x889   : > { %4411 = vrcp.f32 %v1868_v21 }
 0x890   : > { %v1871_v2 = vpop.xlane.xlu1 %1870 }
 0x891   : > { %4413 = vrcp.f32 %v1871_v2  ;;  %v1874_v39 = vpop.xlane.xlu0 %1873 }
 0x892   : > { %4415 = vrcp.f32 %v1874_v39 }
 0x893   : > { %v4412_v43 = vpop.eup %4411 }
 0x894   : > { %v1898_v28 = vmul.f32 %v4412_v43, %v5145_v34 }
 0x896   : > { %v1906_v61 = vpack.c.bf16 %v1898_v28, %v1898_v28 }
 0x898   : > { %v1877_v0 = vpop.xlane.xlu1 %1876  ;;  %4084 = vmatmul.mubr.msk.bf16.vlgmr.msra.gmra.mrb[32].mxu1 %vm1817_vm4, %v1906_v61 }
 0x899   : > { %4417 = vrcp.f32 %v1877_v0  ;;  %4094 = vmatpush3.bf16.msra.mxu1 %v2019_v35  ;;  %v1880_v33 = vpop.xlane.xlu0 %1879  ;;  %4095 = vmatprep.mubr.msk.bf16.mxu1 %vm4559_vm1, %v5734_v56 }
 0x89a   : > { %4419 = vrcp.f32 %v1880_v33  ;;  %4105 = vmatprep.subr.bf16.mxu1 %v5734_v56 }
 0x89b   : > { %v4414_v11 = vpop.eup %4413 }
 0x89c   : > { %v4416_v49 = vpop.eup %4415  ;;  %v1899_v16 = vmul.f32 %v4414_v11, %v5149_v22 }
 0x89d   : > { %v1900_v34 = vmul.f32 %v4416_v49, %v5151_v55 }
 0x89e   : > { %v1907_v37 = vpack.c.bf16 %v1899_v16, %v1899_v16 }
 0x89f   : > { %v1908_v7 = vpack.c.bf16 %v1900_v34, %v1900_v34 }
 0x8a0   : > { %v1883_v18 = vpop.xlane.xlu1 %1882  ;;  %4090 = vmatmul.mubr.msk.bf16.vlgmr.msra.gmra.mrb[56].mxu0 %vm1817_vm4, %v1907_v37 }
 0x8a1   : > { %4421 = vrcp.f32 %v1883_v18  ;;  %4096 = vmatmul.mubr.msk.bf16.vlgmr.msra.gmra.mrb[36].mxu1 %vm1817_vm4, %v1908_v7  ;;  %4100 = vmatpush3.bf16.msra.mxu0 %v2065_v14  ;;  %v1886_v22 = vpop.xlane.xlu0 %1885 }
 0x8a2   : > { %4106 = vmatpush3.bf16.msra.mxu1 %v2111_v63  ;;  %4423 = vrcp.f32 %v1886_v22  ;;  %4101 = vmatprep.mubr.msk.bf16.mxu0 %vm4559_vm1, %v5734_v56 }
 0x8a3   : > { %v4418_v4 = vpop.eup %4417  ;;  %4107 = vmatprep.mubr.msk.bf16.mxu1 %vm4559_vm1, %v5734_v56  ;;  %4111 = vmatprep.subr.bf16.mxu0 %v5734_v56 }
 0x8a4   : > { %v4420_v55 = vpop.eup %4419  ;;  %v1901_v15 = vmul.f32 %v4418_v4, %v5157_v30  ;;  %4117 = vmatprep.subr.bf16.mxu1 %v5734_v56 }
 0x8a5   : > { %v1902_v42 = vmul.f32 %v4420_v55, %v5159_v24  ;;  %v2296_v59 = vpop.permute.xlu0 %2295  ;;  %v5266_v24 = vpack.c.bf16 %v5129_v40, %v5129_v40 }
 0x8a6   : > { %v1909_v58 = vpack.c.bf16 %v1901_v15, %v1901_v15  ;;  %v2301_v40 = vsel %vm1448_vm2, %v2296_v59, 0 }
 0x8a7   : > { %v1910_v46 = vpack.c.bf16 %v1902_v42, %v1902_v42  ;;  %v2249_v2 = vsel %vm1925_vm3, %v5266_v24, 0 }
 0x8a8   : > { %4102 = vmatmul.mubr.msk.bf16.vlgmr.msra.gmra.mrb[60].mxu0 %vm1817_vm4, %v1909_v58 }
 0x8a9   : > { %4108 = vmatmul.mubr.msk.bf16.vlgmr.msra.gmra.mrb[40].mxu1 %vm1817_vm4, %v1910_v46  ;;  %4112 = vmatpush3.bf16.msra.mxu0 %v2157_v54  ;;  %v2400_v26 = vpop.permute.xlu0 %2399 }
 0x8aa   : > { %4118 = vmatpush3.bf16.msra.mxu1 %v2203_v23  ;;  %4113 = vmatprep.mubr.msk.bf16.mxu0 %vm4559_vm1, %v5734_v56  ;;  %v2405_v43 = vsel %vm1448_vm2, %v2400_v26, 0 }
 0x8ab   : > { %v4422_v19 = vpop.eup %4421  ;;  %4119 = vmatprep.mubr.msk.bf16.mxu1 %vm4559_vm1, %v5734_v56  ;;  %4123 = vmatprep.subr.bf16.mxu0 %v5734_v56 }
 0x8ac   : > { %v4424_v30 = vpop.eup %4423  ;;  %v1903_v41 = vmul.f32 %v4422_v19, %v5165_v45  ;;  %4129 = vmatprep.subr.bf16.mxu1 %v5734_v56  ;;  %v2348_v45 = vpop.permute.xlu1 %2347 }
 0x8ad   : > { %v1904_v48 = vmul.f32 %v4424_v30, %v5167_v47  ;;  %v2397_v47 = vpop.permute.xlu0 %2396  ;;  %v2353_v18 = vsel %vm1448_vm2, %v2348_v45, 0 }
 0x8ae   : > { %v1911_v5 = vpack.c.bf16 %v1903_v41, %v1903_v41 }
 0x8af   : > { %v1912_v21 = vpack.c.bf16 %v1904_v48, %v1904_v48 }
 0x8b0   : > { %4114 = vmatmul.mubr.msk.bf16.vlgmr.msra.gmra.mrb[64].mxu0 %vm1817_vm4, %v1911_v5  ;;  %v2293_v39 = vpop.permute.xlu1 %2292 }
 0x8b1   : > { %4120 = vmatmul.mubr.msk.bf16.vlgmr.msra.gmra.mrb[44].mxu1 %vm1817_vm4, %v1912_v21  ;;  %4124 = vmatpush3.bf16.msra.mxu0 %v2249_v2  ;;  %v2504_v28 = vpop.permute.xlu0 %2503 }
 0x8b2   : > { %4131 = vmatprep.mubr.msk.bf16.mxu1 %vm4559_vm1, %v5734_v56  ;;  %4125 = vmatprep.mubr.msk.bf16.mxu0 %vm4559_vm1, %v5734_v56  ;;  %v2509_v35 = vsel %vm1448_vm2, %v2504_v28, 0 }
 0x8b3   : > { %4130 = vmatpush3.bf16.xpose.msra.mxu1 %v2301_v40  ;;  %4135 = vmatprep.subr.bf16.mxu0 %v5734_v56 }
 0x8b4   : > { %4141 = vmatprep.subr.bf16.mxu1 %v5734_v56 }
 0x8b5   : > { %v2501_v61 = vpop.permute.xlu0 %2500 }
 0x8b9   : > { %v2608_v0 = vpop.permute.xlu0 %2607 }
 0x8ba   : > { %4132 = vmatmul.mubr.msk.bf16.vlgmr.msra.gmra.mrb[48].mxu1 %vm1448_vm2, %v2293_v39  ;;  %v2613_v33 = vsel %vm1448_vm2, %v2608_v0, 0 }
 0x8bb   : > { %4142 = vmatpush3.bf16.xpose.msra.mxu1 %v2405_v43  ;;  %4143 = vmatprep.mubr.msk.bf16.mxu1 %vm4559_vm1, %v5734_v56 }
 0x8bc   : > { %4153 = vmatprep.subr.bf16.mxu1 %v5734_v56 }
 0x8bd   : > { %v2605_v11 = vpop.permute.xlu0 %2604 }
 0x8c2   : > { %4144 = vmatmul.mubr.msk.bf16.vlgmr.msra.gmra.mrb[52].mxu1 %vm1448_vm2, %v2397_v47 }
 0x8c3   : > { %4154 = vmatpush3.bf16.xpose.msra.mxu1 %v2509_v35  ;;  %4155 = vmatprep.mubr.msk.bf16.mxu1 %vm4559_vm1, %v5734_v56 }
 0x8c4   : > { %4165 = vmatprep.subr.bf16.mxu1 %v5734_v56 }
 0x8ca   : > { %4156 = vmatmul.mubr.msk.bf16.vlgmr.msra.gmra.mrb[56].mxu1 %vm1448_vm2, %v2501_v61 }
 0x8cb   : > { %4166 = vmatpush3.bf16.xpose.msra.mxu1 %v2613_v33  ;;  %4167 = vmatprep.mubr.msk.bf16.mxu1 %vm4559_vm1, %v5734_v56 }
 0x8cc   : > { %4177 = vmatprep.subr.bf16.mxu1 %v5734_v56 }
 0x8d2   : > { %4168 = vmatmul.mubr.msk.bf16.vlgmr.msra.gmra.mrb[60].mxu1 %vm1448_vm2, %v2605_v11 }
 0x8d3   : > { %4179 = vmatprep.mubr.msk.bf16.mxu1 %vm4559_vm1, %v5734_v56 }
 0x8d9   : > { %v1889_v49 = vpop.xlane.xlu1 %1888 }
 0x8da   : > { %4425 = vrcp.f32 %v1889_v49 }
 0x8dd   : > { %v2345_v16 = vpop.permute.xlu1 %2344 }
 0x8e1   : > { %v2452_v7 = vpop.permute.xlu1 %2451 }
 0x8e2   : > { %v2457_v22 = vsel %vm1448_vm2, %v2452_v7, 0 }
 0x8e4   : > { %v4426_v34 = vpop.eup %4425 }
 0x8e5   : > { %v1905_v37 = vmul.f32 %v4426_v34, %v5192_v62  ;;  %v2449_v63 = vpop.permute.xlu1 %2448 }
 0x8e7   : > { %v1913_v14 = vpack.c.bf16 %v1905_v37, %v1905_v37 }
 0x8e9   : > { %4126 = vmatmul.mubr.msk.bf16.vlgmr.msra.gmra.mrb[68].mxu0 %vm1817_vm4, %v1913_v14  ;;  %v2556_v4 = vpop.permute.xlu1 %2555 }
 0x8ea   : > { %4136 = vmatpush3.bf16.xpose.msra.mxu0 %v2353_v18  ;;  %4137 = vmatprep.mubr.msk.bf16.mxu0 %vm4559_vm1, %v5734_v56  ;;  %v2561_v55 = vsel %vm1448_vm2, %v2556_v4, 0 }
 0x8eb   : > { %4147 = vmatprep.subr.bf16.mxu0 %v5734_v56 }
 0x8ed   : > { %v2553_v62 = vpop.permute.xlu1 %2552 }
 0x8f1   : > { %4138 = vmatmul.mubr.msk.bf16.vlgmr.msra.gmra.mrb[72].mxu0 %vm1448_vm2, %v2345_v16  ;;  %v2660_v15 = vpop.permute.xlu1 %2659 }
 0x8f2   : > { %4148 = vmatpush3.bf16.xpose.msra.mxu0 %v2457_v22  ;;  %4149 = vmatprep.mubr.msk.bf16.mxu0 %vm4559_vm1, %v5734_v56  ;;  %v2665_v42 = vsel %vm1448_vm2, %v2660_v15, 0 }
 0x8f3   : > { %4159 = vmatprep.subr.bf16.mxu0 %v5734_v56 }
 0x8f5   : > { %v2657_v58 = vpop.permute.xlu1 %2656 }
 0x8f9   : > { %4150 = vmatmul.mubr.msk.bf16.vlgmr.msra.gmra.mrb[76].mxu0 %vm1448_vm2, %v2449_v63 }
 0x8fa   : > { %4160 = vmatpush3.bf16.xpose.msra.mxu0 %v2561_v55  ;;  %4161 = vmatprep.mubr.msk.bf16.mxu0 %vm4559_vm1, %v5734_v56 }
 0x8fb   : > { %4171 = vmatprep.subr.bf16.mxu0 %v5734_v56 }
 0x901   : > { %4162 = vmatmul.mubr.msk.bf16.vlgmr.msra.gmra.mrb[80].mxu0 %vm1448_vm2, %v2553_v62 }
 0x902   : > { %4172 = vmatpush3.bf16.xpose.msra.mxu0 %v2665_v42  ;;  %4173 = vmatprep.mubr.msk.bf16.mxu0 %vm4559_vm1, %v5734_v56 }
 0x903   : > { %4183 = vmatprep.subr.bf16.mxu0 %v5734_v56 }
 0x909   : > { %4174 = vmatmul.mubr.msk.bf16.vlgmr.msra.gmra.mrb[84].mxu0 %vm1448_vm2, %v2657_v58 }
 0x90a   : > { %4185 = vmatprep.mubr.msk.bf16.mxu0 %vm4559_vm1, %v5734_v56 }
 0x96b   : > { %v5324_v46 = vpop.f32.mrb[32].mxu1 }
 0x96c   : > { %v4085_v54 = vpop.f32.mrb[33].mxu1 }
 0x96d   : > { %v1966_v23 = vpop.f32.mrb[34].mxu1 }
 0x96e   : > { %v4086_v59 = vpop.f32.mrb[35].mxu1 }
 0x973   : > { %v5326_v19 = vpop.f32.mrb[56].mxu0 }
 0x974   : > { %v5328_v30 = vpop.f32.mrb[36].mxu1  ;;  %v4091_v41 = vpop.f32.mrb[57].mxu0 }
 0x975   : > { %v4097_v48 = vpop.f32.mrb[37].mxu1  ;;  %v2012_v5 = vpop.f32.mrb[58].mxu0 }
 0x976   : > { %v2058_v26 = vpop.f32.mrb[38].mxu1  ;;  %v4092_v21 = vpop.f32.mrb[59].mxu0 }
 0x977   : > { %v4098_v2 = vpop.f32.mrb[39].mxu1 }
 0x97b   : > { %v5330_v40 = vpop.f32.mrb[60].mxu0 }
 0x97c   : > { %v5332_v45 = vpop.f32.mrb[40].mxu1  ;;  %v4103_v47 = vpop.f32.mrb[61].mxu0 }
 0x97d   : > { %v4109_v39 = vpop.f32.mrb[41].mxu1  ;;  %v2104_v43 = vpop.f32.mrb[62].mxu0 }
 0x97e   : > { %v2150_v28 = vpop.f32.mrb[42].mxu1  ;;  %v4104_v61 = vpop.f32.mrb[63].mxu0 }
 0x97f   : > { %v4110_v35 = vpop.f32.mrb[43].mxu1 }
 0x983   : > { %v5334_v0 = vpop.f32.mrb[64].mxu0 }
 0x984   : > { %v5336_v33 = vpop.f32.mrb[44].mxu1  ;;  %v4115_v11 = vpop.f32.mrb[65].mxu0 }
 0x985   : > { %v4121_v49 = vpop.f32.mrb[45].mxu1  ;;  %v2196_v16 = vpop.f32.mrb[66].mxu0 }
 0x986   : > { %v2242_v34 = vpop.f32.mrb[46].mxu1  ;;  %v4116_v37 = vpop.f32.mrb[67].mxu0 }
 0x987   : > { %v4122_v7 = vpop.f32.mrb[47].mxu1 }
 0x98d   : > { %v2337_v14 = vpop.f32.mrb[48].mxu1 }
 0x98e   : > { %v4133_v18 = vpop.f32.mrb[49].mxu1  ;;  %v2707_v63 = vsel %vm1817_vm4, %v2337_v14, -inf }
 0x98f   : > { %2708 = vmax.xlane.f32.xlu0 %v2707_v63  ;;  %v2340_v22 = vpop.f32.mrb[50].mxu1 }
 0x990   : > { %v4134_v4 = vpop.f32.mrb[51].mxu1 }
 0x995   : > { %v2441_v62 = vpop.f32.mrb[52].mxu1 }
 0x996   : > { %v4145_v55 = vpop.f32.mrb[53].mxu1  ;;  %v2713_v15 = vsel %vm1817_vm4, %v2441_v62, -inf }
 0x997   : > { %2714 = vmax.xlane.f32.xlu0 %v2713_v15  ;;  %v2444_v42 = vpop.f32.mrb[54].mxu1 }
 0x998   : > { %v4146_v58 = vpop.f32.mrb[55].mxu1 }
 0x99d   : > { %v5340_v54 = vpop.f32.mrb[56].mxu1 }
 0x99e   : > { %v4157_v23 = vpop.f32.mrb[57].mxu1  ;;  %v2719_v63 = vsel %vm1817_vm4, %v5340_v54, -inf }
 0x99f   : > { %v2548_v59 = vpop.f32.mrb[58].mxu1 }
 0x9a0   : > { %v4158_v41 = vpop.f32.mrb[59].mxu1 }
 0x9a5   : > { %v5342_v48 = vpop.f32.mrb[60].mxu1 }
 0x9a6   : > { %v4169_v5 = vpop.f32.mrb[61].mxu1  ;;  %v2725_v15 = vsel %vm1817_vm4, %v5342_v48, -inf }
 0x9a7   : > { %v2652_v26 = vpop.f32.mrb[62].mxu1 }
 0x9a8   : > { %v4170_v21 = vpop.f32.mrb[63].mxu1 }
 0x9bc   : > { %v5344_v2 = vpop.f32.mrb[68].mxu0 }
 0x9bd   : > { %v4127_v47 = vpop.f32.mrb[69].mxu0 }
 0x9be   : > { %v2288_v39 = vpop.f32.mrb[70].mxu0 }
 0x9bf   : > { %v4128_v43 = vpop.f32.mrb[71].mxu0 }
 0x9c4   : > { %v2389_v28 = vpop.f32.mrb[72].mxu0 }
 0x9c5   : > { %v4139_v61 = vpop.f32.mrb[73].mxu0  ;;  %v2710_v35 = vsel %vm1817_vm4, %v2389_v28, -inf }
 0x9c6   : > { %2711 = vmax.xlane.f32.xlu1 %v2710_v35  ;;  %v2392_v11 = vpop.f32.mrb[74].mxu0 }
 0x9c7   : > { %v4140_v49 = vpop.f32.mrb[75].mxu0 }
 0x9cc   : > { %v5347_v16 = vpop.f32.mrb[76].mxu0 }
 0x9cd   : > { %v4151_v34 = vpop.f32.mrb[77].mxu0  ;;  %v2716_v37 = vsel %vm1817_vm4, %v5347_v16, -inf }
 0x9ce   : > { %v2496_v7 = vpop.f32.mrb[78].mxu0  ;;  %2717 = vmax.xlane.f32.xlu0 %v2716_v37 }
 0x9cf   : > { %v4152_v18 = vpop.f32.mrb[79].mxu0 }
 0x9d2   : > { %2720 = vmax.xlane.f32.xlu0 %v2719_v63 }
 0x9d4   : > { %v5353_v22 = vpop.f32.mrb[80].mxu0 }
 0x9d5   : > { %v4163_v4 = vpop.f32.mrb[81].mxu0  ;;  %v2722_v55 = vsel %vm1817_vm4, %v5353_v22, -inf }
 0x9d6   : > { %2723 = vmax.xlane.f32.xlu1 %v2722_v55  ;;  %v2600_v42 = vpop.f32.mrb[82].mxu0  ;;  %2726 = vmax.xlane.f32.xlu0 %v2725_v15 }
 0x9d7   : > { %v4164_v58 = vpop.f32.mrb[83].mxu0 }
 0x9dc   : > { %v5359_v23 = vpop.f32.mrb[84].mxu0 }
 0x9dd   : > { %v4175_v59 = vpop.f32.mrb[85].mxu0  ;;  %v2728_v26 = vsel %vm1817_vm4, %v5359_v23, -inf }
 0x9de   : > { %v2704_v41 = vpop.f32.mrb[86].mxu0 }
 0x9df   : > { %v4176_v5 = vpop.f32.mrb[87].mxu0 }
 0x9e7   : > { %2853 = vrot.lane.b32.xlu1 %v5099_v29, %s4560_s20 }
 0x9eb   : > { %2902 = vrot.lane.b32.xlu1 %v5212_v44, %s4560_s20 }
 0x9ec   : > { %2804 = vrot.lane.b32.xlu0 %v5071_v10, %s4560_s20 }
 0xa0f   : > { %2729 = vmax.xlane.f32.xlu1 %v2728_v26 }
 0xa1c   : > { %v2709_v21 = vpop.xlane.xlu0 %2708 }
 0xa1d   : > { %v2731_v47 = vsub.f32 %v2337_v14, %v2709_v21 }
 0xa1f   : > { %v2739_v39 = vmul.f32 1.442695, %v2731_v47 }
 0xa20   : > { %2951 = vrot.lane.b32.xlu1 %v5223_v50, %s4560_s20 }
 0xa21   : > { %4427 = vpow2.f32 %v2739_v39 }
 0xa24   : > { %v2715_v43 = vpop.xlane.xlu0 %2714 }
 0xa25   : > { %v2733_v61 = vsub.f32 %v2441_v62, %v2715_v43 }
 0xa27   : > { %v2743_v29 = vmul.f32 1.442695, %v2733_v61 }
 0xa29   : > { %4429 = vpow2.f32 %v2743_v29 }
 0xa2b   : > { %v5371_v35 = vpop.eup %4427 }
 0xa2c   : > { %v2755_v10 = vsel %vm1817_vm4, %v5371_v35, 0.0 }
 0xa2d   : > { %2756 = vadd.xlane.f32.xlu0 %v2755_v10 }
 0xa33   : > { %v5375_v44 = vpop.eup %4429 }
 0xa34   : > { %v2761_v14 = vsel %vm1817_vm4, %v5375_v44, 0.0 }
 0xa35   : > { %2762 = vadd.xlane.f32.xlu0 %v2761_v14 }
 0xa4b   : > { %3000 = vrot.lane.b32.xlu0 %v5228_v9, %s4560_s20 }
 0xa53   : > { %v2712_v50 = vpop.xlane.xlu1 %2711 }
 0xa54   : > { %v2732_v11 = vsub.f32 %v2389_v28, %v2712_v50 }
 0xa56   : > { %v2741_v62 = vmul.f32 1.442695, %v2732_v11 }
 0xa58   : > { %4431 = vpow2.f32 %v2741_v62 }
 0xa5b   : > { %v2718_v49 = vpop.xlane.xlu0 %2717 }
 0xa5c   : > { %v2734_v26 = vsub.f32 %v5347_v16, %v2718_v49 }
 0xa5e   : > { %v2745_v21 = vmul.f32 1.442695, %v2734_v26 }
 0xa5f   : > { %v2721_v34 = vpop.xlane.xlu0 %2720 }
 0xa60   : > { %v2735_v37 = vsub.f32 %v5340_v54, %v2721_v34 }
 0xa62   : > { %v5382_v7 = vpop.eup %4431  ;;  %v2747_v18 = vmul.f32 1.442695, %v2735_v37 }
 0xa63   : > { %v2724_v63 = vpop.xlane.xlu1 %2723  ;;  %v2727_v4 = vpop.xlane.xlu0 %2726  ;;  %v2758_v55 = vsel %vm1817_vm4, %v5382_v7, 0.0 }
 0xa64   : > { %4433 = vpow2.f32 %v2747_v18  ;;  %v2737_v15 = vsub.f32 %v5342_v48, %v2727_v4  ;;  %2759 = vadd.xlane.f32.xlu1 %v2758_v55  ;;  %v2736_v47 = vsub.f32 %v5353_v22, %v2724_v63 }
 0xa66   : > { %v2751_v9 = vmul.f32 1.442695, %v2737_v15  ;;  %v2749_v39 = vmul.f32 1.442695, %v2736_v47 }
 0xa67   : > { %v2854_v28 = vpop.permute.xlu1 %2853  ;;  %v2805_v42 = vpop.permute.xlu0 %2804 }
 0xa68   : > { %v2859_v58 = vsel %vm1925_vm3, %v2854_v28, 0  ;;  %v2810_v59 = vsel %vm1925_vm3, %v2805_v42, 0  ;;  %4435 = vpow2.f32 %v2751_v9 }
 0xa69   : > { %4178 = vmatpush3.bf16.msra.mxu1 %v2810_v59  ;;  %4184 = vmatpush3.bf16.msra.mxu0 %v2859_v58  ;;  %4437 = vpow2.f32 %v2745_v21 }
 0xa6a   : > { %4189 = vmatprep.subr.bf16.mxu1 %v5734_v56  ;;  %4195 = vmatprep.subr.bf16.mxu0 %v5734_v56  ;;  %4439 = vpow2.f32 %v2749_v39 }
 0xa6b   : > { %v2903_v61 = vpop.permute.xlu1 %2902 }
 0xa6c   : > { %v2908_v37 = vsel %vm1925_vm3, %v2903_v61, 0 }
 0xa6e   : > { %v5391_v54 = vpop.eup %4433 }
 0xa6f   : > { %v2767_v48 = vsel %vm1817_vm4, %v5391_v54, 0.0 }
 0xa70   : > { %2768 = vadd.xlane.f32.xlu0 %v2767_v48 }
 0xa72   : > { %v5395_v41 = vpop.eup %4435 }
 0xa73   : > { %v2773_v5 = vsel %vm1817_vm4, %v5395_v41, 0.0  ;;  %v5405_v43 = vpop.eup %4437 }
 0xa74   : > { %2774 = vadd.xlane.f32.xlu0 %v2773_v5  ;;  %v2764_v29 = vsel %vm1817_vm4, %v5405_v43, 0.0  ;;  %v5409_v10 = vpop.eup %4439 }
 0xa75   : > { %3049 = vrot.lane.b32.xlu1 %v5244_v53, %s4560_s20  ;;  %v2770_v16 = vsel %vm1817_vm4, %v5409_v10, 0.0 }
 0xa8a   : > { %3098 = vrot.lane.b32.xlu0 %v5250_v8, %s4560_s20 }
 0xa99   : > { %2765 = vadd.xlane.f32.xlu1 %v2764_v29 }
 0xa9c   : > { %v2730_v53 = vpop.xlane.xlu1 %2729 }
 0xa9d   : > { %v2738_v22 = vsub.f32 %v5359_v23, %v2730_v53  ;;  %2771 = vadd.xlane.f32.xlu1 %v2770_v16 }
 0xa9f   : > { %v2753_v14 = vmul.f32 1.442695, %v2738_v22 }
 0xaa1   : > { %4441 = vpow2.f32 %v2753_v14 }
 0xaab   : > { %v5414_v8 = vpop.eup %4441 }
 0xaac   : > { %v2776_v50 = vsel %vm1817_vm4, %v5414_v8, 0.0 }
 0xaad   : > { %2777 = vadd.xlane.f32.xlu1 %v2776_v50 }
 0xaba   : > { %v2757_v11 = vpop.xlane.xlu0 %2756 }
 0xabb   : > { %4443 = vrcp.f32 %v2757_v11 }
 0xabe   : > { %3147 = vrot.lane.b32.xlu1 %v5266_v24, %s4560_s20 }
 0xac2   : > { %v2763_v62 = vpop.xlane.xlu0 %2762 }
 0xac3   : > { %4445 = vrcp.f32 %v2763_v62 }
 0xac5   : > { %v4444_v49 = vpop.eup %4443 }
 0xac6   : > { %v2787_v34 = vmul.f32 %v4444_v49, %v5371_v35  ;;  %v3001_v24 = vpop.permute.xlu0 %3000  ;;  %v2952_v35 = vpop.permute.xlu1 %2951 }
 0xac7   : > { %v3006_v55 = vsel %vm1925_vm3, %v3001_v24, 0  ;;  %v2957_v58 = vsel %vm1925_vm3, %v2952_v35, 0 }
 0xac8   : > { %v2795_v23 = vpack.c.bf16 %v2787_v34, %v2787_v34 }
 0xaca   : > { %4180 = vmatmul.mubr.msk.bf16.vlgmr.msra.gmra.mrb[64].mxu1 %vm1817_vm4, %v2795_v23 }
 0xacb   : > { %4190 = vmatpush3.bf16.msra.mxu1 %v2908_v37  ;;  %4191 = vmatprep.mubr.msk.bf16.mxu1 %vm4559_vm1, %v5734_v56 }
 0xacc   : > { %4201 = vmatprep.subr.bf16.mxu1 %v5734_v56 }
 0xacd   : > { %v4446_v18 = vpop.eup %4445 }
 0xace   : > { %v2789_v63 = vmul.f32 %v4446_v18, %v5375_v44 }
 0xad0   : > { %v2797_v4 = vpack.c.bf16 %v2789_v63, %v2789_v63 }
 0xad2   : > { %4192 = vmatmul.mubr.msk.bf16.vlgmr.msra.gmra.mrb[68].mxu1 %vm1817_vm4, %v2797_v4 }
 0xad3   : > { %4202 = vmatpush3.bf16.msra.mxu1 %v3006_v55  ;;  %4203 = vmatprep.mubr.msk.bf16.mxu1 %vm4559_vm1, %v5734_v56 }
 0xad4   : > { %4213 = vmatprep.subr.bf16.mxu1 %v5734_v56 }
 0xaf1   : > { %v2760_v15 = vpop.xlane.xlu1 %2759 }
 0xaf2   : > { %4447 = vrcp.f32 %v2760_v15 }
 0xaf5   : > { %v3050_v29 = vpop.permute.xlu1 %3049 }
 0xaf6   : > { %v3055_v11 = vsel %vm1925_vm3, %v3050_v29, 0 }
 0xafc   : > { %v4448_v9 = vpop.eup %4447 }
 0xafd   : > { %v2788_v28 = vmul.f32 %v4448_v9, %v5382_v7  ;;  %v2769_v42 = vpop.xlane.xlu0 %2768 }
 0xafe   : > { %4449 = vrcp.f32 %v2769_v42 }
 0xaff   : > { %v2796_v44 = vpack.c.bf16 %v2788_v28, %v2788_v28 }
 0xb01   : > { %4186 = vmatmul.mubr.msk.bf16.vlgmr.msra.gmra.mrb[88].mxu0 %vm1817_vm4, %v2796_v44  ;;  %v2775_v59 = vpop.xlane.xlu0 %2774  ;;  %v4307_v44 = vld [vmem:[%s5720_s4] sm:$0xff]  }
 0xb02   : > { %4196 = vmatpush3.bf16.msra.mxu0 %v2957_v58  ;;  %4197 = vmatprep.mubr.msk.bf16.mxu0 %vm4559_vm1, %v5734_v56  ;;  %4451 = vrcp.f32 %v2775_v59  ;;  %v4308_v58 = vld [vmem:[%s5720_s4 + $0x8] sm:$0xff]  }
 0xb03   : > { %4207 = vmatprep.subr.bf16.mxu0 %v5734_v56 }
 0xb05   : > { %v3099_v26 = vpop.permute.xlu0 %3098 }
 0xb06   : > { %v3104_v47 = vsel %vm1925_vm3, %v3099_v26, 0 }
 0xb08   : > { %v4450_v48 = vpop.eup %4449 }
 0xb09   : > { %v2791_v5 = vmul.f32 %v4450_v48, %v5391_v54 }
 0xb0b   : > { %v2799_v7 = vpack.c.bf16 %v2791_v5, %v2791_v5  ;;  %v4309_v5 = vld [vmem:[%s5720_s4 + $0x10] sm:$0xff]  }
 0xb0c   : > { %v4452_v21 = vpop.eup %4451 }
 0xb0d   : > { %4204 = vmatmul.mubr.msk.bf16.vlgmr.msra.gmra.mrb[72].mxu1 %vm1817_vm4, %v2799_v7  ;;  %v2793_v39 = vmul.f32 %v4452_v21, %v5395_v41  ;;  %v4310_v21 = vld [vmem:[%s5720_s4 + $0x18] sm:$0xff]  }
 0xb0e   : > { %4214 = vmatpush3.bf16.msra.mxu1 %v3104_v47  ;;  %4215 = vmatprep.mubr.msk.bf16.mxu1 %vm4559_vm1, %v5734_v56 }
 0xb0f   : > { %v2801_v61 = vpack.c.bf16 %v2793_v39, %v2793_v39  ;;  %4225 = vmatprep.subr.bf16.mxu1 %v4307_v44 }
 0xb15   : > { %4216 = vmatmul.mubr.msk.bf16.vlgmr.msra.gmra.mrb[76].mxu1 %vm1817_vm4, %v2801_v61  ;;  %v4311_v61 = vld [vmem:[%s5720_s4 + $0x20] sm:$0xff]  }
 0xb16   : > { %4226 = vmatpush3.bf16.msra.mxu1 %v4307_v44 }
 0xb17   : > { %4227 = vmatprep.subr.bf16.mxu1 %v4308_v58 }
 0xb1a   : > { %4228 = vmatpush3.bf16.msra.mxu1 %v4308_v58 }
 0xb1b   : > { %4229 = vmatprep.subr.bf16.mxu1 %v4309_v5 }
 0xb1e   : > { %4230 = vmatpush3.bf16.msra.mxu1 %v4309_v5  ;;  %v1380_v5 = vadd.f32 %v5122_v27, %v5109_v20 }
 0xb1f   : > { %4231 = vmatprep.subr.bf16.mxu1 %v4310_v21 }
 0xb22   : > { %4232 = vmatpush3.bf16.msra.mxu1 %v4310_v21 }
 0xb23   : > { %4233 = vmatprep.subr.bf16.mxu1 %v4311_v61 }
 0xb26   : > { %v2766_v53 = vpop.xlane.xlu1 %2765  ;;  %4234 = vmatpush3.bf16.msra.mxu1 %v4311_v61 }
 0xb27   : > { %4453 = vrcp.f32 %v2766_v53 }
 0xb2a   : > { %v2772_v54 = vpop.xlane.xlu1 %2771 }
 0xb2b   : > { %4455 = vrcp.f32 %v2772_v54  ;;  %v4312_v54 = vld [vmem:[%s5720_s4 + $0x28] sm:$0xff]  }
 0xb2c   : > { %4235 = vmatprep.subr.bf16.mxu1 %v4312_v54 }
 0xb2d   : > { %4236 = vmatpush3.bf16.msra.mxu1 %v4312_v54 }
 0xb31   : > { %v4454_v16 = vpop.eup %4453 }
 0xb32   : > { %v2790_v22 = vmul.f32 %v4454_v16, %v5405_v43  ;;  %v1376_v16 = vadd.f32 %v5122_v27, %v5059_v6  ;;  %v4314_v6 = vld [vmem:[%s5720_s4 + $0x38] sm:$0xff]  }
 0xb34   : > { %v2798_v14 = vpack.c.bf16 %v2790_v22, %v2790_v22  ;;  %v4313_v22 = vld [vmem:[%s5720_s4 + $0x30] sm:$0xff]  }
 0xb35   : > { %v4456_v50 = vpop.eup %4455  ;;  %4237 = vmatprep.subr.bf16.mxu1 %v4313_v22 }
 0xb36   : > { %4198 = vmatmul.mubr.msk.bf16.vlgmr.msra.gmra.mrb[92].mxu0 %vm1817_vm4, %v2798_v14  ;;  %v2792_v41 = vmul.f32 %v4456_v50, %v5409_v10  ;;  %v3869_v14 = vmul.f32 -1.442695, %v1376_v16  ;;  %v1378_v50 = vadd.f32 %v5122_v27, %v5087_v60  ;;  %4238 = vmatpush3.bf16.msra.mxu1 %v4313_v22 }
 0xb37   : > { %4208 = vmatpush3.bf16.msra.mxu0 %v3055_v11  ;;  %4209 = vmatprep.mubr.msk.bf16.mxu0 %vm4559_vm1, %v5734_v56 }
 0xb38   : > { %4219 = vmatprep.subr.bf16.mxu0 %v5734_v56  ;;  %v2800_v49 = vpack.c.bf16 %v2792_v41, %v2792_v41  ;;  %v3871_v11 = vmul.f32 -1.442695, %v1378_v50  ;;  %4239 = vmatprep.subr.bf16.mxu1 %v4314_v6 }
 0xb3a   : > { %v2778_v62 = vpop.xlane.xlu1 %2777  ;;  %4240 = vmatpush3.bf16.msra.mxu1 %v4314_v6 }
 0xb3b   : > { %4457 = vrcp.f32 %v2778_v62 }
 0xb3c   : > { %4459 = vpow2.f32 %v3869_v14 }
 0xb3d   : > { %4461 = vpow2.f32 %v3871_v11  ;;  %v1379_v11 = vadd.f32 %v5122_v27, %v5094_v36 }
 0xb3e   : > { %4210 = vmatmul.mubr.msk.bf16.vlgmr.msra.gmra.mrb[96].mxu0 %vm1817_vm4, %v2800_v49  ;;  %v3148_v43 = vpop.permute.xlu1 %3147 }
 0xb3f   : > { %v3153_v34 = vsel %vm1925_vm3, %v3148_v43, 0  ;;  %4221 = vmatprep.mubr.msk.bf16.mxu0 %vm4559_vm1, %v5734_v56 }
 0xb40   : > { %4220 = vmatpush3.bf16.msra.mxu0 %v3153_v34 }
 0xb45   : > { %v4458_v23 = vpop.eup %4457 }
 0xb46   : > { %v2794_v37 = vmul.f32 %v4458_v23, %v5414_v8  ;;  %v4460_v41 = vpop.eup %4459 }
 0xb47   : > { %v1408_v62 = vadd.f32 1.0, %v4460_v41  ;;  %v4462_v49 = vpop.eup %4461 }
 0xb48   : > { %v2802_v18 = vpack.c.bf16 %v2794_v37, %v2794_v37  ;;  %v1410_v23 = vadd.f32 1.0, %v4462_v49  ;;  %v3872_v49 = vmul.f32 -1.442695, %v1379_v11 }
 0xb49   : > { %4463 = vrcp.f32 %v1408_v62 }
 0xb4a   : > { %4222 = vmatmul.mubr.msk.bf16.vlgmr.msra.gmra.mrb[100].mxu0 %vm1817_vm4, %v2802_v18  ;;  %4465 = vrcp.f32 %v1410_v23 }
 0xb9d   : > { %v2846_v10 = vpop.f32.mrb[64].mxu1 }
 0xb9e   : > { %3203 = vrot.lane.b32.xlu0 %v2846_v10, %s4560_s20  ;;  %v4181_v63 = vpop.f32.mrb[65].mxu1  ;;  %v4464_v10 = vpop.eup %4463 }
 0xb9f   : > { %v2849_v24 = vpop.f32.mrb[66].mxu1 }
 0xba0   : > { %v4182_v4 = vpop.f32.mrb[67].mxu1 }
 0xba5   : > { %v2944_v55 = vpop.f32.mrb[68].mxu1 }
 0xba6   : > { %3207 = vrot.lane.b32.xlu0 %v2944_v55, %s4560_s20  ;;  %v4193_v35 = vpop.f32.mrb[69].mxu1 }
 0xba7   : > { %v2947_v15 = vpop.f32.mrb[70].mxu1 }
 0xba8   : > { %v4194_v9 = vpop.f32.mrb[71].mxu1 }
 0xbd4   : > { %v2895_v56 = vpop.f32.mrb[88].mxu0 }
 0xbd5   : > { %v4187_v28 = vpop.f32.mrb[89].mxu0  ;;  %3205 = vrot.lane.b32.xlu1 %v2895_v56, %s4560_s20  ;;  %v4466_v56 = vpop.eup %4465 }
 0xbd6   : > { %v2898_v8 = vpop.f32.mrb[90].mxu0 }
 0xbd7   : > { %v4188_v42 = vpop.f32.mrb[91].mxu0 }
 0xbe0   : > { %v3042_v59 = vpop.f32.mrb[72].mxu1 }
 0xbe1   : > { %3211 = vrot.lane.b32.xlu0 %v3042_v59, %s4560_s20  ;;  %v4205_v48 = vpop.f32.mrb[73].mxu1 }
 0xbe2   : > { %v3045_v26 = vpop.f32.mrb[74].mxu1 }
 0xbe3   : > { %v4206_v7 = vpop.f32.mrb[75].mxu1  ;;  %v3873_v26 = vmul.f32 -1.442695, %v1380_v5 }
 0xbe8   : > { %v3140_v47 = vpop.f32.mrb[76].mxu1 }
 0xbe9   : > { %3215 = vrot.lane.b32.xlu0 %v3140_v47, %s4560_s20  ;;  %v4217_v39 = vpop.f32.mrb[77].mxu1 }
 0xbea   : > { %v3143_v29 = vpop.f32.mrb[78].mxu1 }
 0xbeb   : > { %v4218_v53 = vpop.f32.mrb[79].mxu1 }
 0xc09   : > { %v2993_v43 = vpop.f32.mrb[92].mxu0 }
 0xc0a   : > { %3209 = vrot.lane.b32.xlu1 %v2993_v43, %s4560_s20  ;;  %v4199_v34 = vpop.f32.mrb[93].mxu0  ;;  %v1381_v43 = vadd.f32 %v5122_v27, %v5116_v3 }
 0xc0b   : > { %v2996_v37 = vpop.f32.mrb[94].mxu0 }
 0xc0c   : > { %v4200_v60 = vpop.f32.mrb[95].mxu0  ;;  %v3874_v34 = vmul.f32 -1.442695, %v1381_v43 }
 0xc10   : > { %v3204_v18 = vpop.permute.xlu0 %3203 }
 0xc11   : > { %v3227_v63 = vsel %vm1448_vm2, %v5324_v46, %v3204_v18  ;;  %v3091_v24 = vpop.f32.mrb[96].mxu0  ;;  %v1377_v46 = vadd.f32 %v5122_v27, %v5065_v57 }
 0xc12   : > { %v3235_v4 = vmul.f32 %v4464_v10, %v3227_v63  ;;  %3213 = vrot.lane.b32.xlu1 %v3091_v24, %s4560_s20  ;;  %v4211_v55 = vpop.f32.mrb[97].mxu0 }
 0xc13   : > { %v3094_v35 = vpop.f32.mrb[98].mxu0  ;;  %v3870_v48 = vmul.f32 -1.442695, %v1377_v46 }
 0xc14   : > { %v4212_v15 = vpop.f32.mrb[99].mxu0 }
 0xc15   : > { %4467 = vpow2.f32 %v3870_v48 }
 0xc16   : > { %4469 = vpow2.f32 %v3873_v26 }
 0xc18   : > { %v3208_v9 = vpop.permute.xlu0 %3207 }
 0xc19   : > { %v3229_v28 = vsel %vm1448_vm2, %v5328_v30, %v3208_v9  ;;  %v3875_v30 = vmul.f32 -1.442695, %v5127_v38 }
 0xc1a   : > { %v3237_v8 = vmul.f32 %v4466_v56, %v3229_v28 }
 0xc1d   : > { %v3189_v42 = vpop.f32.mrb[100].mxu0 }
 0xc1e   : > { %3217 = vrot.lane.b32.xlu1 %v3189_v42, %s4560_s20  ;;  %v4223_v44 = vpop.f32.mrb[101].mxu0 }
 0xc1f   : > { %v3192_v58 = vpop.f32.mrb[102].mxu0  ;;  %v4468_v7 = vpop.eup %4467  ;;  %v4524_v44 = vld [vmem:[%s5721_s5] sm:$0xff] }
 0xc20   : > { %v4224_v59 = vpop.f32.mrb[103].mxu0  ;;  %v1409_v21 = vadd.f32 1.0, %v4468_v7  ;;  %v4470_v47 = vpop.eup %4469 }
 0xc21   : > { %v1412_v39 = vadd.f32 1.0, %v4470_v47 }
 0xc22   : > { %4471 = vrcp.f32 %v1409_v21 }
 0xc23   : > { %4473 = vpow2.f32 %v3875_v30 }
 0xc24   : > { %4475 = vrcp.f32 %v1412_v39 }
 0xc2c   : > { %v4472_v29 = vpop.eup %4471 }
 0xc2d   : > { %v4474_v54 = vpop.eup %4473 }
 0xc2e   : > { %v1414_v20 = vadd.f32 1.0, %v4474_v54  ;;  %v4476_v14 = vpop.eup %4475 }
 0xc30   : > { %4477 = vrcp.f32 %v1414_v20 }
 0xc31   : > { %4479 = vpow2.f32 %v3872_v49 }
 0xc32   : > { %4481 = vpow2.f32 %v3874_v34 }
 0xc3a   : > { %v4478_v41 = vpop.eup %4477 }
 0xc3b   : > { %v4480_v23 = vpop.eup %4479 }
 0xc3c   : > { %v1411_v37 = vadd.f32 1.0, %v4480_v23  ;;  %v4482_v60 = vpop.eup %4481 }
 0xc3d   : > { %v1413_v36 = vadd.f32 1.0, %v4482_v60 }
 0xc3e   : > { %4483 = vrcp.f32 %v1411_v37 }
 0xc47   : > { %v3206_v61 = vpop.permute.xlu1 %3205 }
 0xc48   : > { %v3228_v57 = vsel %vm1448_vm2, %v5326_v19, %v3206_v61  ;;  %v4484_v10 = vpop.eup %4483 }
 0xc49   : > { %v3236_v53 = vmul.f32 %v4472_v29, %v3228_v57 }
 0xc4b   : > { %v3243_v16 = vpack.c.bf16 %v3236_v53, %v3235_v4 }
 0xc4d   : > { %4241 = vmatprep.mubr.bf16.mxu1 %v3243_v16 }
 0xc53   : > { %v3212_v22 = vpop.permute.xlu0 %3211 }
 0xc54   : > { %v3231_v38 = vsel %vm1448_vm2, %v5332_v45, %v3212_v22  ;;  %v3876_v45 = vmul.f32 -1.442695, %v5132_v31 }
 0xc55   : > { %v3239_v50 = vmul.f32 %v4476_v14, %v3231_v38 }
 0xc56   : > { %4485 = vpow2.f32 %v3876_v45 }
 0xc57   : > { %4487 = vrcp.f32 %v1413_v36 }
 0xc5b   : > { %v3216_v6 = vpop.permute.xlu0 %3215 }
 0xc5c   : > { %v3233_v19 = vsel %vm1448_vm2, %v5336_v33, %v3216_v6  ;;  %v5735_v6 = vld [vmem:[#allocation4_spill] sm:$0xff] }
 0xc5d   : > { %v3241_v62 = vmul.f32 %v4478_v41, %v3233_v19 }
 0xc60   : > { %v4486_v24 = vpop.eup %4485 }
 0xc61   : > { %v1415_v3 = vadd.f32 1.0, %v4486_v24  ;;  %v4488_v55 = vpop.eup %4487 }
 0xc63   : > { %4489 = vrcp.f32 %v1415_v3 }
 0xc6d   : > { %v4490_v56 = vpop.eup %4489 }
 0xc7c   : > { %v3210_v18 = vpop.permute.xlu1 %3209 }
 0xc7d   : > { %v3230_v33 = vsel %vm1448_vm2, %v5330_v40, %v3210_v18 }
 0xc7e   : > { %v3238_v63 = vmul.f32 %v4484_v10, %v3230_v33 }
 0xc80   : > { %v3244_v4 = vpack.c.bf16 %v3238_v63, %v3237_v8  ;;  %v3265_v8 = vsub.s32 7, %v4713_v17 }
 0xc82   : > { %4242 = vmatmul.mubr.bf16.vlgmr.msra.gmra.mrb[80].mxu1 %v3244_v4  ;;  %v3266_v58 = vrot.slane %v4524_v44, %v3265_v8 }
 0xc84   : > { %v3214_v27 = vpop.permute.xlu1 %3213 }
 0xc85   : > { %v3232_v31 = vsel %vm1448_vm2, %v5334_v0, %v3214_v27 }
 0xc86   : > { %v3240_v35 = vmul.f32 %v4488_v55, %v3232_v31 }
 0xc88   : > { %v3245_v15 = vpack.c.bf16 %v3240_v35, %v3239_v50 }
 0xc8a   : > { %4245 = vmatprep.mubr.bf16.mxu1 %v3245_v15 }
 0xc90   : > { %v3218_v9 = vpop.permute.xlu1 %3217 }
 0xc91   : > { %v3234_v28 = vsel %vm1448_vm2, %v5344_v2, %v3218_v9 }
 0xc92   : > { %v3242_v40 = vmul.f32 %v4490_v56, %v3234_v28 }
 0xc94   : > { %v3246_v42 = vpack.c.bf16 %v3242_v40, %v3241_v62 }
 0xc96   : > { %4246 = vmatmul.mubr.bf16.gmra.mrb[84].mxu1 %v3246_v42 }
 0xd55   : > { %v4243_v0 = vpop.f32.mrb[80].mxu1 }
 0xd56   : > { %v3358_v59 = vadd.f32 %v4243_v0, %v3266_v58  ;;  %v3349_v46 = vpop.f32.mrb[81].mxu1 }
 0xd57   : > { %v3350_v48 = vadd.f32 %v3349_v46, %v3266_v58  ;;  %v4244_v5 = vpop.f32.mrb[82].mxu1 }
 0xd58   : > { %v3382_v26 = vadd.f32 %v3358_v59, %v4953_v32  ;;  %v3352_v7 = vpop.f32.mrb[83].mxu1  ;;  %v3361_v30 = vadd.f32 %v4244_v5, %v3266_v58 }
 0xd59   : > { %v3353_v21 = vadd.f32 %v3352_v7, %v3266_v58  ;;  %v3380_v2 = vadd.f32 %v3350_v48, %v4941_v51 }
 0xd5a   : > { %v3394_v47 = vsel %vm421_vm0, %v3382_v26, 0.0  ;;  %v3383_v29 = vadd.f32 %v3361_v30, %v4951_v1 }
 0xd5b   : > { %v3381_v39 = vadd.f32 %v3353_v21, %v4943_v25  ;;  %3395 = vadd.xlane.f32.xlu0 %v3394_v47  ;;  %v3388_v57 = vsel %vm421_vm0, %v3380_v2, 0.0 }
 0xd5c   : > { %v3397_v32 = vsel %vm421_vm0, %v3383_v29, 0.0 }
 0xd5d   : > { %v3391_v61 = vsel %vm421_vm0, %v3381_v39, 0.0 }
 0xd5e   : > { %3392 = vadd.xlane.f32.xlu1 %v3391_v61 }
 0xd5f   : > { %3389 = vadd.xlane.f32.xlu0 %v3388_v57 }
 0xd63   : > { %3398 = vadd.xlane.f32.xlu0 %v3397_v32 }
 0xd69   : > { %v4247_v53 = vpop.f32.mrb[84].mxu1 }
 0xd6a   : > { %v3365_v54 = vpop.f32.mrb[85].mxu1  ;;  %v3374_v51 = vadd.f32 %v4247_v53, %v3266_v58 }
 0xd6b   : > { %v3366_v16 = vadd.f32 %v3365_v54, %v3266_v58  ;;  %v4248_v20 = vpop.f32.mrb[86].mxu1 }
 0xd6c   : > { %v3368_v22 = vpop.f32.mrb[87].mxu1  ;;  %v3377_v14 = vadd.f32 %v4248_v20, %v3266_v58  ;;  %v3386_v50 = vadd.f32 %v3374_v51, %v4970_v52  ;;  %v5583_v51 = vld [vmem:[%s5721_s5 + $0x8] sm:$0xf] }
 0xd6d   : > { %v3384_v25 = vadd.f32 %v3366_v16, %v4963_v12  ;;  %v3369_v38 = vadd.f32 %v3368_v22, %v3266_v58 }
 0xd6e   : > { %v3387_v41 = vadd.f32 %v3377_v14, %v5735_v6  ;;  %v3406_v62 = vsel %vm421_vm0, %v3386_v50, 0.0 }
 0xd6f   : > { %v3385_v1 = vadd.f32 %v3369_v38, %v4965_v13  ;;  %v3400_v11 = vsel %vm421_vm0, %v3384_v25, 0.0 }
 0xd70   : > { %3401 = vadd.xlane.f32.xlu0 %v3400_v11  ;;  %v3409_v49 = vsel %vm421_vm0, %v3387_v41, 0.0  ;;  %v5737_v11 = vld [vmem:[#allocation3_spill] sm:$0xff] }
 0xd71   : > { %v3403_v19 = vsel %vm421_vm0, %v3385_v1, 0.0  ;;  %v5592_v6 = vrot.slane %v5583_v51, %v5737_v11 }
 0xd72   : > { %3404 = vadd.xlane.f32.xlu1 %v3403_v19 }
 0xd74   : > { %3407 = vadd.xlane.f32.xlu0 %v3406_v62 }
 0xd76   : > { %3410 = vadd.xlane.f32.xlu1 %v3409_v49 }
 0xde8   : > { %v3396_v12 = vpop.xlane.xlu0 %3395 }
 0xde9   : > { %v3414_v43 = vmul.f32 0.03125, %v3396_v12 }
 0xdeb   : > { %v5540_v34 = vsub.f32 %v3382_v26, %v3414_v43  ;;  %v3393_v52 = vpop.xlane.xlu1 %3392 }
 0xdec   : > { %v3390_v13 = vpop.xlane.xlu0 %3389  ;;  %v3413_v45 = vmul.f32 0.03125, %v3393_v52  ;;  %v4525_v52 = vld [vmem:[%s4625_s11 + $0x10] sm:$0xff] }
 0xded   : > { %v3412_v23 = vmul.f32 0.03125, %v3390_v13  ;;  %v3430_v37 = vmul.f32 %v5540_v34, %v5540_v34 }
 0xdee   : > { %v5549_v63 = vsub.f32 %v3381_v39, %v3413_v45 }
 0xdef   : > { %v5544_v60 = vsub.f32 %v3380_v2, %v3412_v23  ;;  %v3442_v36 = vsel %vm421_vm0, %v3430_v37, 0.0 }
 0xdf0   : > { %3443 = vadd.xlane.f32.xlu0 %v3442_v36  ;;  %v3399_v18 = vpop.xlane.xlu0 %3398  ;;  %v3429_v55 = vmul.f32 %v5549_v63, %v5549_v63 }
 0xdf1   : > { %v3415_v10 = vmul.f32 0.03125, %v3399_v18  ;;  %v3428_v33 = vmul.f32 %v5544_v60, %v5544_v60 }
 0xdf2   : > { %v3439_v31 = vsel %vm421_vm0, %v3429_v55, 0.0 }
 0xdf3   : > { %v5551_v24 = vsub.f32 %v3383_v29, %v3415_v10  ;;  %v3436_v4 = vsel %vm421_vm0, %v3428_v33, 0.0 }
 0xdf4   : > { %3437 = vadd.xlane.f32.xlu0 %v3436_v4 }
 0xdf5   : > { %v3431_v3 = vmul.f32 %v5551_v24, %v5551_v24 }
 0xdf7   : > { %v3445_v27 = vsel %vm421_vm0, %v3431_v3, 0.0 }
 0xdf8   : > { %3446 = vadd.xlane.f32.xlu1 %v3445_v27  ;;  %v4526_v27 = vld [vmem:[%s4625_s11] sm:$0xff] }
 0xdfc   : > { %3440 = vadd.xlane.f32.xlu1 %v3439_v31 }
 0xdfd   : > { %v3402_v35 = vpop.xlane.xlu0 %3401 }
 0xdfe   : > { %v3416_v15 = vmul.f32 0.03125, %v3402_v35 }
 0xdff   : > { %v3405_v9 = vpop.xlane.xlu1 %3404 }
 0xe00   : > { %v5560_v56 = vsub.f32 %v3384_v25, %v3416_v15  ;;  %v3417_v28 = vmul.f32 0.03125, %v3405_v9  ;;  %v5736_v25 = vld [vmem:[#allocation2_spill] sm:$0xff] }
 0xe01   : > { %v3408_v40 = vpop.xlane.xlu0 %3407  ;;  %v5587_v14 = vrot.slane %v5583_v51, %v5736_v25 }
 0xe02   : > { %v5562_v42 = vsub.f32 %v3385_v1, %v3417_v28  ;;  %v3418_v8 = vmul.f32 0.03125, %v3408_v40  ;;  %v3432_v44 = vmul.f32 %v5560_v56, %v5560_v56 }
 0xe03   : > { %v3411_v58 = vpop.xlane.xlu1 %3410 }
 0xe04   : > { %v5566_v0 = vsub.f32 %v3386_v50, %v3418_v8  ;;  %v3419_v59 = vmul.f32 0.03125, %v3411_v58  ;;  %v3448_v46 = vsel %vm421_vm0, %v3432_v44, 0.0  ;;  %v3433_v48 = vmul.f32 %v5562_v42, %v5562_v42  ;;  %v4527_v58 = vld [vmem:[%s4625_s11 + $0x18] sm:$0xff] }
 0xe05   : > { %3449 = vadd.xlane.f32.xlu0 %v3448_v46 }
 0xe06   : > { %v5571_v5 = vsub.f32 %v3387_v41, %v3419_v59  ;;  %v3451_v26 = vsel %vm421_vm0, %v3433_v48, 0.0  ;;  %v3434_v7 = vmul.f32 %v5566_v0, %v5566_v0 }
 0xe07   : > { %3452 = vadd.xlane.f32.xlu1 %v3451_v26 }
 0xe08   : > { %v3454_v21 = vsel %vm421_vm0, %v3434_v7, 0.0  ;;  %v3435_v2 = vmul.f32 %v5571_v5, %v5571_v5  ;;  %v4528_v7 = vld [vmem:[%s4625_s11 + $0x8] sm:$0xff] }
 0xe09   : > { %3455 = vadd.xlane.f32.xlu0 %v3454_v21 }
 0xe0a   : > { %v3457_v30 = vsel %vm421_vm0, %v3435_v2, 0.0 }
 0xe0b   : > { %3458 = vadd.xlane.f32.xlu1 %v3457_v30 }
 0xe7d   : > { %v3444_v47 = vpop.xlane.xlu0 %3443 }
 0xe7e   : > { %v3462_v39 = vmul.f32 0.03125, %v3444_v47 }
 0xe80   : > { %v3470_v61 = vadd.f32 1e-05, %v3462_v39 }
 0xe81   : > { %v3438_v29 = vpop.xlane.xlu0 %3437 }
 0xe82   : > { %4491 = vrsqrt.f32 %v3470_v61  ;;  %v3460_v57 = vmul.f32 0.03125, %v3438_v29 }
 0xe84   : > { %v3468_v32 = vadd.f32 1e-05, %v3460_v57 }
 0xe85   : > { %v3447_v53 = vpop.xlane.xlu1 %3446 }
 0xe86   : > { %4493 = vrsqrt.f32 %v3468_v32  ;;  %v3463_v54 = vmul.f32 0.03125, %v3447_v53 }
 0xe88   : > { %v3471_v16 = vadd.f32 1e-05, %v3463_v54 }
 0xe89   : > { %v3441_v20 = vpop.xlane.xlu1 %3440 }
 0xe8a   : > { %4495 = vrsqrt.f32 %v3471_v16  ;;  %v3461_v22 = vmul.f32 0.03125, %v3441_v20  ;;  %v4529_v16 = vld [vmem:[%s4625_s11 + $0x20] sm:$0xff] }
 0xe8c   : > { %v4492_v38 = vpop.eup %4491  ;;  %v3469_v50 = vadd.f32 1e-05, %v3461_v22 }
 0xe8d   : > { %v3486_v1 = vmul.f32 %v4492_v38, %v5540_v34  ;;  %v4530_v38 = vld [vmem:[%s4625_s11 + $0x28] sm:$0xff] }
 0xe8e   : > { %4497 = vrsqrt.f32 %v3469_v50 }
 0xe8f   : > { %v3498_v41 = vmul.f32 %v5587_v14, %v3486_v1 }
 0xe90   : > { %v4494_v19 = vpop.eup %4493 }
 0xe91   : > { %v3510_v62 = vadd.f32 %v5592_v6, %v3498_v41  ;;  %v3484_v49 = vmul.f32 %v4494_v19, %v5544_v60  ;;  %v4531_v41 = vld [vmem:[%s4625_s11 + $0x30] sm:$0xff] }
 0xe92   : > { %v3450_v12 = vpop.xlane.xlu0 %3449 }
 0xe93   : > { %v3464_v43 = vmul.f32 0.03125, %v3450_v12  ;;  %v5598_v13 = vadd.f32 %v4525_v52, %v3510_v62  ;;  %v3496_v34 = vmul.f32 %v5587_v14, %v3484_v49  ;;  %v4532_v12 = vld [vmem:[%s4625_s11 + $0x38] sm:$0xff] }
 0xe94   : > { %v4496_v23 = vpop.eup %4495  ;;  %v3453_v37 = vpop.xlane.xlu1 %3452 }
 0xe95   : > { %v3472_v45 = vadd.f32 1e-05, %v3464_v43  ;;  %v3465_v36 = vmul.f32 0.03125, %v3453_v37  ;;  %v3530_v18 = vsel %vm421_vm0, %v5598_v13, 0.0  ;;  %v3508_v10 = vadd.f32 %v5592_v6, %v3496_v34 }
 0xe96   : > { %3531 = vadd.xlane.f32.xlu0 %v3530_v18  ;;  %v3456_v33 = vpop.xlane.xlu0 %3455  ;;  %v3487_v60 = vmul.f32 %v4496_v23, %v5551_v24 }
 0xe97   : > { %4499 = vrsqrt.f32 %v3472_v45  ;;  %v3473_v4 = vadd.f32 1e-05, %v3465_v36  ;;  %v3466_v3 = vmul.f32 0.03125, %v3456_v33  ;;  %v3516_v55 = vadd.f32 %v4526_v27, %v3508_v10 }
 0xe98   : > { %v4498_v31 = vpop.eup %4497  ;;  %v3459_v35 = vpop.xlane.xlu1 %3458  ;;  %v3499_v15 = vmul.f32 %v5587_v14, %v3487_v60 }
 0xe99   : > { %4501 = vrsqrt.f32 %v3473_v4  ;;  %v3474_v9 = vadd.f32 1e-05, %v3466_v3  ;;  %v3467_v28 = vmul.f32 0.03125, %v3459_v35  ;;  %v3524_v40 = vsel %vm421_vm0, %v3516_v55, 0.0 }
 0xe9a   : > { %3525 = vadd.xlane.f32.xlu0 %v3524_v40  ;;  %v3511_v8 = vadd.f32 %v5592_v6, %v3499_v15  ;;  %v3485_v24 = vmul.f32 %v4498_v31, %v5549_v63 }
 0xe9b   : > { %4503 = vrsqrt.f32 %v3474_v9  ;;  %v3475_v44 = vadd.f32 1e-05, %v3467_v28 }
 0xe9c   : > { %v3519_v59 = vadd.f32 %v4527_v58, %v3511_v8  ;;  %v3497_v46 = vmul.f32 %v5587_v14, %v3485_v24 }
 0xe9d   : > { %4505 = vrsqrt.f32 %v3475_v44 }
 0xe9e   : > { %v3533_v48 = vsel %vm421_vm0, %v3519_v59, 0.0  ;;  %v3509_v26 = vadd.f32 %v5592_v6, %v3497_v46 }
 0xe9f   : > { %3534 = vadd.xlane.f32.xlu1 %v3533_v48 }
 0xea0   : > { %v3517_v21 = vadd.f32 %v4528_v7, %v3509_v26 }
 0xea1   : > { %v4500_v2 = vpop.eup %4499 }
 0xea2   : > { %v3527_v30 = vsel %vm421_vm0, %v3517_v21, 0.0  ;;  %v3488_v63 = vmul.f32 %v4500_v2, %v5560_v56 }
 0xea3   : > { %v4502_v47 = vpop.eup %4501  ;;  %3528 = vadd.xlane.f32.xlu1 %v3527_v30 }
 0xea4   : > { %v3500_v39 = vmul.f32 %v5587_v14, %v3488_v63  ;;  %v3489_v61 = vmul.f32 %v4502_v47, %v5562_v42 }
 0xea5   : > { %v4504_v29 = vpop.eup %4503 }
 0xea6   : > { %v3512_v57 = vadd.f32 %v5592_v6, %v3500_v39  ;;  %v3501_v32 = vmul.f32 %v5587_v14, %v3489_v61  ;;  %v3490_v53 = vmul.f32 %v4504_v29, %v5566_v0 }
 0xea7   : > { %v4506_v54 = vpop.eup %4505 }
 0xea8   : > { %v3520_v20 = vadd.f32 %v4529_v16, %v3512_v57  ;;  %v3513_v56 = vadd.f32 %v5592_v6, %v3501_v32  ;;  %v3502_v22 = vmul.f32 %v5587_v14, %v3490_v53  ;;  %v3491_v25 = vmul.f32 %v4506_v54, %v5571_v5 }
 0xeaa   : > { %v3536_v42 = vsel %vm421_vm0, %v3520_v20, 0.0  ;;  %v3521_v50 = vadd.f32 %v4530_v38, %v3513_v56  ;;  %v3514_v1 = vadd.f32 %v5592_v6, %v3502_v22  ;;  %v3503_v11 = vmul.f32 %v5587_v14, %v3491_v25 }
 0xeab   : > { %3537 = vadd.xlane.f32.xlu0 %v3536_v42  ;;  %v5738_v38 = vsub.s32 2, %v4713_v17 }
 0xeac   : > { %v3539_v0 = vsel %vm421_vm0, %v3521_v50, 0.0  ;;  %v3522_v19 = vadd.f32 %v4531_v41, %v3514_v1  ;;  %v3515_v62 = vadd.f32 %v5592_v6, %v3503_v11 }
 0xead   : > { %3540 = vadd.xlane.f32.xlu1 %v3539_v0  ;;  %v5739_v0 = vsub.s32 3, %v4713_v17 }
 0xeae   : > { %v3542_v49 = vsel %vm421_vm0, %v3522_v19, 0.0  ;;  %v3523_v5 = vadd.f32 %v4532_v12, %v3515_v62 }
 0xeaf   : > { %3543 = vadd.xlane.f32.xlu0 %v3542_v49  ;;  %v3643_v41 = vrot.slane %v5583_v51, %v5739_v0 }
 0xeb0   : > { %v3545_v43 = vsel %vm421_vm0, %v3523_v5, 0.0 }
 0xeb1   : > { %3546 = vadd.xlane.f32.xlu1 %v3545_v43 }
 0xf23   : > { %v3532_v52 = vpop.xlane.xlu0 %3531 }
 0xf24   : > { %v3550_v34 = vmul.f32 0.03125, %v3532_v52 }
 0xf26   : > { %v5637_v14 = vsub.f32 %v5598_v13, %v3550_v34 }
 0xf27   : > { %v3526_v23 = vpop.xlane.xlu0 %3525 }
 0xf28   : > { %v3548_v37 = vmul.f32 0.03125, %v3526_v23  ;;  %v3566_v45 = vmul.f32 %v5637_v14, %v5637_v14 }
 0xf2a   : > { %v5641_v6 = vsub.f32 %v3516_v55, %v3548_v37  ;;  %v3578_v36 = vsel %vm421_vm0, %v3566_v45, 0.0 }
 0xf2b   : > { %3579 = vadd.xlane.f32.xlu0 %v3578_v36 }
 0xf2c   : > { %v3535_v18 = vpop.xlane.xlu1 %3534  ;;  %v3564_v10 = vmul.f32 %v5641_v6, %v5641_v6 }
 0xf2d   : > { %v3551_v33 = vmul.f32 0.03125, %v3535_v18 }
 0xf2e   : > { %v3572_v60 = vsel %vm421_vm0, %v3564_v10, 0.0 }
 0xf2f   : > { %v5647_v4 = vsub.f32 %v3519_v59, %v3551_v33  ;;  %3573 = vadd.xlane.f32.xlu0 %v3572_v60 }
 0xf30   : > { %v3529_v13 = vpop.xlane.xlu1 %3528 }
 0xf31   : > { %v3549_v3 = vmul.f32 0.03125, %v3529_v13  ;;  %v3567_v27 = vmul.f32 %v5647_v4, %v5647_v4 }
 0xf33   : > { %v5651_v55 = vsub.f32 %v3517_v21, %v3549_v3  ;;  %v3581_v31 = vsel %vm421_vm0, %v3567_v27, 0.0 }
 0xf34   : > { %3582 = vadd.xlane.f32.xlu1 %v3581_v31 }
 0xf35   : > { %v3565_v35 = vmul.f32 %v5651_v55, %v5651_v55 }
 0xf37   : > { %v3575_v15 = vsel %vm421_vm0, %v3565_v35, 0.0 }
 0xf38   : > { %3576 = vadd.xlane.f32.xlu1 %v3575_v15  ;;  %v3538_v9 = vpop.xlane.xlu0 %3537 }
 0xf39   : > { %v3552_v28 = vmul.f32 0.03125, %v3538_v9 }
 0xf3a   : > { %v3541_v40 = vpop.xlane.xlu1 %3540 }
 0xf3b   : > { %v5657_v8 = vsub.f32 %v3520_v20, %v3552_v28  ;;  %v3553_v24 = vmul.f32 0.03125, %v3541_v40 }
 0xf3c   : > { %v3544_v44 = vpop.xlane.xlu0 %3543 }
 0xf3d   : > { %v5659_v58 = vsub.f32 %v3521_v50, %v3553_v24  ;;  %v3554_v59 = vmul.f32 0.03125, %v3544_v44  ;;  %v3568_v46 = vmul.f32 %v5657_v8, %v5657_v8  ;;  %v3631_v50 = vrot.slane %v5583_v51, %v5738_v38 }
 0xf3e   : > { %v3547_v48 = vpop.xlane.xlu1 %3546 }
 0xf3f   : > { %v5663_v26 = vsub.f32 %v3522_v19, %v3554_v59  ;;  %v3555_v7 = vmul.f32 0.03125, %v3547_v48  ;;  %v3584_v21 = vsel %vm421_vm0, %v3568_v46, 0.0  ;;  %v3569_v2 = vmul.f32 %v5659_v58, %v5659_v58 }
 0xf40   : > { %3585 = vadd.xlane.f32.xlu0 %v3584_v21 }
 0xf41   : > { %v5668_v30 = vsub.f32 %v3523_v5, %v3555_v7  ;;  %v3587_v63 = vsel %vm421_vm0, %v3569_v2, 0.0  ;;  %v3570_v47 = vmul.f32 %v5663_v26, %v5663_v26 }
 0xf42   : > { %3588 = vadd.xlane.f32.xlu1 %v3587_v63 }
 0xf43   : > { %v3590_v39 = vsel %vm421_vm0, %v3570_v47, 0.0  ;;  %v3571_v61 = vmul.f32 %v5668_v30, %v5668_v30 }
 0xf44   : > { %3591 = vadd.xlane.f32.xlu0 %v3590_v39 }
 0xf45   : > { %v3593_v29 = vsel %vm421_vm0, %v3571_v61, 0.0 }
 0xf46   : > { %3594 = vadd.xlane.f32.xlu1 %v3593_v29 }
 0xfb8   : > { %v3580_v57 = vpop.xlane.xlu0 %3579 }
 0xfb9   : > { %v3598_v32 = vmul.f32 0.03125, %v3580_v57 }
 0xfbb   : > { %v3606_v53 = vadd.f32 1e-05, %v3598_v32 }
 0xfbc   : > { %v3574_v54 = vpop.xlane.xlu0 %3573 }
 0xfbd   : > { %4507 = vrsqrt.f32 %v3606_v53  ;;  %v3596_v16 = vmul.f32 0.03125, %v3574_v54 }
 0xfbf   : > { %v3604_v20 = vadd.f32 1e-05, %v3596_v16 }
 0xfc1   : > { %4509 = vrsqrt.f32 %v3604_v20  ;;  %v3583_v56 = vpop.xlane.xlu1 %3582 }
 0xfc2   : > { %v3599_v22 = vmul.f32 0.03125, %v3583_v56 }
 0xfc4   : > { %v3607_v25 = vadd.f32 1e-05, %v3599_v22 }
 0xfc5   : > { %v3577_v42 = vpop.xlane.xlu1 %3576 }
 0xfc6   : > { %4511 = vrsqrt.f32 %v3607_v25  ;;  %v3597_v1 = vmul.f32 0.03125, %v3577_v42 }
 0xfc7   : > { %v4508_v11 = vpop.eup %4507 }
 0xfc8   : > { %v3622_v19 = vmul.f32 %v4508_v11, %v5637_v14  ;;  %v3605_v62 = vadd.f32 1e-05, %v3597_v1 }
 0xfca   : > { %v3634_v49 = vmul.f32 %v3631_v50, %v3622_v19  ;;  %4513 = vrsqrt.f32 %v3605_v62 }
 0xfcb   : > { %v4510_v12 = vpop.eup %4509 }
 0xfcc   : > { %v3646_v5 = vadd.f32 %v3643_v41, %v3634_v49  ;;  %v3620_v43 = vmul.f32 %v4510_v12, %v5641_v6 }
 0xfcd   : > { %v3586_v52 = vpop.xlane.xlu0 %3585 }
 0xfce   : > { %3654 = vst.msk [vmem:[%s4625_s11 + $0x10] sm:$0xff] %vm421_vm0, %v3646_v5  ;;  %v3632_v34 = vmul.f32 %v3631_v50, %v3620_v43  ;;  %v3600_v23 = vmul.f32 0.03125, %v3586_v52 }
 0xfcf   : > { %v3589_v37 = vpop.xlane.xlu1 %3588 }
 0xfd0   : > { %v4512_v45 = vpop.eup %4511  ;;  %v3644_v17 = vadd.f32 %v3643_v41, %v3632_v34  ;;  %v3608_v36 = vadd.f32 1e-05, %v3600_v23  ;;  %v3601_v51 = vmul.f32 0.03125, %v3589_v37 }
 0xfd1   : > { %v3623_v14 = vmul.f32 %v4512_v45, %v5647_v4  ;;  %v3592_v18 = vpop.xlane.xlu0 %3591 }
 0xfd2   : > { %3652 = vst.msk [vmem:[%s4625_s11] sm:$0xff] %vm421_vm0, %v3644_v17  ;;  %4515 = vrsqrt.f32 %v3608_v36  ;;  %v3609_v10 = vadd.f32 1e-05, %v3601_v51  ;;  %v3602_v6 = vmul.f32 0.03125, %v3592_v18 }
 0xfd3   : > { %v3635_v33 = vmul.f32 %v3631_v50, %v3623_v14  ;;  %v3595_v60 = vpop.xlane.xlu1 %3594 }
 0xfd4   : > { %v4514_v13 = vpop.eup %4513  ;;  %4517 = vrsqrt.f32 %v3609_v10  ;;  %v3610_v3 = vadd.f32 1e-05, %v3602_v6  ;;  %v3603_v27 = vmul.f32 0.03125, %v3595_v60 }
 0xfd5   : > { %v3647_v31 = vadd.f32 %v3643_v41, %v3635_v33  ;;  %v3621_v35 = vmul.f32 %v4514_v13, %v5651_v55 }
 0xfd6   : > { %4519 = vrsqrt.f32 %v3610_v3  ;;  %v3611_v15 = vadd.f32 1e-05, %v3603_v27 }
 0xfd7   : > { %3655 = vst.msk [vmem:[%s4625_s11 + $0x18] sm:$0xff] %vm421_vm0, %v3647_v31  ;;  %v3633_v4 = vmul.f32 %v3631_v50, %v3621_v35 }
 0xfd8   : > { %4521 = vrsqrt.f32 %v3611_v15 }
 0xfd9   : > { %v3645_v9 = vadd.f32 %v3643_v41, %v3633_v4 }
 0xfdb   : > { %3653 = vst.msk [vmem:[%s4625_s11 + $0x8] sm:$0xff] %vm421_vm0, %v3645_v9 }
 0xfdc   : > { %v4516_v28 = vpop.eup %4515 }
 0xfdd   : > { %v3624_v40 = vmul.f32 %v4516_v28, %v5657_v8 }
 0xfde   : > { %v4518_v24 = vpop.eup %4517 }
 0xfdf   : > { %v3636_v44 = vmul.f32 %v3631_v50, %v3624_v40  ;;  %v3625_v55 = vmul.f32 %v4518_v24, %v5659_v58 }
 0xfe0   : > { %v4520_v59 = vpop.eup %4519 }
 0xfe1   : > { %v3648_v46 = vadd.f32 %v3643_v41, %v3636_v44  ;;  %v3637_v48 = vmul.f32 %v3631_v50, %v3625_v55  ;;  %v3626_v7 = vmul.f32 %v4520_v59, %v5663_v26 }
 0xfe2   : > { %v4522_v21 = vpop.eup %4521 }
 0xfe3   : > { %3656 = vst.msk [vmem:[%s4625_s11 + $0x20] sm:$0xff] %vm421_vm0, %v3648_v46  ;;  %v3649_v2 = vadd.f32 %v3643_v41, %v3637_v48  ;;  %v3638_v63 = vmul.f32 %v3631_v50, %v3626_v7  ;;  %v3627_v47 = vmul.f32 %v4522_v21, %v5668_v30 }
 0xfe5   : > { %3657 = vst.msk [vmem:[%s4625_s11 + $0x28] sm:$0xff] %vm421_vm0, %v3649_v2  ;;  %v3650_v8 = vadd.f32 %v3643_v41, %v3638_v63  ;;  %v3639_v39 = vmul.f32 %v3631_v50, %v3627_v47 }
 0xfe7   : > { %3658 = vst.msk [vmem:[%s4625_s11 + $0x30] sm:$0xff] %vm421_vm0, %v3650_v8  ;;  %v3651_v61 = vadd.f32 %v3643_v41, %v3639_v39 }
 0xfe9   : > { %3659 = vst.msk [vmem:[%s4625_s11 + $0x38] sm:$0xff] %vm421_vm0, %v3651_v61 }
 0xfea PF: > { %s17_s26 = sadd.s32 1, %s4555_s26   ;;  %s5740_s24 = smov %s4551_s25 }
 0xfeb   : > { %p14_p5 = scmp.ge.s32.totalorder %s17_s26, 4   ;;  %s5741_s25 = smov %s5743_s27 }
 0xfed   :  { %16 = sbr.rel (!%p14_p5) target bundleno = 2 (0x2), region = 100 }

</bundles_post_ra>
